<compile_context>
chip_gen: v7x
topology: tpu7x:2x2x1
jax: 0.10.0
libtpu: 0.0.40
codegen_flags: <defaults>
</compile_context>

<pallas_src>
import functools

import jax
import jax.numpy as jnp
from jax import lax
from jax.experimental import pallas as pl
from jax.experimental.pallas import tpu as pltpu

NUM_CLASSES = 5   # TODO(synk): NUM_CLASSES is undefined in the source snippet; fixed to 5 here.
OUT_PAD = 128     # lane-dense padded width of the final Linear / output block
K = 5             # conv kernel size (both convs)


def ecg_cnn_kernel(xe_ref, xo_ref, w1_ref, b1_ref, w2_ref, b2_ref,
                   w3_ref, b3_ref, w4_ref, b4_ref, o_ref):
    xe = xe_ref[...]                     # (TB, L/2)  even input samples
    xo = xo_ref[...]                     # (TB, L/2)  odd  input samples
    TB, Lh = xe.shape
    L = 2 * Lh
    L1 = L - K + 1                       # conv1 'valid' length
    L2 = L1 // 2                         # after MaxPool1d(2)
    L3 = L2 - K + 1                      # conv2 'valid' length

    w1 = w1_ref[...]                     # (5, 32)  = (tap, out_ch)
    b1 = b1_ref[...]                     # (1, 32)

    def tap(v, i):                       # (TB, L2, 1) contiguous tap slice
        return v[:, i:i + L2][:, :, None]

    def w1k(k):                          # (1, 1, 32)
        return w1[k:k + 1, :][None]

    # ---- Conv1d(1,32,5) evaluated at even / odd positions; MaxPool1d(2) fused
    #      as a single elementwise max (VPU only, no strided gather). ----------
    # even position 2q uses x[2q+k]; odd position 2q+1 uses x[2q+1+k].
    h1e = (b1[None]
           + tap(xe, 0) * w1k(0) + tap(xo, 0) * w1k(1) + tap(xe, 1) * w1k(2)
           + tap(xo, 1) * w1k(3) + tap(xe, 2) * w1k(4))
    h1o = (b1[None]
           + tap(xo, 0) * w1k(0) + tap(xe, 1) * w1k(1) + tap(xo, 1) * w1k(2)
           + tap(xe, 2) * w1k(3) + tap(xo, 2) * w1k(4))
    # relu(max(a,b)) == max(relu(a), relu(b)) == pooled post-ReLU activations
    pooled = jnp.maximum(jnp.maximum(h1e, h1o), 0.0)          # (TB, L2, 32)

    # ---- Conv1d(32,64,5) + ReLU as ONE im2col matmul on the MXU -------------
    patches = jnp.concatenate([pooled[:, k:k + L3, :] for k in range(K)],
                              axis=-1)                        # (TB, L3, 160)
    p2d = patches.reshape(TB * L3, K * 32)                    # (TB*L3, 160)
    h2 = jnp.dot(p2d, w2_ref[...],
                 preferred_element_type=jnp.float32) + b2_ref[...]
    h2 = jnp.maximum(h2, 0.0).reshape(TB, L3, 64)             # (TB, L3, 64)

    # ---- AdaptiveAvgPool1d(1) + Flatten -------------------------------------
    g = jnp.mean(h2, axis=1)                                  # (TB, 64)

    # ---- Linear(64,64) + ReLU ------------------------------------------------
    z = jnp.maximum(
        jnp.dot(g, w3_ref[...], preferred_element_type=jnp.float32) + b3_ref[...],
        0.0)

    # ---- Linear(64, NUM_CLASSES padded to 128) + Sigmoid ---------------------
    logits = jnp.dot(z, w4_ref[...],
                     preferred_element_type=jnp.float32) + b4_ref[...]
    o_ref[...] = jax.nn.sigmoid(logits)                       # (TB, 128)


@functools.partial(jax.jit, static_argnames=("tb",))
def ecg_cnn_forward(x, params, tb=None):
    """x: (B, 1, L) float32 (PyTorch NCL). Returns (B, NUM_CLASSES)."""
    w1, b1, w2, b2, w3, b3, w4, b4 = params
    B, cin, L = x.shape
    assert cin == 1
    assert L % 2 == 0 and L >= 14, "fused-pool formulation needs even L >= 14"
    nc = w4.shape[0]

    # ---- batch tile: biggest reasonable tile, sublane (8) aligned -----------
    # (re-derive the cap per generation: v7x has only 64 MiB VMEM.)
    if tb is None:
        tb = B if B <= 128 else 128
    if tb != B and tb % 8 != 0:
        tb = min(((tb + 7) // 8) * 8, B)
    n_blk = pl.cdiv(B, tb)
    Bp = n_blk * tb

    # ---- glue (pure XLA reshapes/transposes, done once) ---------------------
    x2 = x.reshape(B, L).astype(jnp.float32)
    if Bp != B:
        x2 = jnp.concatenate([x2, jnp.zeros((Bp - B, L), jnp.float32)], axis=0)
    xe = x2[:, 0::2]                                          # (Bp, L/2)
    xo = x2[:, 1::2]                                          # (Bp, L/2)

    w1t = jnp.transpose(w1[:, 0, :])                          # (5, 32)
    # im2col weight: row index = tap*32 + in_ch
    w2t = jnp.transpose(w2, (2, 1, 0)).reshape(K * 32, 64)    # (160, 64)
    w3t = jnp.transpose(w3)                                   # (64, 64)
    w4t = jnp.zeros((64, OUT_PAD), jnp.float32).at[:, :nc].set(jnp.transpose(w4))
    b4p = jnp.zeros((1, OUT_PAD), jnp.float32).at[:, :nc].set(b4[None, :])

    Lh = L // 2
    bmap = lambda i: (i, 0)        # batch-tiled arrays
    cmap = lambda i: (0, 0)        # weights/biases: resident, constant block

    out = pl.pallas_call(
        ecg_cnn_kernel,
        out_shape=jax.ShapeDtypeStruct((Bp, OUT_PAD), jnp.float32),
        grid=(n_blk,),
        in_specs=[
            pl.BlockSpec((tb, Lh), bmap),            # xe
            pl.BlockSpec((tb, Lh), bmap),            # xo
            pl.BlockSpec((K, 32), cmap),             # conv1 weight
            pl.BlockSpec((1, 32), cmap),             # conv1 bias
            pl.BlockSpec((K * 32, 64), cmap),        # conv2 weight (im2col)
            pl.BlockSpec((1, 64), cmap),             # conv2 bias
            pl.BlockSpec((64, 64), cmap),            # fc1 weight
            pl.BlockSpec((1, 64), cmap),             # fc1 bias
            pl.BlockSpec((64, OUT_PAD), cmap),       # fc2 weight (padded)
            pl.BlockSpec((1, OUT_PAD), cmap),        # fc2 bias  (padded)
        ],
        out_specs=pl.BlockSpec((tb, OUT_PAD), bmap),
        compiler_params=pltpu.CompilerParams(
            dimension_semantics=("parallel",),       # megacore shards batch on v7x
            vmem_limit_bytes=32 * 1024 * 1024),
    )(xe, xo, w1t, b1.reshape(1, -1), w2t, b2.reshape(1, -1),
      w3t, b3.reshape(1, -1), w4t, b4p)

    return out[:B, :nc]


def ecg_cnn_reference(x, params):
    """Pure-JAX reference matching the PyTorch forward exactly."""
    w1, b1, w2, b2, w3, b3, w4, b4 = params
    dn = ('NCH', 'OIH', 'NCH')
    h = lax.conv_general_dilated(x, w1, (1,), 'VALID', dimension_numbers=dn)
    h = jnp.maximum(h + b1[None, :, None], 0.0)
    Lp = h.shape[-1] // 2
    h = jnp.max(h[..., :2 * Lp].reshape(h.shape[0], h.shape[1], Lp, 2), axis=-1)
    h = lax.conv_general_dilated(h, w2, (1,), 'VALID', dimension_numbers=dn)
    h = jnp.maximum(h + b2[None, :, None], 0.0)
    g = jnp.mean(h, axis=-1)                     # AdaptiveAvgPool1d(1) + Flatten
    z = jnp.maximum(g @ w3.T + b3, 0.0)
    return jax.nn.sigmoid(z @ w4.T + b4)


if __name__ == "__main__":
    key = jax.random.PRNGKey(0)
    kx, *kp = jax.random.split(key, 9)

    def uinit(k, shape, fan_in):
        bound = 1.0 / (fan_in ** 0.5)
        return jax.random.uniform(k, shape, jnp.float32, -bound, bound)

    B, L = 16, 64
    params = (
        uinit(kp[0], (32, 1, 5), 5),           # conv1.weight
        uinit(kp[1], (32,), 5),                # conv1.bias
        uinit(kp[2], (64, 32, 5), 32 * 5),     # conv2.weight
        uinit(kp[3], (64,), 32 * 5),           # conv2.bias
        uinit(kp[4], (64, 64), 64),            # fc1.weight
        uinit(kp[5], (64,), 64),               # fc1.bias
        uinit(kp[6], (NUM_CLASSES, 64), 64),   # fc2.weight
        uinit(kp[7], (NUM_CLASSES,), 64),      # fc2.bias
    )
    x = jax.random.normal(kx, (B, 1, L), jnp.float32)   # NCL, as PyTorch Conv1d expects

    # tb=8 -> a 2-step batch grid, exercising the pipelined multi-block path.
    out = jax.block_until_ready(ecg_cnn_forward(x, params, tb=8))
    ref = ecg_cnn_reference(x, params)
    assert out.shape == (B, NUM_CLASSES)
    assert jnp.allclose(out, ref, atol=2e-4, rtol=2e-4), (out, ref)
    print("KERNEL_OK")
</pallas_src>

<mosaic_0001>
module attributes {stable_mosaic.version = 11 : i64} {
  func.func @ecg_cnn_kernel(%arg0: i32, %arg1: memref<8x32xf32, #tpu.memory_space<vmem>>, %arg2: memref<8x32xf32, #tpu.memory_space<vmem>>, %arg3: memref<5x32xf32, #tpu.memory_space<vmem>>, %arg4: memref<1x32xf32, #tpu.memory_space<vmem>>, %arg5: memref<160x64xf32, #tpu.memory_space<vmem>>, %arg6: memref<1x64xf32, #tpu.memory_space<vmem>>, %arg7: memref<64x64xf32, #tpu.memory_space<vmem>>, %arg8: memref<1x64xf32, #tpu.memory_space<vmem>>, %arg9: memref<64x128xf32, #tpu.memory_space<vmem>>, %arg10: memref<1x128xf32, #tpu.memory_space<vmem>>, %arg11: memref<8x128xf32, #tpu.memory_space<vmem>>) attributes {dimension_semantics = [#tpu.dimension_semantics<parallel>], iteration_bounds = array<i64: 2>, scalar_prefetch = 0 : i64, scratch_operands = 0 : i64, tpu.core_type = #tpu.core_type<tc>, window_params = [{transform_indices = @transform_0, window_bounds = array<i64: 8, 32>}, {transform_indices = @transform_1, window_bounds = array<i64: 8, 32>}, {pipeline_mode = #tpu.pipeline_mode<synchronous>, transform_indices = @transform_2, window_bounds = array<i64: 5, 32>}, {pipeline_mode = #tpu.pipeline_mode<synchronous>, transform_indices = @transform_3, window_bounds = array<i64: 1, 32>}, {pipeline_mode = #tpu.pipeline_mode<synchronous>, transform_indices = @transform_4, window_bounds = array<i64: 160, 64>}, {pipeline_mode = #tpu.pipeline_mode<synchronous>, transform_indices = @transform_5, window_bounds = array<i64: 1, 64>}, {pipeline_mode = #tpu.pipeline_mode<synchronous>, transform_indices = @transform_6, window_bounds = array<i64: 64, 64>}, {pipeline_mode = #tpu.pipeline_mode<synchronous>, transform_indices = @transform_7, window_bounds = array<i64: 1, 64>}, {pipeline_mode = #tpu.pipeline_mode<synchronous>, transform_indices = @transform_8, window_bounds = array<i64: 64, 128>}, {pipeline_mode = #tpu.pipeline_mode<synchronous>, transform_indices = @transform_9, window_bounds = array<i64: 1, 128>}, {transform_indices = @transform_10, window_bounds = array<i64: 8, 128>}]} {
    %c0 = arith.constant 0 : index
    %c0_0 = arith.constant 0 : index
    %0 = vector.load %arg1[%c0, %c0_0] : memref<8x32xf32, #tpu.memory_space<vmem>>, vector<8x32xf32>
    %c0_1 = arith.constant 0 : index
    %c0_2 = arith.constant 0 : index
    %1 = vector.load %arg2[%c0_1, %c0_2] : memref<8x32xf32, #tpu.memory_space<vmem>>, vector<8x32xf32>
    %c0_3 = arith.constant 0 : index
    %c0_4 = arith.constant 0 : index
    %2 = vector.load %arg3[%c0_3, %c0_4] : memref<5x32xf32, #tpu.memory_space<vmem>>, vector<5x32xf32>
    %c0_5 = arith.constant 0 : index
    %c0_6 = arith.constant 0 : index
    %3 = vector.load %arg4[%c0_5, %c0_6] : memref<1x32xf32, #tpu.memory_space<vmem>>, vector<1x32xf32>
    %4 = vector.shape_cast %3 : vector<1x32xf32> to vector<1x1x32xf32>
    %5 = vector.extract_strided_slice %0 {offsets = [0, 0], sizes = [8, 30], strides = [1, 1]} : vector<8x32xf32> to vector<8x30xf32>
    %6 = vector.shape_cast %5 : vector<8x30xf32> to vector<8x30x1xf32>
    %7 = vector.extract_strided_slice %2 {offsets = [0, 0], sizes = [1, 32], strides = [1, 1]} : vector<5x32xf32> to vector<1x32xf32>
    %8 = vector.shape_cast %7 : vector<1x32xf32> to vector<1x1x32xf32>
    %9 = vector.broadcast %6 : vector<8x30x1xf32> to vector<8x30x32xf32>
    %10 = vector.broadcast %8 : vector<1x1x32xf32> to vector<8x30x32xf32>
    %11 = arith.mulf %9, %10 : vector<8x30x32xf32>
    %12 = vector.broadcast %4 : vector<1x1x32xf32> to vector<8x30x32xf32>
    %13 = arith.addf %12, %11 : vector<8x30x32xf32>
    %14 = vector.extract_strided_slice %1 {offsets = [0, 0], sizes = [8, 30], strides = [1, 1]} : vector<8x32xf32> to vector<8x30xf32>
    %15 = vector.shape_cast %14 : vector<8x30xf32> to vector<8x30x1xf32>
    %16 = vector.extract_strided_slice %2 {offsets = [1, 0], sizes = [1, 32], strides = [1, 1]} : vector<5x32xf32> to vector<1x32xf32>
    %17 = vector.shape_cast %16 : vector<1x32xf32> to vector<1x1x32xf32>
    %18 = vector.broadcast %15 : vector<8x30x1xf32> to vector<8x30x32xf32>
    %19 = vector.broadcast %17 : vector<1x1x32xf32> to vector<8x30x32xf32>
    %20 = arith.mulf %18, %19 : vector<8x30x32xf32>
    %21 = arith.addf %13, %20 : vector<8x30x32xf32>
    %22 = vector.extract_strided_slice %0 {offsets = [0, 1], sizes = [8, 30], strides = [1, 1]} : vector<8x32xf32> to vector<8x30xf32>
    %23 = vector.shape_cast %22 : vector<8x30xf32> to vector<8x30x1xf32>
    %24 = vector.extract_strided_slice %2 {offsets = [2, 0], sizes = [1, 32], strides = [1, 1]} : vector<5x32xf32> to vector<1x32xf32>
    %25 = vector.shape_cast %24 : vector<1x32xf32> to vector<1x1x32xf32>
    %26 = vector.broadcast %23 : vector<8x30x1xf32> to vector<8x30x32xf32>
    %27 = vector.broadcast %25 : vector<1x1x32xf32> to vector<8x30x32xf32>
    %28 = arith.mulf %26, %27 : vector<8x30x32xf32>
    %29 = arith.addf %21, %28 : vector<8x30x32xf32>
    %30 = vector.extract_strided_slice %1 {offsets = [0, 1], sizes = [8, 30], strides = [1, 1]} : vector<8x32xf32> to vector<8x30xf32>
    %31 = vector.shape_cast %30 : vector<8x30xf32> to vector<8x30x1xf32>
    %32 = vector.extract_strided_slice %2 {offsets = [3, 0], sizes = [1, 32], strides = [1, 1]} : vector<5x32xf32> to vector<1x32xf32>
    %33 = vector.shape_cast %32 : vector<1x32xf32> to vector<1x1x32xf32>
    %34 = vector.broadcast %31 : vector<8x30x1xf32> to vector<8x30x32xf32>
    %35 = vector.broadcast %33 : vector<1x1x32xf32> to vector<8x30x32xf32>
    %36 = arith.mulf %34, %35 : vector<8x30x32xf32>
    %37 = arith.addf %29, %36 : vector<8x30x32xf32>
    %38 = vector.extract_strided_slice %0 {offsets = [0, 2], sizes = [8, 30], strides = [1, 1]} : vector<8x32xf32> to vector<8x30xf32>
    %39 = vector.shape_cast %38 : vector<8x30xf32> to vector<8x30x1xf32>
    %40 = vector.extract_strided_slice %2 {offsets = [4, 0], sizes = [1, 32], strides = [1, 1]} : vector<5x32xf32> to vector<1x32xf32>
    %41 = vector.shape_cast %40 : vector<1x32xf32> to vector<1x1x32xf32>
    %42 = vector.broadcast %39 : vector<8x30x1xf32> to vector<8x30x32xf32>
    %43 = vector.broadcast %41 : vector<1x1x32xf32> to vector<8x30x32xf32>
    %44 = arith.mulf %42, %43 : vector<8x30x32xf32>
    %45 = arith.addf %37, %44 : vector<8x30x32xf32>
    %46 = vector.shape_cast %3 : vector<1x32xf32> to vector<1x1x32xf32>
    %47 = vector.extract_strided_slice %1 {offsets = [0, 0], sizes = [8, 30], strides = [1, 1]} : vector<8x32xf32> to vector<8x30xf32>
    %48 = vector.shape_cast %47 : vector<8x30xf32> to vector<8x30x1xf32>
    %49 = vector.extract_strided_slice %2 {offsets = [0, 0], sizes = [1, 32], strides = [1, 1]} : vector<5x32xf32> to vector<1x32xf32>
    %50 = vector.shape_cast %49 : vector<1x32xf32> to vector<1x1x32xf32>
    %51 = vector.broadcast %48 : vector<8x30x1xf32> to vector<8x30x32xf32>
    %52 = vector.broadcast %50 : vector<1x1x32xf32> to vector<8x30x32xf32>
    %53 = arith.mulf %51, %52 : vector<8x30x32xf32>
    %54 = vector.broadcast %46 : vector<1x1x32xf32> to vector<8x30x32xf32>
    %55 = arith.addf %54, %53 : vector<8x30x32xf32>
    %56 = vector.extract_strided_slice %0 {offsets = [0, 1], sizes = [8, 30], strides = [1, 1]} : vector<8x32xf32> to vector<8x30xf32>
    %57 = vector.shape_cast %56 : vector<8x30xf32> to vector<8x30x1xf32>
    %58 = vector.extract_strided_slice %2 {offsets = [1, 0], sizes = [1, 32], strides = [1, 1]} : vector<5x32xf32> to vector<1x32xf32>
    %59 = vector.shape_cast %58 : vector<1x32xf32> to vector<1x1x32xf32>
    %60 = vector.broadcast %57 : vector<8x30x1xf32> to vector<8x30x32xf32>
    %61 = vector.broadcast %59 : vector<1x1x32xf32> to vector<8x30x32xf32>
    %62 = arith.mulf %60, %61 : vector<8x30x32xf32>
    %63 = arith.addf %55, %62 : vector<8x30x32xf32>
    %64 = vector.extract_strided_slice %1 {offsets = [0, 1], sizes = [8, 30], strides = [1, 1]} : vector<8x32xf32> to vector<8x30xf32>
    %65 = vector.shape_cast %64 : vector<8x30xf32> to vector<8x30x1xf32>
    %66 = vector.extract_strided_slice %2 {offsets = [2, 0], sizes = [1, 32], strides = [1, 1]} : vector<5x32xf32> to vector<1x32xf32>
    %67 = vector.shape_cast %66 : vector<1x32xf32> to vector<1x1x32xf32>
    %68 = vector.broadcast %65 : vector<8x30x1xf32> to vector<8x30x32xf32>
    %69 = vector.broadcast %67 : vector<1x1x32xf32> to vector<8x30x32xf32>
    %70 = arith.mulf %68, %69 : vector<8x30x32xf32>
    %71 = arith.addf %63, %70 : vector<8x30x32xf32>
    %72 = vector.extract_strided_slice %0 {offsets = [0, 2], sizes = [8, 30], strides = [1, 1]} : vector<8x32xf32> to vector<8x30xf32>
    %73 = vector.shape_cast %72 : vector<8x30xf32> to vector<8x30x1xf32>
    %74 = vector.extract_strided_slice %2 {offsets = [3, 0], sizes = [1, 32], strides = [1, 1]} : vector<5x32xf32> to vector<1x32xf32>
    %75 = vector.shape_cast %74 : vector<1x32xf32> to vector<1x1x32xf32>
    %76 = vector.broadcast %73 : vector<8x30x1xf32> to vector<8x30x32xf32>
    %77 = vector.broadcast %75 : vector<1x1x32xf32> to vector<8x30x32xf32>
    %78 = arith.mulf %76, %77 : vector<8x30x32xf32>
    %79 = arith.addf %71, %78 : vector<8x30x32xf32>
    %80 = vector.extract_strided_slice %1 {offsets = [0, 2], sizes = [8, 30], strides = [1, 1]} : vector<8x32xf32> to vector<8x30xf32>
    %81 = vector.shape_cast %80 : vector<8x30xf32> to vector<8x30x1xf32>
    %82 = vector.extract_strided_slice %2 {offsets = [4, 0], sizes = [1, 32], strides = [1, 1]} : vector<5x32xf32> to vector<1x32xf32>
    %83 = vector.shape_cast %82 : vector<1x32xf32> to vector<1x1x32xf32>
    %84 = vector.broadcast %81 : vector<8x30x1xf32> to vector<8x30x32xf32>
    %85 = vector.broadcast %83 : vector<1x1x32xf32> to vector<8x30x32xf32>
    %86 = arith.mulf %84, %85 : vector<8x30x32xf32>
    %87 = arith.addf %79, %86 : vector<8x30x32xf32>
    %88 = arith.maximumf %45, %87 : vector<8x30x32xf32>
    %cst = arith.constant 0.000000e+00 : f32
    %89 = vector.broadcast %cst : f32 to vector<8x30x32xf32>
    %90 = arith.maximumf %88, %89 : vector<8x30x32xf32>
    %91 = vector.extract_strided_slice %90 {offsets = [0, 0, 0], sizes = [8, 26, 32], strides = [1, 1, 1]} : vector<8x30x32xf32> to vector<8x26x32xf32>
    %92 = vector.extract_strided_slice %90 {offsets = [0, 1, 0], sizes = [8, 26, 32], strides = [1, 1, 1]} : vector<8x30x32xf32> to vector<8x26x32xf32>
    %93 = vector.extract_strided_slice %90 {offsets = [0, 2, 0], sizes = [8, 26, 32], strides = [1, 1, 1]} : vector<8x30x32xf32> to vector<8x26x32xf32>
    %94 = vector.extract_strided_slice %90 {offsets = [0, 3, 0], sizes = [8, 26, 32], strides = [1, 1, 1]} : vector<8x30x32xf32> to vector<8x26x32xf32>
    %95 = vector.extract_strided_slice %90 {offsets = [0, 4, 0], sizes = [8, 26, 32], strides = [1, 1, 1]} : vector<8x30x32xf32> to vector<8x26x32xf32>
    %96 = tpu.concatenate %91, %92, %93, %94, %95 in 2 : vector<8x26x32xf32>, vector<8x26x32xf32>, vector<8x26x32xf32>, vector<8x26x32xf32>, vector<8x26x32xf32> -> vector<8x26x160xf32>
    %97 = vector.shape_cast %96 : vector<8x26x160xf32> to vector<208x160xf32>
    %c0_7 = arith.constant 0 : index
    %c0_8 = arith.constant 0 : index
    %98 = vector.load %arg5[%c0_7, %c0_8] : memref<160x64xf32, #tpu.memory_space<vmem>>, vector<160x64xf32>
    %cst_9 = arith.constant dense<0.000000e+00> : vector<208x64xf32>
    %99 = tpu.matmul %97, %98, %cst_9 {dimension_numbers = #tpu.dot_dimension_numbers<[1], [0], [0], [1], [0, 0, 1, 1], [], []>} : vector<208x160xf32>, vector<160x64xf32>, vector<208x64xf32> -> vector<208x64xf32>
    %c0_10 = arith.constant 0 : index
    %c0_11 = arith.constant 0 : index
    %100 = vector.load %arg6[%c0_10, %c0_11] : memref<1x64xf32, #tpu.memory_space<vmem>>, vector<1x64xf32>
    %101 = vector.broadcast %100 : vector<1x64xf32> to vector<208x64xf32>
    %102 = arith.addf %99, %101 : vector<208x64xf32>
    %cst_12 = arith.constant 0.000000e+00 : f32
    %103 = vector.broadcast %cst_12 : f32 to vector<208x64xf32>
    %104 = arith.maximumf %102, %103 : vector<208x64xf32>
    %105 = vector.shape_cast %104 : vector<208x64xf32> to vector<8x26x64xf32>
    %cst_13 = arith.constant dense<0.000000e+00> : vector<8x64xf32>
    %106 = vector.multi_reduction <add>, %105, %cst_13 [1] : vector<8x26x64xf32> to vector<8x64xf32>
    %cst_14 = arith.constant 2.600000e+01 : f32
    %107 = vector.broadcast %cst_14 : f32 to vector<8x64xf32>
    %108 = arith.divf %106, %107 : vector<8x64xf32>
    %c0_15 = arith.constant 0 : index
    %c0_16 = arith.constant 0 : index
    %109 = vector.load %arg7[%c0_15, %c0_16] : memref<64x64xf32, #tpu.memory_space<vmem>>, vector<64x64xf32>
    %cst_17 = arith.constant dense<0.000000e+00> : vector<8x64xf32>
    %110 = tpu.matmul %108, %109, %cst_17 {dimension_numbers = #tpu.dot_dimension_numbers<[1], [0], [0], [1], [0, 0, 1, 1], [], []>} : vector<8x64xf32>, vector<64x64xf32>, vector<8x64xf32> -> vector<8x64xf32>
    %c0_18 = arith.constant 0 : index
    %c0_19 = arith.constant 0 : index
    %111 = vector.load %arg8[%c0_18, %c0_19] : memref<1x64xf32, #tpu.memory_space<vmem>>, vector<1x64xf32>
    %112 = vector.broadcast %111 : vector<1x64xf32> to vector<8x64xf32>
    %113 = arith.addf %110, %112 : vector<8x64xf32>
    %cst_20 = arith.constant 0.000000e+00 : f32
    %114 = vector.broadcast %cst_20 : f32 to vector<8x64xf32>
    %115 = arith.maximumf %113, %114 : vector<8x64xf32>
    %c0_21 = arith.constant 0 : index
    %c0_22 = arith.constant 0 : index
    %116 = vector.load %arg9[%c0_21, %c0_22] : memref<64x128xf32, #tpu.memory_space<vmem>>, vector<64x128xf32>
    %cst_23 = arith.constant dense<0.000000e+00> : vector<8x128xf32>
    %117 = tpu.matmul %115, %116, %cst_23 {dimension_numbers = #tpu.dot_dimension_numbers<[1], [0], [0], [1], [0, 0, 1, 1], [], []>} : vector<8x64xf32>, vector<64x128xf32>, vector<8x128xf32> -> vector<8x128xf32>
    %c0_24 = arith.constant 0 : index
    %c0_25 = arith.constant 0 : index
    %118 = vector.load %arg10[%c0_24, %c0_25] : memref<1x128xf32, #tpu.memory_space<vmem>>, vector<1x128xf32>
    %119 = vector.broadcast %118 : vector<1x128xf32> to vector<8x128xf32>
    %120 = arith.addf %117, %119 : vector<8x128xf32>
    %121 = arith.negf %120 : vector<8x128xf32>
    %122 = math.exp %121 : vector<8x128xf32>
    %cst_26 = arith.constant 1.000000e+00 : f32
    %123 = vector.broadcast %cst_26 : f32 to vector<8x128xf32>
    %124 = arith.addf %123, %122 : vector<8x128xf32>
    %125 = arith.divf %123, %124 : vector<8x128xf32>
    %c0_27 = arith.constant 0 : index
    %c0_28 = arith.constant 0 : index
    %126 = vector.load %arg11[%c0_27, %c0_28] : memref<8x128xf32, #tpu.memory_space<vmem>>, vector<8x128xf32>
    tpu.vector_store %arg11[%c0_27, %c0_28], %125 {strides = array<i32>} : memref<8x128xf32, #tpu.memory_space<vmem>>, vector<8x128xf32>,
    return
  }
  func.func @transform_0(%arg0: i32) -> (i32, i32) {
    %c0_i32 = arith.constant 0 : i32
    %c0_i32_0 = arith.constant 0 : i32
    return %arg0, %c0_i32 : i32, i32
  }
  func.func @transform_1(%arg0: i32) -> (i32, i32) {
    %c0_i32 = arith.constant 0 : i32
    %c0_i32_0 = arith.constant 0 : i32
    return %arg0, %c0_i32 : i32, i32
  }
  func.func @transform_2(%arg0: i32) -> (i32, i32) {
    %c0_i32 = arith.constant 0 : i32
    %c0_i32_0 = arith.constant 0 : i32
    %c0_i32_1 = arith.constant 0 : i32
    return %c0_i32, %c0_i32_0 : i32, i32
  }
  func.func @transform_3(%arg0: i32) -> (i32, i32) {
    %c0_i32 = arith.constant 0 : i32
    %c0_i32_0 = arith.constant 0 : i32
    %c0_i32_1 = arith.constant 0 : i32
    return %c0_i32, %c0_i32_0 : i32, i32
  }
  func.func @transform_4(%arg0: i32) -> (i32, i32) {
    %c0_i32 = arith.constant 0 : i32
    %c0_i32_0 = arith.constant 0 : i32
    %c0_i32_1 = arith.constant 0 : i32
    return %c0_i32, %c0_i32_0 : i32, i32
  }
  func.func @transform_5(%arg0: i32) -> (i32, i32) {
    %c0_i32 = arith.constant 0 : i32
    %c0_i32_0 = arith.constant 0 : i32
    %c0_i32_1 = arith.constant 0 : i32
    return %c0_i32, %c0_i32_0 : i32, i32
  }
  func.func @transform_6(%arg0: i32) -> (i32, i32) {
    %c0_i32 = arith.constant 0 : i32
    %c0_i32_0 = arith.constant 0 : i32
    %c0_i32_1 = arith.constant 0 : i32
    return %c0_i32, %c0_i32_0 : i32, i32
  }
  func.func @transform_7(%arg0: i32) -> (i32, i32) {
    %c0_i32 = arith.constant 0 : i32
    %c0_i32_0 = arith.constant 0 : i32
    %c0_i32_1 = arith.constant 0 : i32
    return %c0_i32, %c0_i32_0 : i32, i32
  }
  func.func @transform_8(%arg0: i32) -> (i32, i32) {
    %c0_i32 = arith.constant 0 : i32
    %c0_i32_0 = arith.constant 0 : i32
    %c0_i32_1 = arith.constant 0 : i32
    return %c0_i32, %c0_i32_0 : i32, i32
  }
  func.func @transform_9(%arg0: i32) -> (i32, i32) {
    %c0_i32 = arith.constant 0 : i32
    %c0_i32_0 = arith.constant 0 : i32
    %c0_i32_1 = arith.constant 0 : i32
    return %c0_i32, %c0_i32_0 : i32, i32
  }
  func.func @transform_10(%arg0: i32) -> (i32, i32) {
    %c0_i32 = arith.constant 0 : i32
    %c0_i32_0 = arith.constant 0 : i32
    return %arg0, %c0_i32 : i32, i32
  }
}

</mosaic_0001>

<bundles_post_ra>
// kernel: ecg_cnn_forward.1
= control target key start
LH: loop header
LB: loop body
LE: loop exit
PB: predicated region body
PF: predicated region fallthrough
CT: control target
= control target key end

     0   :  { %s5503_s13 = smov 0   ;;  %s8433_s0 = inlined_call_operand.vmem [shape: f32[16,32], index: 0, kind: input, shape index: {}]   ;;  %s8434_s1 = inlined_call_operand.vmem [shape: f32[16,32], index: 1, kind: input, shape index: {}]   ;;  %s8435_s2 = inlined_call_operand.vmem [shape: f32[5,32], index: 2, kind: input, shape index: {}]   ;;  %s8436_s3 = inlined_call_operand.vmem [shape: f32[1,32], index: 3, kind: input, shape index: {}]   ;;  %s8437_s4 = inlined_call_operand.vmem [shape: f32[160,64], index: 4, kind: input, shape index: {}]   ;;  %s8438_s5 = inlined_call_operand.vmem [shape: f32[1,64], index: 5, kind: input, shape index: {}]   ;;  %s8439_s6 = inlined_call_operand.vmem [shape: f32[64,64], index: 6, kind: input, shape index: {}]   ;;  %s8440_s7 = inlined_call_operand.vmem [shape: f32[1,64], index: 7, kind: input, shape index: {}]   ;;  %s8441_s8 = inlined_call_operand.vmem [shape: f32[64,128], index: 8, kind: input, shape index: {}]   ;;  %s8442_s9 = inlined_call_operand.vmem [shape: f32[1,128], index: 9, kind: input, shape index: {}]   ;;  %s8443_s10 = inlined_call_operand.vmem [shape: f32[16,128], index: 10, kind: output, shape index: {}]  }
   0x1 LB: > { %s5239_s14 = sadd.s32 4294967295, %s5439_s13   ;;  %p5243_p0 = scmp.ge.s32.totalorder %s5439_s13, 1  ;;  %s5439_s13 = sphi %s5503_s13, %s20_s13  }
   0x2   : > { %p320_p1 = scmp.lt.s32.totalorder %s5439_s13, 3 }
   0x4   : > { %p321_p2 = pnand %p5243_p0, %p320_p1 }
   0x6   : > { %324 = sbr.rel (%p321_p2) target bundleno = 1434 (0x59a), region = 60 }
   0xd   : > { %p360_p3 = scmp.lt.s32.totalorder %s5239_s14, 1  ;;  %v376_v0 = vlaneseq  ;;  %vm2107_vm0 = vcmask 1045504   ;;  %vm1954_vm1 = vcmask 1046528   ;;  %vm2260_vm2 = vcmask 1044480   ;;  %s5443_s22 = smov 64  }
   0xe   : > { %vm2413_vm3 = vcmask 1043456   ;;  %s5444_s23 = smov 32   ;;  %s5445_s12 = smov 96   ;;  %vm2470_vm4 = vcmask 261120   ;;  %vm2503_vm5 = vcmask 523264   ;;  %vm2536_vm6 = vcmask 785408  }
   0xf   : > { %s8979_s14 = smov (!%p360_p3, %s5239_s14), 1  ;;  %v5511_v1 = vshrl.u32 %v376_v0, 7  ;;  %vm4860_vm7 = vcmask 517120   ;;  %vm4992_vm8 = vcmask 1041409   ;;  %vm5446_vm9 = vmmov 0  }
  0x10   : > { %s5513_s15 = sshll.u32 %s8979_s14, 3  ;;  %vm4994_vm10 = vcmask 1042434   ;;  %vm4996_vm11 = vcmask 1043459   ;;  %vm4998_vm12 = vcmask 1044484   ;;  %vm5000_vm13 = vcmask 1045509  }
  0x11   : > { %v5516_v2 = vsub.s32 0, %v5511_v1  ;;  %s367_s18 = scalar_lea.vmem %s8434_s1, %s5513_s15  ;;  %s363_s21 = scalar_lea.vmem %s8433_s0, %s5513_s15  ;;  %v5535_v7 = vsub.s32 1, %v5511_v1  ;;  %v5542_v10 = vsub.s32 2, %v5511_v1  ;;  %v473_v13 = vsub.s32 5, %v5511_v1 }
  0x12   : > { %v5526_v3 = vld [vmem:[%s367_s18] sm:$0xff]  ;;  %v5594_v24 = vsub.s32 4, %v5511_v1  ;;  %v5677_v51 = vsub.s32 3, %v5511_v1  ;;  %vm5002_vm14 = vcmask 1046534   ;;  %vm5004_vm15 = vcmask 1047559  }
  0x13   : > { %v5528_v4 = vld [vmem:[%s363_s21] sm:$0xff]  ;;  %v605_v5 = vrot.slane %v5526_v3, %v5516_v2  ;;  %v624_v9 = vrot.slane %v5526_v3, %v5535_v7  ;;  %v5552_v12 = vrot.slane %v5526_v3, %v5542_v10  ;;  %v5573_v17 = vrot.slane %v5526_v3, %v473_v13 }
  0x14   : > { %v379_v6 = vrot.slane %v5528_v4, %v5516_v2  ;;  %v398_v8 = vrot.slane %v5528_v4, %v5535_v7  ;;  %v5546_v11 = vrot.slane %v5528_v4, %v5542_v10  ;;  %v5564_v14 = vrot.slane %v5528_v4, %v473_v13 }
  0x15   : > { %607 = vbcast.lane.b32.xlu1 %v605_v5, 256  ;;  %v5604_v27 = vrot.slane %v5528_v4, %v5594_v24  ;;  %v5614_v30 = vrot.slane %v5526_v3, %v5594_v24  ;;  %v5687_v54 = vrot.slane %v5528_v4, %v5677_v51  ;;  %v5697_v57 = vrot.slane %v5526_v3, %v5677_v51 }
  0x16   : > { %381 = vbcast.lane.b32.xlu0 %v379_v6, 256 }
  0x19   : > { %611 = vbcast.lane.b32.xlu1 %v605_v5, 264 }
  0x1a   : > { %385 = vbcast.lane.b32.xlu0 %v379_v6, 264 }
  0x1d   : > { %828 = vbcast.lane.b32.xlu1 %v379_v6, 265 }
  0x1e   : > { %824 = vbcast.lane.b32.xlu0 %v379_v6, 257 }
  0x21   : > { %615 = vbcast.lane.b32.xlu1 %v605_v5, 272 }
  0x22   : > { %389 = vbcast.lane.b32.xlu0 %v379_v6, 272 }
  0x25   : > { %1024 = vbcast.lane.b32.xlu1 %v605_v5, 265 }
  0x26   : > { %1020 = vbcast.lane.b32.xlu0 %v605_v5, 257 }
  0x29   : > { %1216 = vbcast.lane.b32.xlu1 %v379_v6, 258 }
  0x2a   : > { %832 = vbcast.lane.b32.xlu0 %v379_v6, 273 }
  0x2d   : > { %393 = vbcast.lane.b32.xlu1 %v379_v6, 280 }
  0x2e   : > { %1220 = vbcast.lane.b32.xlu0 %v379_v6, 266 }
  0x31   : > { %1028 = vbcast.lane.b32.xlu1 %v605_v5, 273 }
  0x32   : > { %619 = vbcast.lane.b32.xlu0 %v605_v5, 280 }
  0x35   : > { %1672 = vbcast.lane.b32.xlu1 %v605_v5, 266 }
  0x36   : > { %1668 = vbcast.lane.b32.xlu0 %v605_v5, 258 }
  0x39   : > { %1224 = vbcast.lane.b32.xlu1 %v379_v6, 274 }
  0x3a   : > { %836 = vbcast.lane.b32.xlu0 %v379_v6, 281 }
  0x3d   : > { %404 = vbcast.lane.b32.xlu1 %v398_v8, 264 }
  0x3e   : > { %400 = vbcast.lane.b32.xlu0 %v398_v8, 256 }
  0x41   : > { %630 = vbcast.lane.b32.xlu1 %v624_v9, 264 }
  0x42   : > { %626 = vbcast.lane.b32.xlu0 %v624_v9, 256 }
  0x45   : > { %1676 = vbcast.lane.b32.xlu1 %v605_v5, 274 }
  0x46   : > { %1032 = vbcast.lane.b32.xlu0 %v605_v5, 281 }
  0x49   : > { %844 = vbcast.lane.b32.xlu1 %v398_v8, 265 }
  0x4a   : > { %840 = vbcast.lane.b32.xlu0 %v398_v8, 257 }
  0x4d   : > { %408 = vbcast.lane.b32.xlu1 %v398_v8, 272 }
  0x4e   : > { %1228 = vbcast.lane.b32.xlu0 %v379_v6, 282  ;;  %v492_v6 = vsub.s32 6, %v5511_v1 }
  0x51   : > { %1036 = vbcast.lane.b32.xlu1 %v624_v9, 257 }
  0x52   : > { %634 = vbcast.lane.b32.xlu0 %v624_v9, 272 }
  0x55   : > { %1680 = vbcast.lane.b32.xlu1 %v605_v5, 282 }
  0x56   : > { %1040 = vbcast.lane.b32.xlu0 %v624_v9, 265 }
  0x59   : > { %1232 = vbcast.lane.b32.xlu1 %v398_v8, 258 }
  0x5a   : > { %848 = vbcast.lane.b32.xlu0 %v398_v8, 273 }
  0x5d   : > { %412 = vbcast.lane.b32.xlu1 %v398_v8, 280 }
  0x5e   : > { %1236 = vbcast.lane.b32.xlu0 %v398_v8, 266 }
  0x61   : > { %1044 = vbcast.lane.b32.xlu1 %v624_v9, 273 }
  0x62   : > { %638 = vbcast.lane.b32.xlu0 %v624_v9, 280 }
  0x65   : > { %1688 = vbcast.lane.b32.xlu1 %v624_v9, 266 }
  0x66   : > { %1684 = vbcast.lane.b32.xlu0 %v624_v9, 258 }
  0x69   : > { %1240 = vbcast.lane.b32.xlu1 %v398_v8, 274 }
  0x6a   : > { %852 = vbcast.lane.b32.xlu0 %v398_v8, 281 }
  0x6d   : > { %423 = vbcast.lane.b32.xlu1 %v5546_v11, 264 }
  0x6e   : > { %419 = vbcast.lane.b32.xlu0 %v5546_v11, 256 }
  0x71   : > { %649 = vbcast.lane.b32.xlu1 %v5552_v12, 264 }
  0x72   : > { %645 = vbcast.lane.b32.xlu0 %v5552_v12, 256 }
  0x75   : > { %1692 = vbcast.lane.b32.xlu1 %v624_v9, 274 }
  0x76   : > { %1048 = vbcast.lane.b32.xlu0 %v624_v9, 281 }
  0x79   : > { %860 = vbcast.lane.b32.xlu1 %v5546_v11, 265 }
  0x7a   : > { %856 = vbcast.lane.b32.xlu0 %v5546_v11, 257 }
  0x7d   : > { %427 = vbcast.lane.b32.xlu1 %v5546_v11, 272 }
  0x7e   : > { %1244 = vbcast.lane.b32.xlu0 %v398_v8, 282 }
  0x81   : > { %1052 = vbcast.lane.b32.xlu1 %v5552_v12, 257 }
  0x82   : > { %653 = vbcast.lane.b32.xlu0 %v5552_v12, 272 }
  0x85   : > { %1696 = vbcast.lane.b32.xlu1 %v624_v9, 282 }
  0x86   : > { %1056 = vbcast.lane.b32.xlu0 %v5552_v12, 265 }
  0x87   : > { %v5566_v15 = vpop.permute.xlu1 %607 }
  0x88   : > { %v5568_v16 = vpop.permute.xlu0 %381 }
  0x89   : > { %480 = vbcast.lane.b32.xlu1 %v5564_v14, 264 }
  0x8a   : > { %476 = vbcast.lane.b32.xlu0 %v5564_v14, 256 }
  0x8b   : > { %v5575_v18 = vpop.permute.xlu1 %611 }
  0x8c   : > { %v5577_v19 = vpop.permute.xlu0 %385 }
  0x8d   : > { %706 = vbcast.lane.b32.xlu1 %v5573_v17, 264 }
  0x8e   : > { %702 = vbcast.lane.b32.xlu0 %v5573_v17, 256 }
  0x8f   : > { %v5581_v20 = vpop.permute.xlu1 %828 }
  0x90   : > { %v5583_v21 = vpop.permute.xlu0 %824 }
  0x91   : > { %1248 = vbcast.lane.b32.xlu1 %v5546_v11, 258 }
  0x92   : > { %864 = vbcast.lane.b32.xlu0 %v5546_v11, 273 }
  0x93   : > { %v5587_v22 = vpop.permute.xlu1 %615 }
  0x94   : > { %v5589_v23 = vpop.permute.xlu0 %389 }
  0x95   : > { %904 = vbcast.lane.b32.xlu1 %v5564_v14, 257 }
  0x96   : > { %1252 = vbcast.lane.b32.xlu0 %v5546_v11, 266 }
  0x97   : > { %v5596_v25 = vpop.permute.xlu1 %1024 }
  0x98   : > { %v5598_v26 = vpop.permute.xlu0 %1020 }
  0x99   : > { %431 = vbcast.lane.b32.xlu1 %v5546_v11, 280 }
  0x9a   : > { %908 = vbcast.lane.b32.xlu0 %v5564_v14, 265 }
  0x9b   : > { %v5606_v28 = vpop.permute.xlu1 %1216 }
  0x9c   : > { %v5608_v29 = vpop.permute.xlu0 %832 }
  0x9d   : > { %657 = vbcast.lane.b32.xlu1 %v5552_v12, 280 }
  0x9e   : > { %469 = vbcast.lane.b32.xlu0 %v5604_v27, 280 }
  0x9f   : > { %v5616_v31 = vpop.permute.xlu1 %393 }
  0xa0   : > { %v5618_v32 = vpop.permute.xlu0 %1220 }
  0xa1   : > { %1060 = vbcast.lane.b32.xlu1 %v5552_v12, 273 }
  0xa2   : > { %695 = vbcast.lane.b32.xlu0 %v5614_v30, 280 }
  0xa3   : > { %v5622_v33 = vpop.permute.xlu1 %1028 }
  0xa4   : > { %v5624_v34 = vpop.permute.xlu0 %619 }
  0xa5   : > { %1704 = vbcast.lane.b32.xlu1 %v5552_v12, 266 }
  0xa6   : > { %1700 = vbcast.lane.b32.xlu0 %v5552_v12, 258 }
  0xa7   : > { %v5628_v35 = vpop.permute.xlu1 %1672 }
  0xa8   : > { %v5630_v36 = vpop.permute.xlu0 %1668 }
  0xa9   : > { %710 = vbcast.lane.b32.xlu1 %v5573_v17, 272 }
  0xaa   : > { %484 = vbcast.lane.b32.xlu0 %v5564_v14, 272 }
  0xab   : > { %v5634_v37 = vpop.permute.xlu1 %1224 }
  0xac   : > { %v5636_v38 = vpop.permute.xlu0 %836 }
  0xad   : > { %1104 = vbcast.lane.b32.xlu1 %v5573_v17, 265 }
  0xae   : > { %1100 = vbcast.lane.b32.xlu0 %v5573_v17, 257 }
  0xaf   : > { %v5640_v39 = vpop.permute.xlu1 %404 }
  0xb0   : > { %v5642_v40 = vpop.permute.xlu0 %400 }
  0xb1   : > { %900 = vbcast.lane.b32.xlu1 %v5604_v27, 281 }
  0xb2   : > { %868 = vbcast.lane.b32.xlu0 %v5546_v11, 281 }
  0xb3   : > { %v5646_v41 = vpop.permute.xlu1 %630 }
  0xb4   : > { %v5648_v42 = vpop.permute.xlu0 %626 }
  0xb5   : > { %912 = vbcast.lane.b32.xlu1 %v5564_v14, 273 }
  0xb6   : > { %1256 = vbcast.lane.b32.xlu0 %v5546_v11, 274 }
  0xb7   : > { %v5652_v43 = vpop.permute.xlu1 %1676 }
  0xb8   : > { %v5654_v44 = vpop.permute.xlu0 %1032 }
  0xb9   : > { %1300 = vbcast.lane.b32.xlu1 %v5564_v14, 266 }
  0xba   : > { %1296 = vbcast.lane.b32.xlu0 %v5564_v14, 258 }
  0xbb   : > { %v5658_v45 = vpop.permute.xlu1 %844 }
  0xbc   : > { %v5660_v46 = vpop.permute.xlu0 %840 }
  0xbd   : > { %1096 = vbcast.lane.b32.xlu1 %v5614_v30, 281 }
  0xbe   : > { %1064 = vbcast.lane.b32.xlu0 %v5552_v12, 281 }
  0xbf   : > { %v5664_v47 = vpop.permute.xlu1 %408 }
  0xc0   : > { %8597 = vst [vmem:[#allocation2_spill] sm:$0xff] %v5664_v47  ;;  %v5666_v48 = vpop.permute.xlu0 %1228 }
  0xc1   : > { %488 = vbcast.lane.b32.xlu1 %v5564_v14, 280 }
  0xc2   : > { %1708 = vbcast.lane.b32.xlu0 %v5552_v12, 274 }
  0xc3   : > { %v5670_v49 = vpop.permute.xlu1 %1036 }
  0xc4   : > { %v5672_v50 = vpop.permute.xlu0 %634 }
  0xc5   : > { %8598 = vst [vmem:[#allocation3_spill] sm:$0xff] %v5672_v50  ;;  %1108 = vbcast.lane.b32.xlu1 %v5573_v17, 273 }
  0xc6   : > { %714 = vbcast.lane.b32.xlu0 %v5573_v17, 280 }
  0xc7   : > { %v5679_v52 = vpop.permute.xlu1 %1680 }
  0xc8   : > { %v5681_v53 = vpop.permute.xlu0 %1040 }
  0xc9   : > { %1752 = vbcast.lane.b32.xlu1 %v5573_v17, 266 }
  0xca   : > { %1748 = vbcast.lane.b32.xlu0 %v5573_v17, 258 }
  0xcb   : > { %v5689_v55 = vpop.permute.xlu1 %1232 }
  0xcc   : > { %v5691_v56 = vpop.permute.xlu0 %848 }
  0xcd   : > { %8599 = vst [vmem:[#allocation4_spill] sm:$0xff] %v5691_v56  ;;  %442 = vbcast.lane.b32.xlu1 %v5687_v54, 264 }
  0xce   : > { %438 = vbcast.lane.b32.xlu0 %v5687_v54, 256 }
  0xcf   : > { %v5699_v58 = vpop.permute.xlu1 %412 }
  0xd0   : > { %8600 = vst [vmem:[#allocation5_spill] sm:$0xff] %v5699_v58  ;;  %v5701_v59 = vpop.permute.xlu0 %1236 }
  0xd1   : > { %668 = vbcast.lane.b32.xlu1 %v5697_v57, 264 }
  0xd2   : > { %664 = vbcast.lane.b32.xlu0 %v5697_v57, 256 }
  0xd3   : > { %v5705_v60 = vpop.permute.xlu1 %1044 }
  0xd4   : > { %8601 = vst [vmem:[#allocation6_spill] sm:$0xff] %v5705_v60  ;;  %v5707_v61 = vpop.permute.xlu0 %638 }
  0xd5   : > { %8602 = vst [vmem:[#allocation7_spill] sm:$0xff] %v5707_v61  ;;  %1292 = vbcast.lane.b32.xlu1 %v5604_v27, 282  ;;  %v5740_v61 = vrot.slane %v5526_v3, %v492_v6 }
  0xd6   : > { %1260 = vbcast.lane.b32.xlu0 %v5546_v11, 282  ;;  %v5731_v11 = vrot.slane %v5528_v4, %v492_v6 }
  0xd7   : > { %v5711_v62 = vpop.permute.xlu1 %1688 }
  0xd8   : > { %8603 = vst [vmem:[#allocation8_spill] sm:$0xff] %v5711_v62  ;;  %v5713_v63 = vpop.permute.xlu0 %1684 }
  0xd9   : > { %8604 = vst [vmem:[#allocation9_spill] sm:$0xff] %v5713_v63  ;;  %1304 = vbcast.lane.b32.xlu1 %v5564_v14, 274 }
  0xda   : > { %916 = vbcast.lane.b32.xlu0 %v5564_v14, 281 }
  0xdb   : > { %v5717_v0 = vpop.permute.xlu1 %1240 }
  0xdc   : > { %8605 = vst [vmem:[#allocation10_spill] sm:$0xff] %v5717_v0  ;;  %v5719_v5 = vpop.permute.xlu0 %852 }
  0xdd   : > { %8606 = vst [vmem:[#allocation11_spill] sm:$0xff] %v5719_v5  ;;  %876 = vbcast.lane.b32.xlu1 %v5687_v54, 265 }
  0xde   : > { %872 = vbcast.lane.b32.xlu0 %v5687_v54, 257 }
  0xdf   : > { %v5724_v8 = vpop.permute.xlu1 %423 }
  0xe0   : > { %8607 = vst [vmem:[#allocation12_spill] sm:$0xff] %v5724_v8  ;;  %v5726_v9 = vpop.permute.xlu0 %419 }
  0xe1   : > { %8608 = vst [vmem:[#allocation13_spill] sm:$0xff] %v5726_v9  ;;  %1744 = vbcast.lane.b32.xlu1 %v5614_v30, 282 }
  0xe2   : > { %1712 = vbcast.lane.b32.xlu0 %v5552_v12, 282 }
  0xe3   : > { %v5733_v13 = vpop.permute.xlu1 %649 }
  0xe4   : > { %8609 = vst [vmem:[#allocation14_spill] sm:$0xff] %v5733_v13  ;;  %v5735_v5 = vpop.permute.xlu0 %645 }
  0xe5   : > { %8610 = vst [vmem:[#allocation15_spill] sm:$0xff] %v5735_v5  ;;  %499 = vbcast.lane.b32.xlu1 %v5731_v11, 264 }
  0xe6   : > { %495 = vbcast.lane.b32.xlu0 %v5731_v11, 256 }
  0xe7   : > { %v5742_v8 = vpop.permute.xlu1 %1692 }
  0xe8   : > { %8611 = vst [vmem:[#allocation16_spill] sm:$0xff] %v5742_v8  ;;  %v5744_v9 = vpop.permute.xlu0 %1048 }
  0xe9   : > { %8612 = vst [vmem:[#allocation17_spill] sm:$0xff] %v5744_v9  ;;  %725 = vbcast.lane.b32.xlu1 %v5740_v61, 264 }
  0xea   : > { %721 = vbcast.lane.b32.xlu0 %v5740_v61, 256 }
  0xeb   : > { %v5748_v12 = vpop.permute.xlu1 %860 }
  0xec   : > { %8613 = vst [vmem:[#allocation18_spill] sm:$0xff] %v5748_v12  ;;  %v5750_v13 = vpop.permute.xlu0 %856 }
  0xed   : > { %8614 = vst [vmem:[#allocation19_spill] sm:$0xff] %v5750_v13  ;;  %1756 = vbcast.lane.b32.xlu1 %v5573_v17, 274 }
  0xee   : > { %1112 = vbcast.lane.b32.xlu0 %v5573_v17, 281 }
  0xef   : > { %v5754_v5 = vpop.permute.xlu1 %427 }
  0xf0   : > { %8615 = vst [vmem:[#allocation20_spill] sm:$0xff] %v5754_v5  ;;  %v5756_v6 = vpop.permute.xlu0 %1244 }
  0xf1   : > { %8616 = vst [vmem:[#allocation21_spill] sm:$0xff] %v5756_v6  ;;  %672 = vbcast.lane.b32.xlu1 %v5697_v57, 272 }
  0xf2   : > { %446 = vbcast.lane.b32.xlu0 %v5687_v54, 272 }
  0xf3   : > { %v5760_v9 = vpop.permute.xlu1 %1052 }
  0xf4   : > { %8617 = vst [vmem:[#allocation22_spill] sm:$0xff] %v5760_v9  ;;  %v5762_v8 = vpop.permute.xlu0 %653 }
  0xf5   : > { %8618 = vst [vmem:[#allocation23_spill] sm:$0xff] %v5762_v8  ;;  %1072 = vbcast.lane.b32.xlu1 %v5697_v57, 265 }
  0xf6   : > { %1068 = vbcast.lane.b32.xlu0 %v5697_v57, 257 }
  0xf7   : > { %v5766_v13 = vpop.permute.xlu1 %1696 }
  0xf8   : > { %8619 = vst [vmem:[#allocation24_spill] sm:$0xff] %v5766_v13  ;;  %v5768_v12 = vpop.permute.xlu0 %1056 }
  0xf9   : > { %8620 = vst [vmem:[#allocation25_spill] sm:$0xff] %v5768_v12  ;;  %924 = vbcast.lane.b32.xlu1 %v5731_v11, 265 }
  0xfa   : > { %920 = vbcast.lane.b32.xlu0 %v5731_v11, 257 }
  0xfb   : > { %v5772_v5 = vpop.permute.xlu1 %480 }
  0xfc   : > { %8621 = vst [vmem:[#allocation26_spill] sm:$0xff] %v5772_v5  ;;  %v5774_v6 = vpop.permute.xlu0 %476 }
  0xfd   : > { %8622 = vst [vmem:[#allocation27_spill] sm:$0xff] %v5774_v6  ;;  %880 = vbcast.lane.b32.xlu1 %v5687_v54, 273 }
  0xfe   : > { %1308 = vbcast.lane.b32.xlu0 %v5564_v14, 282 }
  0xff   : > { %v5778_v8 = vpop.permute.xlu1 %706 }
 0x100   : > { %8623 = vst [vmem:[#allocation28_spill] sm:$0xff] %v5778_v8  ;;  %v5780_v9 = vpop.permute.xlu0 %702 }
 0x101   : > { %8624 = vst [vmem:[#allocation29_spill] sm:$0xff] %v5780_v9  ;;  %1268 = vbcast.lane.b32.xlu1 %v5687_v54, 266 }
 0x102   : > { %1264 = vbcast.lane.b32.xlu0 %v5687_v54, 258 }
 0x103   : > { %v5784_v12 = vpop.permute.xlu1 %1248 }
 0x104   : > { %8625 = vst [vmem:[#allocation30_spill] sm:$0xff] %v5784_v12  ;;  %v5786_v13 = vpop.permute.xlu0 %864 }
 0x105   : > { %8626 = vst [vmem:[#allocation31_spill] sm:$0xff] %v5786_v13  ;;  %729 = vbcast.lane.b32.xlu1 %v5740_v61, 272 }
 0x106   : > { %503 = vbcast.lane.b32.xlu0 %v5731_v11, 272 }
 0x107   : > { %v5790_v6 = vpop.permute.xlu1 %904 }
 0x108   : > { %8627 = vst [vmem:[#allocation32_spill] sm:$0xff] %v5790_v6  ;;  %v5792_v5 = vpop.permute.xlu0 %1252 }
 0x109   : > { %8628 = vst [vmem:[#allocation33_spill] sm:$0xff] %v5792_v5  ;;  %1120 = vbcast.lane.b32.xlu1 %v5740_v61, 265 }
 0x10a   : > { %1116 = vbcast.lane.b32.xlu0 %v5740_v61, 257 }
 0x10b   : > { %v5796_v14 = vpop.permute.xlu1 %431 }
 0x10c   : > { %8629 = vst [vmem:[#allocation34_spill] sm:$0xff] %v5796_v14  ;;  %v5798_v9 = vpop.permute.xlu0 %908 }
 0x10d   : > { %8630 = vst [vmem:[#allocation35_spill] sm:$0xff] %v5798_v9  ;;  %450 = vbcast.lane.b32.xlu1 %v5687_v54, 280 }
 0x10e   : > { %1760 = vbcast.lane.b32.xlu0 %v5573_v17, 282 }
 0x10f   : > { %v5802_v13 = vpop.permute.xlu1 %657 }
 0x110   : > { %8631 = vst [vmem:[#allocation36_spill] sm:$0xff] %v5802_v13  ;;  %v5804_v12 = vpop.permute.xlu0 %469 }
 0x111   : > { %8632 = vst [vmem:[#allocation37_spill] sm:$0xff] %v5804_v12  ;;  %1076 = vbcast.lane.b32.xlu1 %v5697_v57, 273 }
 0x112   : > { %676 = vbcast.lane.b32.xlu0 %v5697_v57, 280 }
 0x113   : > { %v5808_v6 = vpop.permute.xlu1 %1060 }
 0x114   : > { %8633 = vst [vmem:[#allocation38_spill] sm:$0xff] %v5808_v6  ;;  %v5810_v5 = vpop.permute.xlu0 %695 }
 0x115   : > { %8634 = vst [vmem:[#allocation39_spill] sm:$0xff] %v5810_v5  ;;  %1720 = vbcast.lane.b32.xlu1 %v5697_v57, 266 }
 0x116   : > { %1716 = vbcast.lane.b32.xlu0 %v5697_v57, 258 }
 0x117   : > { %v5814_v9 = vpop.permute.xlu1 %1704 }
 0x118   : > { %8635 = vst [vmem:[#allocation40_spill] sm:$0xff] %v5814_v9  ;;  %v5816_v14 = vpop.permute.xlu0 %1700 }
 0x119   : > { %8636 = vst [vmem:[#allocation41_spill] sm:$0xff] %v5816_v14  ;;  %1312 = vbcast.lane.b32.xlu1 %v5731_v11, 258 }
 0x11a   : > { %928 = vbcast.lane.b32.xlu0 %v5731_v11, 273 }
 0x11b   : > { %v5820_v17 = vpop.permute.xlu1 %710 }
 0x11c   : > { %8637 = vst [vmem:[#allocation42_spill] sm:$0xff] %v5820_v17  ;;  %v5822_v12 = vpop.permute.xlu0 %484 }
 0x11d   : > { %8638 = vst [vmem:[#allocation43_spill] sm:$0xff] %v5822_v12  ;;  %884 = vbcast.lane.b32.xlu1 %v5687_v54, 281 }
 0x11e   : > { %1316 = vbcast.lane.b32.xlu0 %v5731_v11, 266 }
 0x11f   : > { %v5826_v5 = vpop.permute.xlu1 %1104 }
 0x120   : > { %8639 = vst [vmem:[#allocation44_spill] sm:$0xff] %v5826_v5  ;;  %v5828_v6 = vpop.permute.xlu0 %1100 }
 0x121   : > { %8640 = vst [vmem:[#allocation45_spill] sm:$0xff] %v5828_v6  ;;  %507 = vbcast.lane.b32.xlu1 %v5731_v11, 280 }
 0x122   : > { %1272 = vbcast.lane.b32.xlu0 %v5687_v54, 274 }
 0x123   : > { %v5832_v13 = vpop.permute.xlu1 %900 }
 0x124   : > { %8641 = vst [vmem:[#allocation46_spill] sm:$0xff] %v5832_v13  ;;  %v5834_v14 = vpop.permute.xlu0 %868 }
 0x125   : > { %8642 = vst [vmem:[#allocation47_spill] sm:$0xff] %v5834_v14  ;;  %1124 = vbcast.lane.b32.xlu1 %v5740_v61, 273 }
 0x126   : > { %733 = vbcast.lane.b32.xlu0 %v5740_v61, 280 }
 0x127   : > { %v5838_v17 = vpop.permute.xlu1 %912 }
 0x128   : > { %8643 = vst [vmem:[#allocation48_spill] sm:$0xff] %v5838_v17  ;;  %v5840_v12 = vpop.permute.xlu0 %1256  ;;  %v374_v17 = vld [vmem:[%s8435_s2] sm:$0x1f] }
 0x129   : > { %8644 = vst [vmem:[#allocation49_spill] sm:$0xff] %v5840_v12  ;;  %1768 = vbcast.lane.b32.xlu1 %v5740_v61, 266  ;;  %v5873_v9 = vrot.slane %v374_v17, %v5535_v7  ;;  %v5889_v0 = vrot.slane %v374_v17, %v5542_v10  ;;  %v5917_v62 = vrot.slane %v374_v17, %v5594_v24 }
 0x12a   : > { %1764 = vbcast.lane.b32.xlu0 %v5740_v61, 258 }
 0x12b   : > { %v5844_v6 = vpop.permute.xlu1 %1300  ;;  %v759_v7 = vmul.f32 %v5873_v9, %v5575_v18  ;;  %v1474_v60 = vmul.f32 %v5583_v21, %v5873_v9  ;;  %v758_v10 = vmul.f32 %v5873_v9, %v5566_v15  ;;  %v1539_v50 = vmul.f32 %v5596_v25, %v5889_v0 }
 0x12c   : > { %8645 = vst [vmem:[#allocation50_spill] sm:$0xff] %v5844_v6  ;;  %v5846_v5 = vpop.permute.xlu0 %1296  ;;  %v5860_v6 = vrot.slane %v374_v17, %v5516_v2  ;;  %v1538_v63 = vmul.f32 %v5598_v26, %v5889_v0 }
 0x12d   : > { %8646 = vst [vmem:[#allocation51_spill] sm:$0xff] %v5846_v5  ;;  %1724 = vbcast.lane.b32.xlu1 %v5697_v57, 274 }
 0x12e   : > { %1080 = vbcast.lane.b32.xlu0 %v5697_v57, 281  ;;  %v532_v2 = vmul.f32 %v5860_v6, %v5568_v16 }
 0x12f   : > { %v5850_v14 = vpop.permute.xlu1 %1096 }
 0x130   : > { %8647 = vst [vmem:[#allocation52_spill] sm:$0xff] %v5850_v14  ;;  %v5852_v13 = vpop.permute.xlu0 %1064  ;;  %v533_v14 = vmul.f32 %v5860_v6, %v5577_v19  ;;  %v5884_v19 = vld [vmem:[%s8436_s3] ss:$0 sm:$0xff] }
 0x131   : > { %8648 = vst [vmem:[#allocation53_spill] sm:$0xff] %v5852_v13  ;;  %1320 = vbcast.lane.b32.xlu1 %v5731_v11, 274  ;;  %v1411_v13 = vmul.f32 %v5575_v18, %v5860_v6  ;;  %v570_v58 = vadd.f32 %v5884_v19, %v532_v2  ;;  %v5905_v18 = vrot.slane %v374_v17, %v5677_v51 }
 0x132   : > { %932 = vbcast.lane.b32.xlu0 %v5731_v11, 281  ;;  %v571_v16 = vadd.f32 %v5884_v19, %v533_v14  ;;  %v955_v51 = vmul.f32 %v5889_v0, %v5581_v20  ;;  %v954_v2 = vmul.f32 %v5889_v0, %v5583_v21 }
 0x133   : > { %v5862_v5 = vpop.permute.xlu1 %488  ;;  %v1603_v24 = vmul.f32 %v5618_v32, %v5905_v18  ;;  %v790_v17 = vadd.f32 %v758_v10, %v570_v58  ;;  %v1150_v21 = vmul.f32 %v5905_v18, %v5598_v26  ;;  %v1794_v58 = vmul.f32 %v5630_v36, %v5917_v62 }
 0x134   : > { %8649 = vst [vmem:[#allocation54_spill] sm:$0xff] %v5862_v5  ;;  %v5864_v12 = vpop.permute.xlu0 %1708  ;;  %v5441_v10 = vmov 1983009808   ;;  %v1346_v26 = vmul.f32 %v5917_v62, %v5606_v28  ;;  %v760_v36 = vmul.f32 %v5873_v9, %v5587_v22 }
 0x135   : > { %8650 = vst [vmem:[#allocation55_spill] sm:$0xff] %v5864_v12  ;;  %461 = vbcast.lane.b32.xlu1 %v5604_v27, 264  ;;  %v1410_v12 = vmul.f32 %v5566_v15, %v5860_v6  ;;  %v791_v15 = vadd.f32 %v759_v7, %v571_v16  ;;  %v534_v7 = vmul.f32 %v5860_v6, %v5589_v23  ;;  %v2604_v23 = vunpack.c.l.s4 %v5441_v10 }
 0x136   : > { %457 = vbcast.lane.b32.xlu0 %v5604_v27, 256  ;;  %v986_v47 = vadd.f32 %v954_v2, %v790_v17 }
 0x137   : > { %v5877_v8 = vpop.permute.xlu1 %1108 }
 0x138   : > { %8651 = vst [vmem:[#allocation56_spill] sm:$0xff] %v5877_v8  ;;  %v5879_v5 = vpop.permute.xlu0 %714  ;;  %v1475_v8 = vmul.f32 %v5581_v20, %v5873_v9  ;;  %v1151_v20 = vmul.f32 %v5905_v18, %v5596_v25  ;;  %v511_v25 = vsub.s32 7, %v5511_v1  ;;  %v1182_v17 = vadd.f32 %v1150_v21, %v986_v47 }
 0x139   : > { %8652 = vst [vmem:[#allocation57_spill] sm:$0xff] %v5879_v5  ;;  %687 = vbcast.lane.b32.xlu1 %v5614_v30, 264  ;;  %v1443_v5 = vadd.f32 %v5884_v19, %v1411_v13  ;;  %v1442_v13 = vadd.f32 %v5884_v19, %v1410_v12  ;;  %v1540_v21 = vmul.f32 %v5622_v33, %v5889_v0 }
 0x13a   : > { %683 = vbcast.lane.b32.xlu0 %v5614_v30, 256 }
 0x13b   : > { %v5907_v14 = vpop.permute.xlu1 %1752  ;;  %v1507_v12 = vadd.f32 %v1475_v8, %v1443_v5  ;;  %v1795_v8 = vmul.f32 %v5628_v35, %v5917_v62  ;;  %v1347_v35 = vmul.f32 %v5917_v62, %v5618_v32  ;;  %v1476_v32 = vmul.f32 %v5608_v29, %v5873_v9 }
 0x13c   : > { %8653 = vst [vmem:[#allocation58_spill] sm:$0xff] %v5907_v14  ;;  %v5909_v56 = vpop.permute.xlu0 %1748  ;;  %v1602_v14 = vmul.f32 %v5606_v28, %v5905_v18 }
 0x13d   : > { %8654 = vst [vmem:[#allocation59_spill] sm:$0xff] %v5909_v56  ;;  %1128 = vbcast.lane.b32.xlu1 %v5740_v61, 281  ;;  %v1506_v56 = vadd.f32 %v1474_v60, %v1442_v13  ;;  %v1571_v60 = vadd.f32 %v1539_v50, %v1507_v12  ;;  %v987_v13 = vadd.f32 %v955_v51, %v791_v15 }
 0x13e   : > { %1276 = vbcast.lane.b32.xlu0 %v5687_v54, 282  ;;  %v572_v15 = vadd.f32 %v5884_v19, %v534_v7  ;;  %v1378_v7 = vadd.f32 %v1346_v26, %v1182_v17  ;;  %v1796_v17 = vmul.f32 %v5652_v43, %v5917_v62 }
 0x13f   : > { %v5935_v16 = vpop.permute.xlu1 %442  ;;  %v1570_v5 = vadd.f32 %v1538_v63, %v1506_v56  ;;  %v1635_v56 = vadd.f32 %v1603_v24, %v1571_v60  ;;  %v1412_v63 = vmul.f32 %v5587_v22, %v5860_v6  ;;  %v1183_v12 = vadd.f32 %v1151_v20, %v987_v13 }
 0x140   : > { %v5937_v54 = vpop.permute.xlu0 %438  ;;  %v5964_v24 = vrot.slane %v5528_v4, %v511_v25  ;;  %v2605_v22 = vunpack.c.0.s8 %v2604_v23  ;;  %v535_v60 = vmul.f32 %v5860_v6, %v5616_v31  ;;  %v956_v20 = vmul.f32 %v5889_v0, %v5608_v29 }
 0x141   : > { %888 = vbcast.lane.b32.xlu1 %v5604_v27, 257  ;;  %v1634_v50 = vadd.f32 %v1602_v14, %v1570_v5  ;;  %v1827_v28 = vadd.f32 %v1795_v8, %v1635_v56  ;;  %v1379_v5 = vadd.f32 %v1347_v35, %v1183_v12  ;;  %v1444_v47 = vadd.f32 %v5884_v19, %v1412_v63 }
 0x142   : > { %1772 = vbcast.lane.b32.xlu0 %v5740_v61, 274  ;;  %v792_v4 = vadd.f32 %v760_v36, %v572_v15  ;;  %v1152_v31 = vmul.f32 %v5905_v18, %v5622_v33  ;;  %v5982_v29 = vrot.slane %v5526_v3, %v511_v25  ;;  %v5985_v13 = vsub.s32 %v2605_v22, %v5511_v1 }
 0x143   : > { %v5955_v51 = vpop.permute.xlu1 %668  ;;  %v1826_v14 = vadd.f32 %v1794_v58, %v1634_v50  ;;  %v1859_v58 = vmax.f32 %v1379_v5, %v1827_v28  ;;  %v1508_v23 = vadd.f32 %v1476_v32, %v1444_v47  ;;  %v573_v26 = vadd.f32 %v5884_v19, %v535_v60 }
 0x144   : > { %v5957_v2 = vpop.permute.xlu0 %664  ;;  %8655 = vst [vmem:[#allocation60_spill] sm:$0xff] %v5985_v13  ;;  %v761_v50 = vmul.f32 %v5873_v9, %v5624_v34  ;;  %v1604_v35 = vmul.f32 %v5634_v37, %v5905_v18  ;;  %v988_v56 = vadd.f32 %v956_v20, %v792_v4  ;;  %v1413_v36 = vmul.f32 %v5624_v34, %v5860_v6 }
 0x145   : > { %1728 = vbcast.lane.b32.xlu1 %v5697_v57, 282  ;;  %v1858_v10 = vmax.f32 %v1378_v7, %v1826_v14  ;;  %v1572_v33 = vadd.f32 %v1540_v21, %v1508_v23  ;;  %v1348_v3 = vmul.f32 %v5917_v62, %v5634_v37  ;;  %v6000_v63 = vmax.f32 %v1859_v58, 0.0 }
 0x146   : > { %892 = vbcast.lane.b32.xlu0 %v5604_v27, 265  ;;  %v957_v12 = vmul.f32 %v5889_v0, %v5636_v38  ;;  %v1184_v28 = vadd.f32 %v1152_v31, %v988_v56  ;;  %v1477_v34 = vmul.f32 %v5636_v38, %v5873_v9  ;;  %v793_v37 = vadd.f32 %v761_v50, %v573_v26 }
 0x147   : > { %v5973_v57 = vpop.permute.xlu1 %1292  ;;  %8657 = vst [vmem:[#allocation62_spill] sm:$0xff] %v6000_v63  ;;  %v6002_v15 = vmax.f32 %v1858_v10, 0.0  ;;  %v1636_v14 = vadd.f32 %v1604_v35, %v1572_v33  ;;  %v537_v32 = vmul.f32 %v5860_v6, %v5640_v39  ;;  %v536_v22 = vmul.f32 %v5860_v6, %v5642_v40 }
 0x148   : > { %v5975_v8 = vpop.permute.xlu0 %1260  ;;  %v1445_v43 = vadd.f32 %v5884_v19, %v1413_v36  ;;  %v1380_v7 = vadd.f32 %v1348_v3, %v1184_v28  ;;  %v1541_v38 = vmul.f32 %v5654_v44, %v5889_v0  ;;  %v989_v47 = vadd.f32 %v957_v12, %v793_v37 }
 0x149   : > { %518 = vbcast.lane.b32.xlu1 %v5964_v24, 264  ;;  %8658 = vst [vmem:[#allocation63_spill] sm:$0xff] %v6002_v15  ;;  %v1828_v20 = vadd.f32 %v1796_v17, %v1636_v14  ;;  %v2108_v21 = vrot.slane %v6002_v15, 2  ;;  %v8482_v39 = vrot.slane %v6000_v63, 2  ;;  %v1605_v40 = vmul.f32 %v5666_v48, %v5905_v18 }
 0x14a   : > { %514 = vbcast.lane.b32.xlu0 %v5964_v24, 256  ;;  %v1509_v4 = vadd.f32 %v1477_v34, %v1445_v43  ;;  %v1955_v58 = vrot.slane %v6002_v15, 1  ;;  %v1956_v10 = vrot.slane %v6000_v63, 1  ;;  %v575_v23 = vadd.f32 %v5884_v19, %v537_v32 }
 0x14b   : > { %v5996_v25 = vpop.permute.xlu1 %1304  ;;  %v574_v31 = vadd.f32 %v5884_v19, %v536_v22  ;;  %v2261_v26 = vrot.slane %v6002_v15, 3  ;;  %v8483_v50 = vrot.slane %v6000_v63, 3  ;;  %v1414_v35 = vmul.f32 %v5648_v42, %v5860_v6 }
 0x14c   : > { %v5998_v1 = vpop.permute.xlu0 %916  ;;  %v1153_v56 = vmul.f32 %v5905_v18, %v5654_v44  ;;  %v1573_v33 = vadd.f32 %v1541_v38, %v1509_v4  ;;  %v763_v12 = vmul.f32 %v5873_v9, %v5646_v41  ;;  %v1415_v17 = vmul.f32 %v5646_v41, %v5860_v6 }
 0x14d   : > { %8656 = vst [vmem:[#allocation61_spill] sm:$0xff] %v5998_v1  ;;  %744 = vbcast.lane.b32.xlu1 %v5982_v29, 264  ;;  %v1860_v28 = vmax.f32 %v1380_v7, %v1828_v20  ;;  %v6052_v34 = vsel %vm2107_vm0, %v2108_v21, %v8482_v39  ;;  %v1478_v44 = vmul.f32 %v5660_v46, %v5873_v9  ;;  %v2414_v14 = vrot.slane %v6002_v15, 4 }
 0x14e   : > { %740 = vbcast.lane.b32.xlu0 %v5982_v29, 256  ;;  %v1637_v37 = vadd.f32 %v1605_v40, %v1573_v33  ;;  %v762_v41 = vmul.f32 %v5873_v9, %v5648_v42  ;;  %v1479_v32 = vmul.f32 %v5658_v45, %v5873_v9  ;;  %v6068_v22 = vsel %vm1954_vm1, %v1955_v58, %v1956_v10 }
 0x14f   : > { %v6019_v60 = vpop.permute.xlu1 %876  ;;  %v1446_v43 = vadd.f32 %v5884_v19, %v1414_v35  ;;  %v1185_v7 = vadd.f32 %v1153_v56, %v989_v47  ;;  %v1542_v42 = vmul.f32 %v5670_v49, %v5889_v0  ;;  %v795_v4 = vadd.f32 %v763_v12, %v575_v23 }
 0x150   : > { %8659 = vst [vmem:[#allocation64_spill] sm:$0xff] %v6019_v60  ;;  %v6021_v5 = vpop.permute.xlu0 %872  ;;  %v1447_v40 = vadd.f32 %v5884_v19, %v1415_v17  ;;  %v959_v58 = vmul.f32 %v5889_v0, %v5658_v45  ;;  %v6087_v33 = vmax.f32 %v1860_v28, 0.0  ;;  %v958_v47 = vmul.f32 %v5889_v0, %v5660_v46  ;;  %v8665_v17 = vld [vmem:[#allocation2_spill] sm:$0xff]  ;;  %v8717_v60 = vld [vmem:[#allocation20_spill] sm:$0xff] }
 0x151   : > { %8660 = vst [vmem:[#allocation65_spill] sm:$0xff] %v6021_v5  ;;  %465 = vbcast.lane.b32.xlu1 %v5604_v27, 272  ;;  %v1510_v35 = vadd.f32 %v1478_v44, %v1446_v43  ;;  %v794_v23 = vadd.f32 %v762_v41, %v574_v31  ;;  %v1606_v12 = vmul.f32 %v5689_v55, %v5905_v18 }
 0x152   : > { %1324 = vbcast.lane.b32.xlu0 %v5731_v11, 282  ;;  %v1797_v11 = vmul.f32 %v5679_v52, %v5917_v62  ;;  %v1349_v52 = vmul.f32 %v5917_v62, %v5666_v48  ;;  %v6073_v48 = vsel %vm2260_vm2, %v2261_v26, %v8483_v50  ;;  %v1543_v26 = vmul.f32 %v5681_v53, %v5889_v0 }
 0x153   : > { %v6041_v36 = vpop.permute.xlu1 %1744  ;;  %8664 = vst [vmem:[#allocation69_spill] sm:$0xff] %v6087_v33  ;;  %v1607_v45 = vmul.f32 %v5701_v59, %v5905_v18  ;;  %v538_v28 = vmul.f32 %v5860_v6, %v8665_v17  ;;  %v1154_v46 = vmul.f32 %v5905_v18, %v5670_v49  ;;  %v1574_v44 = vadd.f32 %v1542_v42, %v1510_v35 }
 0x154   : > { %8661 = vst [vmem:[#allocation66_spill] sm:$0xff] %v6041_v36  ;;  %v6043_v3 = vpop.permute.xlu0 %1712  ;;  %v1829_v38 = vadd.f32 %v1797_v11, %v1637_v37  ;;  %v1381_v56 = vadd.f32 %v1349_v52, %v1185_v7  ;;  %v1511_v11 = vadd.f32 %v1479_v32, %v1447_v40  ;;  %v1155_v31 = vmul.f32 %v5905_v18, %v5681_v53  ;;  %v8668_v32 = vld [vmem:[#allocation8_spill] sm:$0xff]  ;;  %v8669_v40 = vld [vmem:[#allocation9_spill] sm:$0xff] }
 0x155   : > { %1084 = vbcast.lane.b32.xlu1 %v5614_v30, 257  ;;  %v1799_v7 = vmul.f32 %v8668_v32, %v5917_v62  ;;  %v1798_v39 = vmul.f32 %v8669_v40, %v5917_v62  ;;  %v991_v17 = vadd.f32 %v959_v58, %v795_v4  ;;  %v990_v50 = vadd.f32 %v958_v47, %v794_v23  ;;  %v8670_v4 = vld [vmem:[#allocation3_spill] sm:$0xff]  ;;  %v8675_v40 = vld [vmem:[#allocation4_spill] sm:$0xff] }
 0x156   : > { %691 = vbcast.lane.b32.xlu0 %v5614_v30, 272  ;;  %v1861_v52 = vmax.f32 %v1381_v56, %v1829_v38  ;;  %v1575_v41 = vadd.f32 %v1543_v26, %v1511_v11  ;;  %v1958_v49 = vrot.slane %v6087_v33, 1  ;;  %v2415_v42 = vrot.slane %v6000_v63, 4 }
 0x157   : > { %v6078_v20 = vpop.permute.xlu1 %499  ;;  %v1350_v53 = vmul.f32 %v5917_v62, %v5689_v55  ;;  %v1638_v38 = vadd.f32 %v1606_v12, %v1574_v44  ;;  %v1351_v26 = vmul.f32 %v5917_v62, %v5701_v59  ;;  %v576_v56 = vadd.f32 %v5884_v19, %v538_v28 }
 0x158   : > { %8662 = vst [vmem:[#allocation67_spill] sm:$0xff] %v6078_v20  ;;  %v6080_v21 = vpop.permute.xlu0 %495  ;;  %v1639_v35 = vadd.f32 %v1607_v45, %v1575_v41  ;;  %v764_v58 = vmul.f32 %v5873_v9, %v8670_v4  ;;  %v6124_v47 = vmax.f32 %v1861_v52, 0.0  ;;  %v1186_v55 = vadd.f32 %v1154_v46, %v990_v50 }
 0x159   : > { %8663 = vst [vmem:[#allocation68_spill] sm:$0xff] %v6080_v21  ;;  %936 = vbcast.lane.b32.xlu1 %v5964_v24, 257  ;;  %v1187_v12 = vadd.f32 %v1155_v31, %v991_v17  ;;  %v1830_v32 = vadd.f32 %v1798_v39, %v1638_v38  ;;  %v2264_v59 = vrot.slane %v6087_v33, 3  ;;  %v2111_v45 = vrot.slane %v6087_v33, 2 }
 0x15a   : > { %1088 = vbcast.lane.b32.xlu0 %v5614_v30, 265  ;;  %8671 = vst [vmem:[#allocation8_spill] sm:$0xff] %v6124_v47  ;;  %v1831_v44 = vadd.f32 %v1799_v7, %v1639_v35  ;;  %v6135_v28 = vsel %vm2413_vm3, %v2414_v14, %v2415_v42  ;;  %v2417_v52 = vrot.slane %v6087_v33, 4  ;;  %v1382_v41 = vadd.f32 %v1350_v53, %v1186_v55  ;;  %v8676_v7 = vld [vmem:[#allocation5_spill] sm:$0xff]  ;;  %v8679_v55 = vld [vmem:[#allocation6_spill] sm:$0xff] }
 0x15b   : > { %v6101_v37 = vpop.permute.xlu1 %725  ;;  %8674 = vst [vmem:[#allocation71_spill] sm:$0xff] %v6135_v28  ;;  %v960_v50 = vmul.f32 %v5889_v0, %v8675_v40  ;;  %v1480_v39 = vmul.f32 %v8675_v40, %v5873_v9  ;;  %v1383_v46 = vadd.f32 %v1351_v26, %v1187_v12  ;;  %v796_v31 = vadd.f32 %v764_v58, %v576_v56 }
 0x15c   : > { %8666 = vst [vmem:[#allocation2_spill] sm:$0xff] %v6101_v37  ;;  %v6103_v43 = vpop.permute.xlu0 %721  ;;  %v539_v17 = vmul.f32 %v5860_v6, %v8676_v7  ;;  %v6151_v14 = vsel %vm1954_vm1, %v1956_v10, %v1958_v49  ;;  %v1544_v26 = vmul.f32 %v8679_v55, %v5889_v0  ;;  %v1862_v58 = vmax.f32 %v1382_v41, %v1830_v32  ;;  %v8682_v41 = vld [vmem:[#allocation10_spill] sm:$0xff] }
 0x15d   : > { %8667 = vst [vmem:[#allocation70_spill] sm:$0xff] %v6103_v43  ;;  %1776 = vbcast.lane.b32.xlu1 %v5740_v61, 282  ;;  %v1416_v61 = vmul.f32 %v8670_v4, %v5860_v6  ;;  %v1863_v56 = vmax.f32 %v1383_v46, %v1831_v44  ;;  %v8680_v12 = vrot.slane %v6000_v63, 3  ;;  %v8681_v10 = vrot.slane %v6000_v63, 2 }
 0x15e   : > { %940 = vbcast.lane.b32.xlu0 %v5964_v24, 265  ;;  %v992_v44 = vadd.f32 %v960_v50, %v796_v31  ;;  %v1608_v46 = vmul.f32 %v8682_v41, %v5905_v18  ;;  %v6174_v33 = vsel %vm2413_vm3, %v2415_v42, %v2417_v52  ;;  %v1156_v13 = vmul.f32 %v5905_v18, %v8679_v55  ;;  %v8690_v55 = vld [vmem:[#allocation7_spill] sm:$0xff] }
 0x15f   : > { %v6126_v23 = vpop.permute.xlu1 %1756  ;;  %v1448_v4 = vadd.f32 %v5884_v19, %v1416_v61  ;;  %v6162_v40 = vsel %vm2260_vm2, %v8680_v12, %v2264_v59  ;;  %v6167_v7 = vsel %vm2107_vm0, %v8681_v10, %v2111_v45  ;;  %8683 = vst [vmem:[#allocation6_spill] sm:$0xff] %v6174_v33  ;;  %v577_v12 = vadd.f32 %v5884_v19, %v539_v17  ;;  %v8689_v17 = vld [vmem:[#allocation16_spill] sm:$0xff] }
 0x160   : > { %8672 = vst [vmem:[#allocation9_spill] sm:$0xff] %v6126_v23  ;;  %v6128_v11 = vpop.permute.xlu0 %1112  ;;  %v8686_v61 = vrot.slane %v6124_v47, 2  ;;  %v6191_v42 = vmax.f32 %v1862_v58, 0.0  ;;  %v1800_v53 = vmul.f32 %v8689_v17, %v5917_v62  ;;  %v765_v33 = vmul.f32 %v5873_v9, %v8690_v55 }
 0x161   : > { %8673 = vst [vmem:[#allocation3_spill] sm:$0xff] %v6128_v11  ;;  %1280 = vbcast.lane.b32.xlu1 %v5604_v27, 258  ;;  %v1512_v32 = vadd.f32 %v1480_v39, %v1448_v4  ;;  %v6189_v4 = vmax.f32 %v1863_v56, 0.0  ;;  %v1417_v58 = vmul.f32 %v8690_v55, %v5860_v6  ;;  %v8693_v39 = vld [vmem:[#allocation12_spill] sm:$0xff]  ;;  %v1188_v15 = vadd.f32 %v1156_v13, %v992_v44 }
 0x162   : > { %896 = vbcast.lane.b32.xlu0 %v5604_v27, 273  ;;  %v6186_v50 = vsel %vm2107_vm0, %v2111_v45, %v8686_v61  ;;  %8688 = vst [vmem:[#allocation74_spill] sm:$0xff] %v6191_v42  ;;  %v8691_v45 = vrot.slane %v6124_v47, 1  ;;  %v541_v28 = vmul.f32 %v5860_v6, %v8693_v39  ;;  %v8697_v55 = vrot.slane %v6124_v47, 4 }
 0x163   : > { %v6144_v38 = vpop.permute.xlu1 %672  ;;  %v1576_v31 = vadd.f32 %v1544_v26, %v1512_v32  ;;  %8687 = vst [vmem:[#allocation73_spill] sm:$0xff] %v6189_v4  ;;  %v8692_v26 = vrot.slane %v6124_v47, 3  ;;  %v1352_v32 = vmul.f32 %v5917_v62, %v8682_v41  ;;  %v8699_v41 = vld [vmem:[#allocation13_spill] sm:$0xff]  ;;  %v1962_v13 = vrot.slane %v6191_v42, 1 }
 0x164   : > { %8677 = vst [vmem:[#allocation4_spill] sm:$0xff] %v6144_v38  ;;  %v6146_v35 = vpop.permute.xlu0 %446  ;;  %v6202_v61 = vsel %vm1954_vm1, %v1958_v49, %v8691_v45  ;;  %v8508_v21 = vmov 0.0|0.0  }
 0x165   : > { %8678 = vst [vmem:[#allocation5_spill] sm:$0xff] %v6146_v35  ;;  %522 = vbcast.lane.b32.xlu1 %v5964_v24, 272  ;;  %v6207_v56 = vsel %vm2260_vm2, %v2264_v59, %v8692_v26  ;;  %v1640_v17 = vadd.f32 %v1608_v46, %v1576_v31  ;;  %v6226_v26 = vsel %vm2413_vm3, %v2417_v52, %v8697_v55  ;;  %v2421_v31 = vrot.slane %v6191_v42, 4 }
 0x166   : > { %1284 = vbcast.lane.b32.xlu0 %v5604_v27, 266  ;;  %8698 = vst [vmem:[#allocation12_spill] sm:$0xff] %v6226_v26  ;;  %v540_v46 = vmul.f32 %v5860_v6, %v8699_v41  ;;  %v797_v55 = vadd.f32 %v765_v33, %v577_v12  ;;  %v1449_v41 = vadd.f32 %v5884_v19, %v1417_v58  ;;  %v8700_v26 = vld [vmem:[#allocation14_spill] sm:$0xff] }
 0x167   : > { %v6179_v63 = vpop.permute.xlu1 %1072  ;;  %v1832_v39 = vadd.f32 %v1800_v53, %v1640_v17  ;;  %v1384_v53 = vadd.f32 %v1352_v32, %v1188_v15  ;;  %v579_v17 = vadd.f32 %v5884_v19, %v541_v28  ;;  %v767_v44 = vmul.f32 %v5873_v9, %v8700_v26  ;;  %5338 = vmatprep.subr.bf16.mxu0 %v8508_v21 }
 0x168   : > { %8684 = vst [vmem:[#allocation10_spill] sm:$0xff] %v6179_v63  ;;  %v6181_v10 = vpop.permute.xlu0 %1068  ;;  %v578_v15 = vadd.f32 %v5884_v19, %v540_v46  ;;  %v8704_v28 = vrot.slane %v6189_v4, 1  ;;  %v1419_v46 = vmul.f32 %v8700_v26, %v5860_v6  ;;  %v3097_v26 = vld [vmem:[%s8437_s4] sm:$0xff]  ;;  %5392 = vmatprep.subr.bf16.mxu1 %v8508_v21 }
 0x169   : > { %8685 = vst [vmem:[#allocation72_spill] sm:$0xff] %v6181_v10  ;;  %1132 = vbcast.lane.b32.xlu1 %v5982_v29, 257  ;;  %v8694_v10 = vld [vmem:[#allocation11_spill] sm:$0xff]  ;;  %v1864_v58 = vmax.f32 %v1384_v53, %v1832_v39 }
 0x16a   : > { %748 = vbcast.lane.b32.xlu0 %v5982_v29, 272  ;;  %v961_v49 = vmul.f32 %v5889_v0, %v8694_v10  ;;  %v1481_v45 = vmul.f32 %v8694_v10, %v5873_v9  ;;  %v2115_v10 = vrot.slane %v6191_v42, 2  ;;  %v6256_v32 = vsel %vm1954_vm1, %v1962_v13, %v8704_v28  ;;  %v8707_v39 = vld [vmem:[#allocation15_spill] sm:$0xff] }
 0x16b   : > { %v6219_v63 = vpop.permute.xlu1 %924  ;;  %v1418_v13 = vmul.f32 %v8707_v39, %v5860_v6  ;;  %v799_v28 = vadd.f32 %v767_v44, %v579_v17  ;;  %v6293_v17 = vmax.f32 %v1864_v58, 0.0  ;;  %v1451_v58 = vadd.f32 %v5884_v19, %v1419_v46  ;;  %v3100_v46 = vld [vmem:[%s8437_s4 + $0x18] sm:$0xff] }
 0x16c   : > { %8695 = vst [vmem:[#allocation16_spill] sm:$0xff] %v6219_v63  ;;  %v6221_v59 = vpop.permute.xlu0 %920  ;;  %v8701_v63 = vld [vmem:[#allocation17_spill] sm:$0xff]  ;;  %v993_v33 = vadd.f32 %v961_v49, %v797_v55  ;;  %v1513_v12 = vadd.f32 %v1481_v45, %v1449_v41  ;;  %v8706_v49 = vrot.slane %v6189_v4, 3  ;;  %v766_v55 = vmul.f32 %v5873_v9, %v8707_v39 }
 0x16d   : > { %8696 = vst [vmem:[#allocation7_spill] sm:$0xff] %v6221_v59  ;;  %1092 = vbcast.lane.b32.xlu1 %v5614_v30, 273  ;;  %v2268_v59 = vrot.slane %v6191_v42, 3  ;;  %v1545_v38 = vmul.f32 %v8701_v63, %v5889_v0  ;;  %v8708_v41 = vld [vmem:[#allocation21_spill] sm:$0xff]  ;;  %v8711_v39 = vrot.slane %v6189_v4, 4 }
 0x16e   : > { %1136 = vbcast.lane.b32.xlu0 %v5982_v29, 265  ;;  %v1609_v53 = vmul.f32 %v8708_v41, %v5905_v18  ;;  %8713 = vst [vmem:[#allocation21_spill] sm:$0xff] %v6293_v17 }
 0x16f   : > { %v6244_v11 = vpop.permute.xlu1 %880  ;;  %v6266_v45 = vsel %vm2260_vm2, %v2268_v59, %v8706_v49  ;;  %v3098_v49 = vld [vmem:[%s8437_s4 + $0x8] sm:$0xff]  ;;  %v6291_v44 = vsel %vm2413_vm3, %v2421_v31, %v8711_v39  ;;  %v798_v39 = vadd.f32 %v766_v55, %v578_v15  ;;  %v3099_v15 = vld [vmem:[%s8437_s4 + $0x10] sm:$0xff] }
 0x170   : > { %8702 = vst [vmem:[#allocation11_spill] sm:$0xff] %v6244_v11  ;;  %v6246_v35 = vpop.permute.xlu0 %1308  ;;  %v8705_v11 = vrot.slane %v6189_v4, 2  ;;  %8712 = vst [vmem:[#allocation15_spill] sm:$0xff] %v6291_v44  ;;  %v5339_v31 = vpack.c.bf16 %v3098_v49, %v3097_v26  ;;  %v8511_v26 = vrot.slane %v6293_v17, 3  ;;  %v8514_v49 = vrot.slane %v6293_v17, 2 }
 0x171   : > { %8703 = vst [vmem:[#allocation13_spill] sm:$0xff] %v6246_v35  ;;  %1736 = vbcast.lane.b32.xlu1 %v5614_v30, 266  ;;  %v8716_v35 = vld [vmem:[#allocation19_spill] sm:$0xff] }
 0x172   : > { %1732 = vbcast.lane.b32.xlu0 %v5614_v30, 258  ;;  %v6261_v42 = vsel %vm2107_vm0, %v2115_v10, %v8705_v11  ;;  %v1157_v11 = vmul.f32 %v5905_v18, %v8701_v63  ;;  %v1577_v10 = vadd.f32 %v1545_v38, %v1513_v12  ;;  %v8714_v63 = vld [vmem:[#allocation18_spill] sm:$0xff]  ;;  %v962_v43 = vmul.f32 %v5889_v0, %v8716_v35 }
 0x173   : > { %v6278_v52 = vpop.permute.xlu1 %1268  ;;  %v963_v38 = vmul.f32 %v5889_v0, %v8714_v63  ;;  %v1483_v12 = vmul.f32 %v8714_v63, %v5873_v9  ;;  %v1482_v37 = vmul.f32 %v8716_v35, %v5873_v9  ;;  %v1353_v63 = vmul.f32 %v5917_v62, %v8708_v41  ;;  %5340 = vmatpush1.bf16.msra.mxu0 %v5339_v31 }
 0x174   : > { %8709 = vst [vmem:[#allocation14_spill] sm:$0xff] %v6278_v52  ;;  %v6280_v59 = vpop.permute.xlu0 %1264  ;;  %v1641_v44 = vadd.f32 %v1609_v53, %v1577_v10  ;;  %v1189_v5 = vadd.f32 %v1157_v11, %v993_v33  ;;  %v542_v35 = vmul.f32 %v5860_v6, %v8717_v60  ;;  %5341 = vmatprep.subr.bf16.mxu0 %v8508_v21 }
 0x175   : > { %8710 = vst [vmem:[#allocation17_spill] sm:$0xff] %v6280_v59  ;;  %v8715_v59 = vld [vmem:[#allocation24_spill] sm:$0xff]  ;;  %1328 = vbcast.lane.b32.xlu1 %v5964_v24, 258  ;;  %v995_v55 = vadd.f32 %v963_v38, %v799_v28  ;;  %v5342_v60 = vpack.c.bf16 %v3100_v46, %v3099_v15  ;;  %v1515_v41 = vadd.f32 %v1483_v12, %v1451_v58  ;;  %v3102_v12 = vld [vmem:[%s8437_s4 + $0x28] sm:$0xff] }
 0x176   : > { %v1801_v52 = vmul.f32 %v8715_v59, %v5917_v62  ;;  %944 = vbcast.lane.b32.xlu0 %v5964_v24, 273  ;;  %v1450_v59 = vadd.f32 %v5884_v19, %v1418_v13  ;;  %v8507_v13 = vrot.slane %v6293_v17, 1  ;;  %v994_v53 = vadd.f32 %v962_v43, %v798_v39  ;;  %5402 = vmatpush1.bf16.msra.mxu1 %v5339_v31  ;;  %v8723_v31 = vld [vmem:[#allocation23_spill] sm:$0xff] }
 0x177   : > { %v6314_v20 = vpop.permute.xlu1 %729  ;;  %v1385_v10 = vadd.f32 %v1353_v63, %v1189_v5  ;;  %5343 = vmatpush1.bf16.msra.mxu0 %v5342_v60  ;;  %v3101_v5 = vld [vmem:[%s8437_s4 + $0x20] sm:$0xff]  ;;  %5393 = vmatprep.subr.bf16.mxu1 %v8508_v21  ;;  %v768_v58 = vmul.f32 %v5873_v9, %v8723_v31  ;;  %v1420_v46 = vmul.f32 %v8723_v31, %v5860_v6  ;;  %v8730_v31 = vrot.slane %v6189_v4, 2 }
 0x178   : > { %8718 = vst [vmem:[#allocation18_spill] sm:$0xff] %v6314_v20  ;;  %v6316_v36 = vpop.permute.xlu0 %503  ;;  %v1833_v33 = vadd.f32 %v1801_v52, %v1641_v44  ;;  %v1514_v11 = vadd.f32 %v1482_v37, %v1450_v59  ;;  %v580_v52 = vadd.f32 %v5884_v19, %v542_v35  ;;  %v8720_v44 = vld [vmem:[#allocation22_spill] sm:$0xff]  ;;  %v8725_v35 = vrot.slane %v6189_v4, 1  ;;  %5344 = vmatprep.subr.bf16.mxu0 %v8508_v21 }
 0x179   : > { %8719 = vst [vmem:[#allocation24_spill] sm:$0xff] %v6316_v36  ;;  %1288 = vbcast.lane.b32.xlu1 %v5604_v27, 274  ;;  %v1158_v38 = vmul.f32 %v5905_v18, %v8720_v44  ;;  %v1546_v37 = vmul.f32 %v8720_v44, %v5889_v0  ;;  %v8724_v63 = vld [vmem:[#allocation26_spill] sm:$0xff]  ;;  %v8727_v44 = vld [vmem:[#allocation25_spill] sm:$0xff]  ;;  %v8732_v21 = vrot.slane %v6293_v17, 4 }
 0x17a   : > { %1332 = vbcast.lane.b32.xlu0 %v5964_v24, 266  ;;  %v1865_v39 = vmax.f32 %v1385_v10, %v1833_v33  ;;  %v553_v59 = vmul.f32 %v5860_v6, %v8724_v63  ;;  %v6357_v15 = vsel %vm1954_vm1, %v8725_v35, %v8507_v13  ;;  %v1159_v28 = vmul.f32 %v5905_v18, %v8727_v44 }
 0x17b   : > { %v6337_v43 = vpop.permute.xlu1 %1120  ;;  %8726 = vst [vmem:[#allocation22_spill] sm:$0xff] %v6357_v15  ;;  %v5345_v33 = vpack.c.bf16 %v3102_v12, %v3101_v5  ;;  %v1547_v10 = vmul.f32 %v8727_v44, %v5889_v0  ;;  %v8728_v63 = vrot.slane %v6189_v4, 3  ;;  %v6380_v13 = vsel %vm2107_vm0, %v8730_v31, %v8514_v49  ;;  %5403 = vmatpush1.bf16.msra.mxu1 %v5342_v60  ;;  %v3103_v31 = vld [vmem:[%s8437_s4 + $0x30] sm:$0xff] }
 0x17c   : > { %8721 = vst [vmem:[#allocation19_spill] sm:$0xff] %v6337_v43  ;;  %v6339_v27 = vpop.permute.xlu0 %1116  ;;  %8731 = vst [vmem:[#allocation26_spill] sm:$0xff] %v6380_v13  ;;  %v8733_v5 = vrot.slane %v6189_v4, 4  ;;  %v6389_v44 = vadd.f32 %v1158_v38, %v994_v53  ;;  %v8738_v60 = vmov 0.0|0.0   ;;  %v6404_v53 = vmax.f32 %v1865_v39, 0.0  ;;  %v8740_v38 = vld [vmem:[#allocation28_spill] sm:$0xff] }
 0x17d   : > { %8722 = vst [vmem:[#allocation20_spill] sm:$0xff] %v6339_v27  ;;  %752 = vbcast.lane.b32.xlu1 %v5982_v29, 280  ;;  %v6373_v35 = vsel %vm2260_vm2, %v8728_v63, %v8511_v26  ;;  %v1578_v27 = vadd.f32 %v1546_v37, %v1514_v11  ;;  %v8735_v63 = vld [vmem:[#allocation27_spill] sm:$0xff]  ;;  %5346 = vmatpush1.bf16.msra.mxu0 %v5345_v33  ;;  %v8741_v4 = vld [vmem:[#allocation29_spill] sm:$0xff] }
 0x17e   : > { %526 = vbcast.lane.b32.xlu0 %v5964_v24, 280  ;;  %8729 = vst [vmem:[#allocation23_spill] sm:$0xff] %v6373_v35  ;;  %v6387_v12 = vsel %vm2413_vm3, %v8733_v5, %v8732_v21  ;;  %v552_v26 = vmul.f32 %v5860_v6, %v8735_v63  ;;  %v3104_v21 = vld [vmem:[%s8437_s4 + $0x38] sm:$0xff]  ;;  %5394 = vmatprep.subr.bf16.mxu1 %v8738_v60  ;;  %8739 = vst [vmem:[#allocation76_spill] sm:$0xff] %v6404_v53 }
 0x17f   : > { %8734 = vst [vmem:[#allocation25_spill] sm:$0xff] %v6387_v12  ;;  %v6393_v43 = vpop.permute.xlu1 %450  ;;  %v591_v11 = vadd.f32 %v5884_v19, %v553_v59  ;;  %v779_v37 = vmul.f32 %v5873_v9, %v8740_v38  ;;  %5347 = vmatprep.subr.bf16.mxu0 %v8738_v60  ;;  %v5348_v5 = vpack.c.bf16 %v3104_v21, %v3103_v31 }
 0x180   : > { %8736 = vst [vmem:[#allocation27_spill] sm:$0xff] %v6393_v43  ;;  %v6395_v20 = vpop.permute.xlu0 %1760  ;;  %v6410_v63 = vadd.f32 %v768_v58, %v580_v52  ;;  %v6413_v49 = vadd.f32 %v5884_v19, %v1420_v46  ;;  %v1191_v12 = vadd.f32 %v1159_v28, %v995_v55  ;;  %v1579_v39 = vadd.f32 %v1547_v10, %v1515_v41  ;;  %v8742_v58 = vld [vmem:[#allocation30_spill] sm:$0xff]  ;;  %v8743_v28 = vld [vmem:[#allocation33_spill] sm:$0xff] }
 0x181   : > { %8737 = vst [vmem:[#allocation75_spill] sm:$0xff] %v6395_v20  ;;  %1780 = vbcast.lane.b32.xlu1 %v5982_v29, 258  ;;  %v1431_v59 = vmul.f32 %v8740_v38, %v5860_v6  ;;  %v778_v43 = vmul.f32 %v5873_v9, %v8741_v4  ;;  %v1430_v31 = vmul.f32 %v8741_v4, %v5860_v6  ;;  %v3105_v10 = vld [vmem:[%s8437_s4 + $0x40] sm:$0xff]  ;;  %v3106_v4 = vld [vmem:[%s8437_s4 + $0x48] sm:$0xff]  ;;  %v8747_v20 = vld [vmem:[#allocation41_spill] sm:$0xff] }
 0x182   : > { %1140 = vbcast.lane.b32.xlu0 %v5982_v29, 273  ;;  %5404 = vmatpush1.bf16.msra.mxu1 %v5345_v33  ;;  %v590_v52 = vadd.f32 %v5884_v19, %v552_v26  ;;  %v1610_v55 = vmul.f32 %v8742_v58, %v5905_v18  ;;  %v1611_v46 = vmul.f32 %v8743_v28, %v5905_v18 }
 0x183   : > { %v6428_v21 = vpop.permute.xlu1 %1076  ;;  %5349 = vmatpush1.bf16.msra.mxu0 %v5348_v5  ;;  %5395 = vmatprep.subr.bf16.mxu1 %v8738_v60  ;;  %v6439_v26 = vadd.f32 %v779_v37, %v591_v11  ;;  %v1802_v13 = vmul.f32 %v8747_v20, %v5917_v62  ;;  %v5351_v11 = vpack.c.bf16 %v3106_v4, %v3105_v10  ;;  %v8520_v37 = vrot.slane %v6404_v53, 4 }
 0x184   : > { %8744 = vst [vmem:[#allocation28_spill] sm:$0xff] %v6428_v21  ;;  %v6430_v41 = vpop.permute.xlu0 %676  ;;  %5350 = vmatprep.subr.bf16.mxu0 %v8738_v60  ;;  %v1463_v33 = vadd.f32 %v5884_v19, %v1431_v59  ;;  %v810_v38 = vadd.f32 %v778_v43, %v590_v52  ;;  %v1462_v21 = vadd.f32 %v5884_v19, %v1430_v31  ;;  %v8750_v59 = vld [vmem:[#allocation34_spill] sm:$0xff]  ;;  %v8751_v31 = vrot.slane %v6404_v53, 2 }
 0x185   : > { %8745 = vst [vmem:[#allocation29_spill] sm:$0xff] %v6430_v41  ;;  %v8746_v41 = vld [vmem:[#allocation40_spill] sm:$0xff]  ;;  %1740 = vbcast.lane.b32.xlu1 %v5614_v30, 274  ;;  %v1354_v35 = vmul.f32 %v5917_v62, %v8742_v58  ;;  %v1355_v20 = vmul.f32 %v5917_v62, %v8743_v28  ;;  %v1643_v15 = vadd.f32 %v1611_v46, %v1579_v39  ;;  %v8752_v52 = vrot.slane %v6293_v17, 2 }
 0x186   : > { %v1803_v36 = vmul.f32 %v8746_v41, %v5917_v62  ;;  %1784 = vbcast.lane.b32.xlu0 %v5982_v29, 266  ;;  %5405 = vmatpush1.bf16.msra.mxu1 %v5348_v5  ;;  %v1642_v41 = vadd.f32 %v1610_v55, %v1578_v27  ;;  %v543_v43 = vmul.f32 %v5860_v6, %v8750_v59  ;;  %v8754_v5 = vrot.slane %v6404_v53, 1  ;;  %v3107_v59 = vld [vmem:[%s8437_s4 + $0x50] sm:$0xff] }
 0x187   : > { %v6458_v30 = vpop.permute.xlu1 %1720  ;;  %5352 = vmatpush1.bf16.msra.mxu0 %v5351_v11  ;;  %5396 = vmatprep.subr.bf16.mxu1 %v8738_v60  ;;  %v6470_v27 = vsel %vm2107_vm0, %v8752_v52, %v8751_v31  ;;  %v8755_v39 = vrot.slane %v6293_v17, 1  ;;  %v8757_v55 = vrot.slane %v6404_v53, 3  ;;  %v8758_v28 = vrot.slane %v6293_v17, 3  ;;  %v3108_v31 = vld [vmem:[%s8437_s4 + $0x58] sm:$0xff] }
 0x188   : > { %8748 = vst [vmem:[#allocation30_spill] sm:$0xff] %v6458_v30  ;;  %v6460_v23 = vpop.permute.xlu0 %1716  ;;  %8753 = vst [vmem:[#allocation40_spill] sm:$0xff] %v6470_v27  ;;  %5353 = vmatprep.subr.bf16.mxu0 %v8738_v60  ;;  %v1835_v10 = vadd.f32 %v1803_v36, %v1643_v15  ;;  %v1834_v4 = vadd.f32 %v1802_v13, %v1642_v41  ;;  %v8760_v52 = vrot.slane %v6293_v17, 4  ;;  %v8762_v13 = vld [vmem:[#allocation31_spill] sm:$0xff] }
 0x189   : > { %8749 = vst [vmem:[#allocation33_spill] sm:$0xff] %v6460_v23  ;;  %v6477_v58 = vsel %vm1954_vm1, %v8755_v39, %v8754_v5  ;;  %v6484_v46 = vsel %vm2260_vm2, %v8758_v28, %v8757_v55  ;;  %1336 = vbcast.lane.b32.xlu1 %v5964_v24, 274  ;;  %v1386_v36 = vadd.f32 %v1354_v35, %v6389_v44  ;;  %v8763_v39 = vld [vmem:[#allocation32_spill] sm:$0xff]  ;;  %v8764_v17 = vld [vmem:[#allocation35_spill] sm:$0xff] }
 0x18a   : > { %8756 = vst [vmem:[#allocation41_spill] sm:$0xff] %v6477_v58  ;;  %8759 = vst [vmem:[#allocation34_spill] sm:$0xff] %v6484_v46  ;;  %948 = vbcast.lane.b32.xlu0 %v5964_v24, 281  ;;  %v6500_v5 = vsel %vm2413_vm3, %v8760_v52, %v8520_v37  ;;  %v964_v15 = vmul.f32 %v5889_v0, %v8762_v13  ;;  %v1484_v41 = vmul.f32 %v8762_v13, %v5873_v9  ;;  %v8770_v27 = vld [vmem:[#allocation43_spill] sm:$0xff] }
 0x18b   : > { %8761 = vst [vmem:[#allocation77_spill] sm:$0xff] %v6500_v5  ;;  %v974_v55 = vmul.f32 %v5889_v0, %v8763_v39  ;;  %5406 = vmatpush1.bf16.msra.mxu1 %v5351_v11  ;;  %v1494_v28 = vmul.f32 %v8763_v39, %v5873_v9  ;;  %v1387_v23 = vadd.f32 %v1355_v20, %v1191_v12  ;;  %v6513_v37 = vpop.permute.xlu1 %1312  ;;  %v8767_v11 = vld [vmem:[#allocation36_spill] sm:$0xff]  ;;  %v3109_v20 = vld [vmem:[%s8437_s4 + $0x60] sm:$0xff] }
 0x18c   : > { %v975_v52 = vmul.f32 %v5889_v0, %v8764_v17  ;;  %8765 = vst [vmem:[#allocation31_spill] sm:$0xff] %v6513_v37  ;;  %v6515_v35 = vpop.permute.xlu0 %928  ;;  %v5354_v44 = vpack.c.bf16 %v3108_v31, %v3107_v59  ;;  %5397 = vmatprep.subr.bf16.mxu1 %v8738_v60  ;;  %v581_v13 = vadd.f32 %v5884_v19, %v543_v43  ;;  %v3110_v59 = vld [vmem:[%s8437_s4 + $0x68] sm:$0xff]  ;;  %v8768_v31 = vld [vmem:[#allocation37_spill] sm:$0xff] }
 0x18d   : > { %8766 = vst [vmem:[#allocation32_spill] sm:$0xff] %v6515_v35  ;;  %v1495_v5 = vmul.f32 %v8764_v17, %v5873_v9  ;;  %v769_v30 = vmul.f32 %v5873_v9, %v8767_v11  ;;  %v1421_v12 = vmul.f32 %v8767_v11, %v5860_v6  ;;  %v551_v43 = vmul.f32 %v5860_v6, %v8768_v31  ;;  %v8769_v11 = vld [vmem:[#allocation38_spill] sm:$0xff]  ;;  %v8780_v31 = vld [vmem:[#allocation49_spill] sm:$0xff] }
 0x18e   : > { %v1867_v39 = vmax.f32 %v1387_v23, %v1835_v10  ;;  %v1866_v35 = vmax.f32 %v1386_v36, %v1834_v4  ;;  %1788 = vbcast.lane.b32.xlu1 %v5982_v29, 274  ;;  %1144 = vbcast.lane.b32.xlu0 %v5982_v29, 281  ;;  %v996_v17 = vadd.f32 %v964_v15, %v6410_v63 }
 0x18f   : > { %v1160_v37 = vmul.f32 %v5905_v18, %v8769_v11  ;;  %5355 = vmatpush1.bf16.msra.mxu0 %v5354_v44  ;;  %v5357_v53 = vpack.c.bf16 %v3110_v59, %v3109_v20  ;;  %5407 = vmatpush1.bf16.msra.mxu1 %v5354_v44  ;;  %v1516_v46 = vadd.f32 %v1484_v41, %v6413_v49  ;;  %v6543_v10 = vpop.permute.xlu1 %884 }
 0x190   : > { %v6539_v58 = vadd.f32 %v974_v55, %v810_v38  ;;  %v554_v23 = vmul.f32 %v5860_v6, %v8770_v27  ;;  %8771 = vst [vmem:[#allocation35_spill] sm:$0xff] %v6543_v10  ;;  %v6545_v4 = vpop.permute.xlu0 %1316  ;;  %5356 = vmatprep.subr.bf16.mxu0 %v8738_v60  ;;  %5398 = vmatprep.subr.bf16.mxu1 %v8738_v60  ;;  %v6556_v27 = vmax.f32 %v1867_v39, 0.0  ;;  %v6558_v41 = vmax.f32 %v1866_v35, 0.0 }
 0x191   : > { %8772 = vst [vmem:[#allocation36_spill] sm:$0xff] %v6545_v4  ;;  %v1526_v63 = vadd.f32 %v1494_v28, %v1462_v21  ;;  %v1007_v36 = vadd.f32 %v975_v52, %v6439_v26  ;;  %v1527_v15 = vadd.f32 %v1495_v5, %v1463_v33  ;;  %v6550_v44 = vadd.f32 %v769_v30, %v581_v13  ;;  %v8775_v26 = vld [vmem:[#allocation39_spill] sm:$0xff]  ;;  %v3111_v5 = vld [vmem:[%s8437_s4 + $0x70] sm:$0xff] }
 0x192   : > { %v6553_v49 = vadd.f32 %v5884_v19, %v1421_v12  ;;  %v589_v38 = vadd.f32 %v5884_v19, %v551_v43  ;;  %8773 = vst [vmem:[#allocation37_spill] sm:$0xff] %v6556_v27  ;;  %8774 = vst [vmem:[#allocation38_spill] sm:$0xff] %v6558_v41  ;;  %1792 = vbcast.lane.b32.xlu1 %v5982_v29, 282  ;;  %1340 = vbcast.lane.b32.xlu0 %v5964_v24, 282  ;;  %v3112_v24 = vld [vmem:[%s8437_s4 + $0x78] sm:$0xff]  ;;  %v8776_v29 = vld [vmem:[#allocation42_spill] sm:$0xff] }
 0x193   : > { %v6562_v55 = vadd.f32 %v1160_v37, %v996_v17  ;;  %v1548_v21 = vmul.f32 %v8769_v11, %v5889_v0  ;;  %v777_v33 = vmul.f32 %v5873_v9, %v8775_v26  ;;  %v1429_v30 = vmul.f32 %v8775_v26, %v5860_v6  ;;  %5358 = vmatpush1.bf16.msra.mxu0 %v5357_v53  ;;  %v6581_v35 = vpop.permute.xlu1 %507  ;;  %v8779_v12 = vld [vmem:[#allocation44_spill] sm:$0xff]  ;;  %v8781_v17 = vld [vmem:[#allocation45_spill] sm:$0xff] }
 0x194   : > { %v780_v37 = vmul.f32 %v5873_v9, %v8776_v29  ;;  %v1432_v28 = vmul.f32 %v8776_v29, %v5860_v6  ;;  %v592_v52 = vadd.f32 %v5884_v19, %v554_v23  ;;  %8777 = vst [vmem:[#allocation43_spill] sm:$0xff] %v6581_v35  ;;  %v6583_v13 = vpop.permute.xlu0 %1272  ;;  %5359 = vmatprep.subr.bf16.mxu0 %v8738_v60  ;;  %v2122_v1 = vrot.slane %v6558_v41, 2 }
 0x195   : > { %8778 = vst [vmem:[#allocation39_spill] sm:$0xff] %v6583_v13  ;;  %5408 = vmatpush1.bf16.msra.mxu1 %v5357_v53  ;;  %v1171_v20 = vmul.f32 %v5905_v18, %v8779_v12  ;;  %v1559_v59 = vmul.f32 %v8779_v12, %v5889_v0  ;;  %v1612_v43 = vmul.f32 %v8780_v31, %v5905_v18  ;;  %v1969_v53 = vrot.slane %v6558_v41, 1 }
 0x196   : > { %v5360_v39 = vpack.c.bf16 %v3112_v24, %v3111_v5  ;;  %5399 = vmatprep.subr.bf16.mxu1 %v8738_v60  ;;  %v1170_v11 = vmul.f32 %v5905_v18, %v8781_v17  ;;  %v1558_v23 = vmul.f32 %v8781_v17, %v5889_v0  ;;  %2164 = vrot.lane.b32.xlu1 %v6052_v34, %s5443_s22  ;;  %v3113_v5 = vld [vmem:[%s8437_s4 + $0x80] sm:$0xff]  ;;  %v3114_v24 = vld [vmem:[%s8437_s4 + $0x88] sm:$0xff] }
 0x197   : > { %2011 = vrot.lane.b32.xlu0 %v6068_v22, %s5444_s23  ;;  %v1580_v29 = vadd.f32 %v1548_v21, %v1516_v46  ;;  %v809_v12 = vadd.f32 %v777_v33, %v589_v38  ;;  %v8782_v34 = vld [vmem:[#allocation55_spill] sm:$0xff]  ;;  %v5363_v35 = vpack.c.bf16 %v3114_v24, %v3113_v5  ;;  %v1461_v22 = vadd.f32 %v5884_v19, %v1429_v30  ;;  %v6617_v13 = vpop.permute.xlu1 %1124  ;;  %v3116_v30 = vld [vmem:[%s8437_s4 + $0x98] sm:$0xff]  ;;  %v8791_v5 = vld [vmem:[#allocation48_spill] sm:$0xff] }
 0x198   : > { %v1804_v17 = vmul.f32 %v8782_v34, %v5917_v62  ;;  %5361 = vmatpush1.bf16.msra.mxu0 %v5360_v39  ;;  %v6613_v10 = vadd.f32 %v5884_v19, %v1432_v28  ;;  %v6615_v26 = vadd.f32 %v780_v37, %v592_v52  ;;  %v6619_v4 = vpop.permute.xlu0 %733  ;;  %v1203_v46 = vadd.f32 %v1171_v20, %v1007_v36  ;;  %v3115_v19 = vld [vmem:[%s8437_s4 + $0x90] sm:$0xff]  ;;  %v8785_v20 = vld [vmem:[#allocation50_spill] sm:$0xff]  ;;  %v8788_v24 = vld [vmem:[#allocation47_spill] sm:$0xff] }
 0x199   : > { %8783 = vst [vmem:[#allocation42_spill] sm:$0xff] %v6619_v4  ;;  %5362 = vmatprep.subr.bf16.mxu0 %v8738_v60  ;;  %5409 = vmatpush1.bf16.msra.mxu1 %v5360_v39  ;;  %v1591_v38 = vadd.f32 %v1559_v59, %v1527_v15  ;;  %v1356_v21 = vmul.f32 %v5917_v62, %v8780_v31  ;;  %v8784_v36 = vrot.slane %v6556_v27, 1  ;;  %v2123_v52 = vrot.slane %v6556_v27, 2 }
 0x19a   : > { %v1644_v33 = vadd.f32 %v1612_v43, %v1580_v29  ;;  %5400 = vmatprep.subr.bf16.mxu1 %v8738_v60  ;;  %v1202_v37 = vadd.f32 %v1170_v11, %v6539_v58  ;;  %v1590_v28 = vadd.f32 %v1558_v23, %v1526_v63  ;;  %2013 = vrot.lane.b32.xlu1 %v6151_v14, %s5444_s23  ;;  %v8786_v58 = vld [vmem:[#allocation51_spill] sm:$0xff]  ;;  %v8787_v43 = vld [vmem:[#allocation46_spill] sm:$0xff]  ;;  %v8792_v4 = vrot.slane %v6556_v27, 3 }
 0x19b   : > { %2317 = vrot.lane.b32.xlu0 %v6073_v48, %s5445_s12  ;;  %v6640_v15 = vsel %vm1954_vm1, %v1969_v53, %v8784_v36  ;;  %v1623_v59 = vmul.f32 %v8785_v20, %v5905_v18  ;;  %v1622_v63 = vmul.f32 %v8786_v58, %v5905_v18  ;;  %v5366_v14 = vpack.c.bf16 %v3116_v30, %v3115_v19  ;;  %v6651_v11 = vpop.permute.xlu1 %1768  ;;  %v8790_v19 = vld [vmem:[#allocation59_spill] sm:$0xff] }
 0x19c   : > { %v1836_v31 = vadd.f32 %v1804_v17, %v1644_v33  ;;  %5364 = vmatpush1.bf16.msra.mxu0 %v5363_v35  ;;  %v973_v39 = vmul.f32 %v5889_v0, %v8787_v43  ;;  %v1493_v48 = vmul.f32 %v8787_v43, %v5873_v9  ;;  %v6653_v23 = vpop.permute.xlu0 %1764  ;;  %v2275_v53 = vrot.slane %v6558_v41, 3  ;;  %v8789_v17 = vld [vmem:[#allocation58_spill] sm:$0xff] }
 0x19d   : > { %5365 = vmatprep.subr.bf16.mxu0 %v8738_v60  ;;  %5410 = vmatpush1.bf16.msra.mxu1 %v5363_v35  ;;  %v965_v29 = vmul.f32 %v5889_v0, %v8788_v24  ;;  %v1388_v34 = vadd.f32 %v1356_v21, %v6562_v55  ;;  %v1815_v33 = vmul.f32 %v8789_v17, %v5917_v62 }
 0x19e   : > { %v1814_v30 = vmul.f32 %v8790_v19, %v5917_v62  ;;  %5401 = vmatprep.subr.bf16.mxu1 %v8738_v60  ;;  %v1485_v36 = vmul.f32 %v8788_v24, %v5873_v9  ;;  %v1367_v43 = vmul.f32 %v5917_v62, %v8785_v20  ;;  %2319 = vrot.lane.b32.xlu1 %v6162_v40, %s5445_s12 }
 0x19f   : > { %2166 = vrot.lane.b32.xlu0 %v6167_v7, %s5443_s22  ;;  %v6677_v55 = vsel %vm2107_vm0, %v2122_v1, %v2123_v52  ;;  %v1655_v35 = vadd.f32 %v1623_v59, %v1591_v38  ;;  %v1366_v21 = vmul.f32 %v5917_v62, %v8786_v58  ;;  %v1654_v17 = vadd.f32 %v1622_v63, %v1590_v28  ;;  %v6683_v41 = vpop.permute.xlu1 %1724  ;;  %v8793_v63 = vld [vmem:[#allocation54_spill] sm:$0xff] }
 0x1a0   : > { %v1868_v24 = vmax.f32 %v1388_v34, %v1836_v31  ;;  %5367 = vmatpush1.bf16.msra.mxu0 %v5366_v14  ;;  %v1005_v19 = vadd.f32 %v973_v39, %v809_v12  ;;  %v1525_v20 = vadd.f32 %v1493_v48, %v1461_v22  ;;  %v976_v40 = vmul.f32 %v5889_v0, %v8791_v5  ;;  %v6685_v7 = vpop.permute.xlu0 %1080 }
 0x1a1   : > { %v6690_v1 = vsel %vm2260_vm2, %v2275_v53, %v8792_v4  ;;  %5411 = vmatpush1.bf16.msra.mxu1 %v5366_v14  ;;  %v997_v38 = vadd.f32 %v965_v29, %v6550_v44  ;;  %v1496_v28 = vmul.f32 %v8791_v5, %v5873_v9  ;;  %v1847_v12 = vadd.f32 %v1815_v33, %v1655_v35  ;;  %v8794_v44 = vld [vmem:[#allocation52_spill] sm:$0xff]  ;;  %v8798_v35 = vld [vmem:[#allocation57_spill] sm:$0xff] }
 0x1a2   : > { %v1846_v22 = vadd.f32 %v1814_v30, %v1654_v17  ;;  %5368 = vmatprep.subr.bf16.mxu1 %v8738_v60  ;;  %v1517_v59 = vadd.f32 %v1485_v36, %v6553_v49  ;;  %v1399_v58 = vadd.f32 %v1367_v43, %v1203_v46  ;;  %v555_v31 = vmul.f32 %v5860_v6, %v8793_v63  ;;  %v8796_v46 = vld [vmem:[#allocation53_spill] sm:$0xff]  ;;  %v8797_v5 = vld [vmem:[#allocation56_spill] sm:$0xff]  ;;  %v6726_v36 = vld [vmem:[%s8436_s3] ss:$0 sm:$0xff] }
 0x1a3   : > { %2168 = vrot.lane.b32.xlu1 %v6186_v50, %s5443_s22  ;;  %2015 = vrot.lane.b32.xlu0 %v6202_v61, %s5444_s23  ;;  %v1398_v4 = vadd.f32 %v1366_v21, %v1202_v37  ;;  %v1169_v14 = vmul.f32 %v5905_v18, %v8794_v44  ;;  %v1557_v39 = vmul.f32 %v8794_v44, %v5889_v0  ;;  %v6707_v48 = vmax.f32 %v1868_v24, 0.0  ;;  %v6716_v37 = vpop.permute.xlu1 %1320  ;;  %v8819_v60 = vld [vmem:[#allocation26_spill] sm:$0xff] }
 0x1a4   : > { %v1008_v49 = vadd.f32 %v976_v40, %v6615_v26  ;;  %v1161_v53 = vmul.f32 %v5905_v18, %v8796_v46  ;;  %v1549_v50 = vmul.f32 %v8796_v46, %v5889_v0  ;;  %v1172_v61 = vmul.f32 %v5905_v18, %v8797_v5  ;;  %v6718_v29 = vpop.permute.xlu0 %932 }
 0x1a5   : > { %8795 = vst [vmem:[#allocation44_spill] sm:$0xff] %v6707_v48  ;;  %v1528_v34 = vadd.f32 %v1496_v28, %v6613_v10  ;;  %v1560_v33 = vmul.f32 %v8797_v5, %v5889_v0  ;;  %v1879_v30 = vmax.f32 %v1399_v58, %v1847_v12  ;;  %v1878_v26 = vmax.f32 %v1398_v4, %v1846_v22 }
 0x1a6   : > { %v593_v43 = vadd.f32 %v6726_v36, %v555_v31  ;;  %v781_v21 = vmul.f32 %v5873_v9, %v8798_v35  ;;  %v1433_v17 = vmul.f32 %v8798_v35, %v5860_v6  ;;  %v6737_v10 = vadd.f32 %v1169_v14, %v1005_v19 }
 0x1a7   : > { %2019 = vrot.lane.b32.xlu1 %v6256_v32, %s5444_s23  ;;  %2321 = vrot.lane.b32.xlu0 %v6207_v56, %s5445_s12  ;;  %v6739_v24 = vadd.f32 %v1557_v39, %v1525_v20  ;;  %v545_v40 = vmul.f32 %v5860_v6, %v5935_v16  ;;  %v8536_v28 = vrot.slane %v6707_v48, 1  ;;  %v1193_v12 = vadd.f32 %v1161_v53, %v997_v38  ;;  %v6746_v63 = vpop.permute.xlu1 %461 }
 0x1a8   : > { %v1581_v22 = vadd.f32 %v1549_v50, %v1517_v59  ;;  %v6744_v58 = vadd.f32 %v1172_v61, %v1008_v49  ;;  %v6748_v31 = vpop.permute.xlu0 %457  ;;  %v8534_v32 = vrot.slane %v6707_v48, 2  ;;  %v1592_v56 = vadd.f32 %v1560_v33, %v1528_v34 }
 0x1a9   : > { %8799 = vst [vmem:[#allocation49_spill] sm:$0xff] %v6748_v31  ;;  %v6751_v19 = vmax.f32 %v1879_v30, 0.0  ;;  %v6753_v20 = vmax.f32 %v1878_v26, 0.0  ;;  %v1613_v16 = vmul.f32 %v5975_v8, %v5905_v18  ;;  %v813_v4 = vadd.f32 %v781_v21, %v593_v43 }
 0x1aa   : > { %v6758_v38 = vadd.f32 %v6726_v36, %v1433_v17  ;;  %v544_v59 = vmul.f32 %v5860_v6, %v5937_v54  ;;  %v8802_v44 = vrot.slane %v6124_v47, 1  ;;  %v8533_v14 = vrot.slane %v6707_v48, 3 }
 0x1ab   : > { %8800 = vst [vmem:[#allocation45_spill] sm:$0xff] %v6751_v19  ;;  %8801 = vst [vmem:[#allocation55_spill] sm:$0xff] %v6753_v20  ;;  %2172 = vrot.lane.b32.xlu0 %v6261_v42, %s5443_s22  ;;  %v583_v39 = vadd.f32 %v6726_v36, %v545_v40  ;;  %v771_v49 = vmul.f32 %v5873_v9, %v5955_v51  ;;  %v1805_v46 = vmul.f32 %v6043_v3, %v5917_v62  ;;  %v6786_v61 = vpop.permute.xlu1 %687 }
 0x1ac   : > { %2017 = vrot.lane.b32.xlu1 %v8802_v44, %s5444_s23  ;;  %v8803_v54 = vrot.slane %v6556_v27, 1  ;;  %v1423_v42 = vmul.f32 %v5955_v51, %v5860_v6  ;;  %v770_v50 = vmul.f32 %v5873_v9, %v5957_v2  ;;  %v1422_v5 = vmul.f32 %v5957_v2, %v5860_v6  ;;  %8804 = vst [vmem:[#allocation50_spill] sm:$0xff] %v6786_v61  ;;  %v6788_v34 = vpop.permute.xlu0 %683  ;;  %v8844_v61 = vld [vmem:[#allocation75_spill] sm:$0xff] }
 0x1ad   : > { %8805 = vst [vmem:[#allocation51_spill] sm:$0xff] %v6788_v34  ;;  %v6795_v3 = vsel %vm2107_vm0, %v2123_v52, %v8534_v32  ;;  %v1357_v51 = vmul.f32 %v5917_v62, %v5975_v8  ;;  %v1645_v33 = vadd.f32 %v1613_v16, %v1581_v22  ;;  %v1990_v30 = vrot.slane %v6753_v20, 1 }
 0x1ae   : > { %v6778_v53 = vsel %vm1954_vm1, %v8803_v54, %v8536_v28  ;;  %v8535_v26 = vrot.slane %v6751_v19, 1  ;;  %v582_v2 = vadd.f32 %v6726_v36, %v544_v59  ;;  %v8806_v43 = vrot.slane %v6124_v47, 2  ;;  %v8814_v28 = vld [vmem:[#allocation67_spill] sm:$0xff] }
 0x1af   : > { %2325 = vrot.lane.b32.xlu0 %v6266_v45, %s5445_s12  ;;  %v8807_v52 = vrot.slane %v6556_v27, 3  ;;  %v2143_v35 = vrot.slane %v6753_v20, 2  ;;  %v8537_v21 = vrot.slane %v6751_v19, 2  ;;  %v803_v17 = vadd.f32 %v771_v49, %v583_v39 }
 0x1b0   : > { %2170 = vrot.lane.b32.xlu1 %v8806_v43, %s5443_s22  ;;  %v1837_v40 = vadd.f32 %v1805_v46, %v1645_v33  ;;  %v2296_v22 = vrot.slane %v6753_v20, 3  ;;  %v8538_v16 = vrot.slane %v6751_v19, 3  ;;  %v1455_v59 = vadd.f32 %v6726_v36, %v1423_v42  ;;  %v6823_v43 = vpop.permute.xlu1 %1128  ;;  %v8809_v33 = vld [vmem:[#allocation61_spill] sm:$0xff] }
 0x1b1   : > { %v6812_v8 = vsel %vm2260_vm2, %v8807_v52, %v8533_v14  ;;  %v802_v45 = vadd.f32 %v770_v50, %v582_v2  ;;  %v1365_v44 = vmul.f32 %v5917_v62, %v5973_v57  ;;  %v1624_v54 = vmul.f32 %v5996_v25, %v5905_v18  ;;  %8808 = vst [vmem:[#allocation46_spill] sm:$0xff] %v6823_v43  ;;  %v6825_v52 = vpop.permute.xlu0 %1276  ;;  %v8810_v14 = vld [vmem:[#allocation9_spill] sm:$0xff] }
 0x1b2   : > { %v1454_v39 = vadd.f32 %v6726_v36, %v1422_v5  ;;  %v1621_v49 = vmul.f32 %v5973_v57, %v5905_v18  ;;  %v1389_v46 = vadd.f32 %v1357_v51, %v1193_v12  ;;  %v6833_v42 = vsel %vm1954_vm1, %v1990_v30, %v8535_v26  ;;  %v8812_v57 = vld [vmem:[#allocation22_spill] sm:$0xff] }
 0x1b3   : > { %v1368_v50 = vmul.f32 %v5917_v62, %v5996_v25  ;;  %v977_v2 = vmul.f32 %v5889_v0, %v8809_v33  ;;  %v1816_v32 = vmul.f32 %v8810_v14, %v5917_v62  ;;  %v8811_v5 = vrot.slane %v6124_v47, 3  ;;  %2021 = vrot.lane.b32.xlu0 %v8812_v57, %s5444_s23  ;;  %v8813_v57 = vld [vmem:[#allocation66_spill] sm:$0xff] }
 0x1b4   : > { %v1497_v12 = vmul.f32 %v8809_v33, %v5873_v9  ;;  %v1869_v51 = vmax.f32 %v1389_v46, %v1837_v40  ;;  %v6851_v25 = vsel %vm2107_vm0, %v2143_v35, %v8537_v21  ;;  %v6856_v14 = vsel %vm2260_vm2, %v2296_v22, %v8538_v16  ;;  %v6865_v46 = vpop.permute.xlu1 %888  ;;  %v8816_v21 = vld [vmem:[#allocation64_spill] sm:$0xff] }
 0x1b5   : > { %2323 = vrot.lane.b32.xlu1 %v8811_v5, %s5445_s12  ;;  %v6859_v30 = vadd.f32 %v1365_v44, %v6737_v10  ;;  %v1656_v5 = vadd.f32 %v1624_v54, %v1592_v56  ;;  %v1813_v26 = vmul.f32 %v8813_v57, %v5917_v62  ;;  %v557_v40 = vmul.f32 %v5860_v6, %v8814_v28  ;;  %v6867_v33 = vpop.permute.xlu0 %1772  ;;  %v8817_v44 = vld [vmem:[#allocation65_spill] sm:$0xff]  ;;  %v8818_v28 = vld [vmem:[#allocation23_spill] sm:$0xff] }
 0x1b6   : > { %8815 = vst [vmem:[#allocation47_spill] sm:$0xff] %v6865_v46  ;;  %v1653_v35 = vadd.f32 %v1621_v49, %v6739_v24  ;;  %v967_v22 = vmul.f32 %v5889_v0, %v8816_v21  ;;  %v1487_v10 = vmul.f32 %v8816_v21, %v5873_v9  ;;  %v966_v56 = vmul.f32 %v5889_v0, %v8817_v44  ;;  %v8821_v21 = vld [vmem:[#allocation68_spill] sm:$0xff] }
 0x1b7   : > { %v1400_v54 = vadd.f32 %v1368_v50, %v6744_v58  ;;  %v1009_v57 = vadd.f32 %v977_v2, %v813_v4  ;;  %v1848_v16 = vadd.f32 %v1816_v32, %v1656_v5  ;;  %2174 = vrot.lane.b32.xlu0 %v8819_v60, %s5443_s22  ;;  %v1529_v24 = vadd.f32 %v1497_v12, %v6758_v38  ;;  %v8822_v32 = vld [vmem:[#allocation2_spill] sm:$0xff] }
 0x1b8   : > { %v1486_v49 = vmul.f32 %v8817_v44, %v5873_v9  ;;  %v6884_v20 = vmax.f32 %v1869_v51, 0.0  ;;  %v556_v47 = vmul.f32 %v5860_v6, %v8821_v21  ;;  %v6888_v27 = vadd.f32 %v1813_v26, %v1653_v35  ;;  %v6895_v50 = vpop.permute.xlu1 %1728  ;;  %v8825_v5 = vld [vmem:[#allocation70_spill] sm:$0xff]  ;;  %v8826_v35 = vld [vmem:[#allocation5_spill] sm:$0xff]  ;;  %v8827_v21 = vld [vmem:[#allocation40_spill] sm:$0xff] }
 0x1b9   : > { %2327 = vrot.lane.b32.xlu1 %v8818_v28, %s5445_s12  ;;  %v595_v58 = vadd.f32 %v6726_v36, %v557_v40  ;;  %v783_v4 = vmul.f32 %v5873_v9, %v8822_v32  ;;  %v1435_v60 = vmul.f32 %v8822_v32, %v5860_v6  ;;  %8823 = vst [vmem:[#allocation59_spill] sm:$0xff] %v6895_v50  ;;  %v6897_v38 = vpop.permute.xlu0 %892  ;;  %v8828_v32 = vld [vmem:[#allocation41_spill] sm:$0xff]  ;;  %v8843_v43 = vrot.slane %v6707_v48, 3 }
 0x1ba   : > { %8820 = vst [vmem:[#allocation58_spill] sm:$0xff] %v6884_v20  ;;  %8824 = vst [vmem:[#allocation48_spill] sm:$0xff] %v6897_v38  ;;  %v999_v2 = vadd.f32 %v967_v22, %v803_v17  ;;  %v1519_v12 = vadd.f32 %v1487_v10, %v1455_v59  ;;  %v998_v51 = vadd.f32 %v966_v56, %v802_v45  ;;  %v8548_v59 = vrot.slane %v6884_v20, 1 }
 0x1bb   : > { %v782_v44 = vmul.f32 %v5873_v9, %v8825_v5  ;;  %v1434_v26 = vmul.f32 %v8825_v5, %v5860_v6  ;;  %v1880_v40 = vmax.f32 %v1400_v54, %v1848_v16  ;;  %v546_v28 = vmul.f32 %v5860_v6, %v8826_v35  ;;  %2023 = vrot.lane.b32.xlu0 %v8828_v32, %s5444_s23 }
 0x1bc   : > { %v1518_v38 = vadd.f32 %v1486_v49, %v1454_v39  ;;  %v594_v17 = vadd.f32 %v6726_v36, %v556_v47  ;;  %v8550_v45 = vrot.slane %v6884_v20, 2  ;;  %v1877_v22 = vmax.f32 %v6859_v30, %v6888_v27  ;;  %v6915_v56 = vpop.permute.xlu1 %518  ;;  %v8831_v39 = vld [vmem:[#allocation3_spill] sm:$0xff] }
 0x1bd   : > { %2176 = vrot.lane.b32.xlu1 %v8827_v21, %s5443_s22  ;;  %v815_v16 = vadd.f32 %v783_v4, %v595_v58  ;;  %v1467_v10 = vadd.f32 %v6726_v36, %v1435_v60  ;;  %8829 = vst [vmem:[#allocation54_spill] sm:$0xff] %v6915_v56  ;;  %v6917_v54 = vpop.permute.xlu0 %514  ;;  %v1173_v47 = vmul.f32 %v5905_v18, %v8831_v39  ;;  %v8832_v21 = vld [vmem:[#allocation4_spill] sm:$0xff]  ;;  %v6927_v30 = vmax.f32 %v1880_v40, 0.0  ;;  %v8834_v60 = vld [vmem:[#allocation34_spill] sm:$0xff] }
 0x1be   : > { %8830 = vst [vmem:[#allocation52_spill] sm:$0xff] %v6917_v54  ;;  %v814_v35 = vadd.f32 %v782_v44, %v594_v17  ;;  %v1561_v49 = vmul.f32 %v8831_v39, %v5889_v0  ;;  %v1424_v32 = vmul.f32 %v8832_v21, %v5860_v6  ;;  %v1466_v27 = vadd.f32 %v6726_v36, %v1434_v26  ;;  %v8835_v44 = vld [vmem:[#allocation10_spill] sm:$0xff]  ;;  %v8836_v39 = vld [vmem:[#allocation13_spill] sm:$0xff] }
 0x1bf   : > { %8833 = vst [vmem:[#allocation53_spill] sm:$0xff] %v6927_v30  ;;  %v772_v58 = vmul.f32 %v5873_v9, %v8832_v21  ;;  %v584_v4 = vadd.f32 %v6726_v36, %v546_v28  ;;  %2329 = vrot.lane.b32.xlu0 %v8834_v60, %s5445_s12  ;;  %v1163_v17 = vmul.f32 %v5905_v18, %v8835_v44  ;;  %v8837_v26 = vrot.slane %v6707_v48, 1  ;;  %v8839_v60 = vld [vmem:[#allocation72_spill] sm:$0xff] }
 0x1c0   : > { %v1625_v5 = vmul.f32 %v8836_v39, %v5905_v18  ;;  %v1551_v21 = vmul.f32 %v8835_v44, %v5889_v0  ;;  %v1162_v54 = vmul.f32 %v5905_v18, %v8839_v60  ;;  %v1550_v56 = vmul.f32 %v8839_v60, %v5889_v0  ;;  %v6960_v46 = vpop.permute.xlu1 %744  ;;  %v8845_v60 = vld [vmem:[#allocation76_spill] sm:$0xff] }
 0x1c1   : > { %2027 = vrot.lane.b32.xlu1 %v6640_v15, %s5444_s23  ;;  %v6945_v40 = vsel %vm1954_vm1, %v8837_v26, %v8548_v59  ;;  %v8838_v15 = vrot.slane %v6707_v48, 2  ;;  %8840 = vst [vmem:[#allocation56_spill] sm:$0xff] %v6960_v46  ;;  %v6962_v26 = vpop.permute.xlu0 %740  ;;  %v8842_v59 = vrot.slane %v6884_v20, 3  ;;  %v1593_v34 = vadd.f32 %v1561_v49, %v1529_v24 }
 0x1c2   : > { %8841 = vst [vmem:[#allocation57_spill] sm:$0xff] %v6962_v26  ;;  %v1456_v44 = vadd.f32 %v6726_v36, %v1424_v32  ;;  %v1817_v50 = vmul.f32 %v8844_v61, %v5917_v62  ;;  %v804_v31 = vadd.f32 %v772_v58, %v584_v4  ;;  %v8846_v46 = vrot.slane %v8845_v60, 1 }
 0x1c3   : > { %v6952_v28 = vsel %vm2107_vm0, %v8838_v15, %v8550_v45  ;;  %v6969_v15 = vsel %vm2260_vm2, %v8843_v43, %v8842_v59  ;;  %v1205_v45 = vadd.f32 %v1173_v47, %v1009_v57  ;;  %2180 = vrot.lane.b32.xlu0 %v6677_v55, %s5443_s22  ;;  %v1195_v24 = vadd.f32 %v1163_v17, %v999_v2  ;;  %v8847_v59 = vld [vmem:[#allocation16_spill] sm:$0xff]  ;;  %v8850_v43 = vld [vmem:[#allocation7_spill] sm:$0xff] }
 0x1c4   : > { %v979_v47 = vmul.f32 %v5889_v0, %v8847_v59  ;;  %v1369_v61 = vmul.f32 %v5917_v62, %v8836_v39  ;;  %v1657_v49 = vadd.f32 %v1625_v5, %v1593_v34  ;;  %v1583_v32 = vadd.f32 %v1551_v21, %v1519_v12  ;;  %v6988_v4 = vpop.permute.xlu1 %465  ;;  %v8851_v57 = vld [vmem:[#allocation11_spill] sm:$0xff] }
 0x1c5   : > { %2025 = vrot.lane.b32.xlu1 %v8846_v46, %s5444_s23  ;;  %v1194_v58 = vadd.f32 %v1162_v54, %v998_v51  ;;  %v1582_v46 = vadd.f32 %v1550_v56, %v1518_v38  ;;  %v1499_v55 = vmul.f32 %v8847_v59, %v5873_v9  ;;  %8848 = vst [vmem:[#allocation61_spill] sm:$0xff] %v6988_v4  ;;  %v6990_v48 = vpop.permute.xlu0 %1324  ;;  %v6998_v12 = vmax.f32 %v1877_v22, 0.0  ;;  %v8858_v59 = vld [vmem:[#allocation24_spill] sm:$0xff] }
 0x1c6   : > { %8849 = vst [vmem:[#allocation9_spill] sm:$0xff] %v6990_v48  ;;  %v978_v2 = vmul.f32 %v5889_v0, %v8850_v43  ;;  %v1498_v17 = vmul.f32 %v8850_v43, %v5873_v9  ;;  %v968_v39 = vmul.f32 %v5889_v0, %v8851_v57  ;;  %v1849_v34 = vadd.f32 %v1817_v50, %v1657_v49 }
 0x1c7   : > { %8852 = vst [vmem:[#allocation22_spill] sm:$0xff] %v6998_v12  ;;  %v1488_v38 = vmul.f32 %v8851_v57, %v5873_v9  ;;  %v8853_v51 = vrot.slane %v8845_v60, 2  ;;  %2333 = vrot.lane.b32.xlu0 %v6690_v1, %s5445_s12  ;;  %v8854_v56 = vrot.slane %v6927_v30, 1  ;;  %v8855_v54 = vrot.slane %v6751_v19, 1 }
 0x1c8   : > { %v8856_v50 = vrot.slane %v6927_v30, 2  ;;  %v8857_v22 = vrot.slane %v6751_v19, 2  ;;  %v1011_v43 = vadd.f32 %v979_v47, %v815_v16  ;;  %v1401_v57 = vadd.f32 %v1369_v61, %v1205_v45  ;;  %v8862_v16 = vld [vmem:[#allocation17_spill] sm:$0xff]  ;;  %v7036_v47 = vpop.permute.xlu1 %1084 }
 0x1c9   : > { %2178 = vrot.lane.b32.xlu1 %v8853_v51, %s5443_s22  ;;  %v7012_v5 = vsel %vm1954_vm1, %v8855_v54, %v8854_v56  ;;  %v558_v49 = vmul.f32 %v5860_v6, %v8858_v59  ;;  %v8859_v1 = vrot.slane %v6927_v30, 3  ;;  %v8860_v51 = vrot.slane %v6751_v19, 3  ;;  %v8861_v54 = vld [vmem:[#allocation14_spill] sm:$0xff]  ;;  %v7038_v61 = vpop.permute.xlu0 %691 }
 0x1ca   : > { %v7019_v21 = vsel %vm2107_vm0, %v8857_v22, %v8856_v50  ;;  %v1531_v56 = vadd.f32 %v1499_v55, %v1467_v10  ;;  %v1359_v4 = vmul.f32 %v5917_v62, %v8861_v54  ;;  %v1615_v50 = vmul.f32 %v8861_v54, %v5905_v18  ;;  %8863 = vst [vmem:[#allocation66_spill] sm:$0xff] %v7038_v61  ;;  %v8864_v10 = vld [vmem:[#allocation30_spill] sm:$0xff]  ;;  %v8870_v61 = vld [vmem:[#allocation20_spill] sm:$0xff] }
 0x1cb   : > { %v7028_v26 = vsel %vm2260_vm2, %v8860_v51, %v8859_v1  ;;  %v1614_v45 = vmul.f32 %v8862_v16, %v5905_v18  ;;  %v1010_v22 = vadd.f32 %v978_v2, %v814_v35  ;;  %v1530_v59 = vadd.f32 %v1498_v17, %v1466_v27  ;;  %v8865_v51 = vld [vmem:[#allocation33_spill] sm:$0xff]  ;;  %2029 = vrot.lane.b32.xlu0 %v6778_v53, %s5444_s23  ;;  %v8867_v35 = vld [vmem:[#allocation18_spill] sm:$0xff] }
 0x1cc   : > { %v1000_v19 = vadd.f32 %v968_v39, %v804_v31  ;;  %v1881_v48 = vmax.f32 %v1401_v57, %v1849_v34  ;;  %v1520_v1 = vadd.f32 %v1488_v38, %v1456_v44  ;;  %v1807_v55 = vmul.f32 %v8864_v10, %v5917_v62  ;;  %v8868_v38 = vld [vmem:[#allocation27_spill] sm:$0xff]  ;;  %v7059_v53 = vpop.permute.xlu1 %936 }
 0x1cd   : > { %v1806_v20 = vmul.f32 %v8865_v51, %v5917_v62  ;;  %v8866_v54 = vrot.slane %v8845_v60, 3  ;;  %v1358_v31 = vmul.f32 %v5917_v62, %v8862_v16  ;;  %v784_v27 = vmul.f32 %v5873_v9, %v8867_v35  ;;  %v7061_v10 = vpop.permute.xlu0 %1088  ;;  %v8869_v51 = vld [vmem:[#allocation19_spill] sm:$0xff] }
 0x1ce   : > { %v1436_v44 = vmul.f32 %v8867_v35, %v5860_v6  ;;  %v596_v2 = vadd.f32 %v6726_v36, %v558_v49  ;;  %v1391_v17 = vadd.f32 %v1359_v4, %v1195_v24  ;;  %v1647_v39 = vadd.f32 %v1615_v50, %v1583_v32  ;;  %v8874_v60 = vld [vmem:[#allocation31_spill] sm:$0xff] }
 0x1cf   : > { %2331 = vrot.lane.b32.xlu1 %v8866_v54, %s5445_s12  ;;  %v1646_v34 = vadd.f32 %v1614_v45, %v1582_v46  ;;  %v547_v57 = vmul.f32 %v5860_v6, %v8868_v38  ;;  %v1175_v16 = vmul.f32 %v5905_v18, %v8869_v51  ;;  %v1563_v54 = vmul.f32 %v8869_v51, %v5889_v0 }
 0x1d0   : > { %v1174_v35 = vmul.f32 %v5905_v18, %v8870_v61  ;;  %v7069_v49 = vmax.f32 %v1881_v48, 0.0  ;;  %v1562_v24 = vmul.f32 %v8870_v61, %v5889_v0  ;;  %v1839_v32 = vadd.f32 %v1807_v55, %v1647_v39  ;;  %2051 = vrot.lane.b32.xlu0 %v6833_v42, %s5444_s23  ;;  %v8871_v48 = vld [vmem:[#allocation28_spill] sm:$0xff]  ;;  %v8872_v55 = vld [vmem:[#allocation29_spill] sm:$0xff]  ;;  %v7090_v39 = vpop.permute.xlu1 %1776 }
 0x1d1   : > { %v1838_v46 = vadd.f32 %v1806_v20, %v1646_v34  ;;  %v1390_v50 = vadd.f32 %v1358_v31, %v1194_v58  ;;  %v7079_v45 = vadd.f32 %v6726_v36, %v1436_v44  ;;  %v816_v38 = vadd.f32 %v784_v27, %v596_v2  ;;  %v7092_v58 = vpop.permute.xlu0 %940 }
 0x1d2   : > { %v1164_v51 = vmul.f32 %v5905_v18, %v8871_v48  ;;  %v585_v61 = vadd.f32 %v6726_v36, %v547_v57  ;;  %v1552_v20 = vmul.f32 %v8871_v48, %v5889_v0  ;;  %v1425_v42 = vmul.f32 %v8872_v55, %v5860_v6  ;;  %8873 = vst [vmem:[#allocation67_spill] sm:$0xff] %v7092_v58 }
 0x1d3   : > { %2182 = vrot.lane.b32.xlu1 %v6795_v3, %s5443_s22  ;;  %v773_v3 = vmul.f32 %v5873_v9, %v8872_v55  ;;  %v1207_v31 = vadd.f32 %v1175_v16, %v1011_v43  ;;  %v1595_v27 = vadd.f32 %v1563_v54, %v1531_v56  ;;  %v1206_v44 = vadd.f32 %v1174_v35, %v1010_v22  ;;  %v8875_v43 = vld [vmem:[#allocation36_spill] sm:$0xff] }
 0x1d4   : > { %v8565_v2 = vrot.slane %v7069_v49, 1  ;;  %v1594_v34 = vadd.f32 %v1562_v24, %v1530_v59  ;;  %v1871_v57 = vmax.f32 %v1391_v17, %v1839_v32  ;;  %v1870_v4 = vmax.f32 %v1390_v50, %v1838_v46  ;;  %2204 = vrot.lane.b32.xlu0 %v6851_v25, %s5443_s22  ;;  %v7108_v54 = vpop.permute.xlu1 %1280 }
 0x1d5   : > { %v8567_v48 = vrot.slane %v7069_v49, 2  ;;  %v1196_v55 = vadd.f32 %v1164_v51, %v1000_v19  ;;  %v1626_v58 = vmul.f32 %v8874_v60, %v5905_v18  ;;  %v1627_v56 = vmul.f32 %v8875_v43, %v5905_v18  ;;  %v7110_v25 = vpop.permute.xlu0 %896  ;;  %v8876_v19 = vld [vmem:[#allocation32_spill] sm:$0xff]  ;;  %v8880_v51 = vld [vmem:[#allocation39_spill] sm:$0xff] }
 0x1d6   : > { %v8566_v22 = vrot.slane %v7069_v49, 3  ;;  %v1584_v59 = vadd.f32 %v1552_v20, %v1520_v1  ;;  %v805_v17 = vadd.f32 %v773_v3, %v585_v61  ;;  %v1457_v16 = vadd.f32 %v6726_v36, %v1425_v42 }
 0x1d7   : > { %2335 = vrot.lane.b32.xlu1 %v6812_v8, %s5445_s12  ;;  %v1370_v8 = vmul.f32 %v5917_v62, %v8874_v60  ;;  %v980_v35 = vmul.f32 %v5889_v0, %v8876_v19  ;;  %v1819_v24 = vmul.f32 %v6651_v11, %v5917_v62  ;;  %v1818_v32 = vmul.f32 %v6653_v23, %v5917_v62 }
 0x1d8   : > { %v8877_v1 = vrot.slane %v6927_v30, 1  ;;  %v7125_v60 = vmax.f32 %v1871_v57, 0.0  ;;  %v7127_v50 = vmax.f32 %v1870_v4, 0.0  ;;  %v1616_v61 = vmul.f32 %v8880_v51, %v5905_v18 }
 0x1d9   : > { %v8881_v11 = vrot.slane %v6998_v12, 1  ;;  %v8882_v23 = vrot.slane %v6927_v30, 2  ;;  %v1658_v3 = vadd.f32 %v1626_v58, %v1594_v34  ;;  %v1371_v4 = vmul.f32 %v5917_v62, %v8875_v43  ;;  %v7158_v34 = vpop.permute.xlu1 %522 }
 0x1da   : > { %v7123_v46 = vsel %vm1954_vm1, %v8877_v1, %v8565_v2  ;;  %8878 = vst [vmem:[#allocation64_spill] sm:$0xff] %v7125_v60  ;;  %8879 = vst [vmem:[#allocation65_spill] sm:$0xff] %v7127_v50  ;;  %v1659_v42 = vadd.f32 %v1627_v56, %v1595_v27  ;;  %v1402_v1 = vadd.f32 %v1370_v8, %v1206_v44  ;;  %v8884_v2 = vld [vmem:[#allocation35_spill] sm:$0xff]  ;;  %v7160_v27 = vpop.permute.xlu0 %1284 }
 0x1db   : > { %2357 = vrot.lane.b32.xlu1 %v6856_v14, %s5445_s12  ;;  %2049 = vrot.lane.b32.xlu0 %v8881_v11, %s5444_s23  ;;  %v7141_v20 = vsel %vm2107_vm0, %v8882_v23, %v8567_v48  ;;  %v8883_v14 = vrot.slane %v6927_v30, 3  ;;  %v1500_v11 = vmul.f32 %v8876_v19, %v5873_v9  ;;  %v969_v23 = vmul.f32 %v5889_v0, %v8884_v2  ;;  %v8886_v48 = vld [vmem:[#allocation43_spill] sm:$0xff] }
 0x1dc   : > { %v1808_v58 = vmul.f32 %v6683_v41, %v5917_v62  ;;  %v1012_v43 = vadd.f32 %v980_v35, %v816_v38  ;;  %v1489_v56 = vmul.f32 %v8884_v2, %v5873_v9  ;;  %v1360_v44 = vmul.f32 %v5917_v62, %v8880_v51 }
 0x1dd   : > { %v7150_v57 = vsel %vm2260_vm2, %v8883_v14, %v8566_v22  ;;  %v1851_v14 = vadd.f32 %v1819_v24, %v1659_v42  ;;  %v1850_v22 = vadd.f32 %v1818_v32, %v1658_v3  ;;  %v1648_v8 = vadd.f32 %v1616_v61, %v1584_v59  ;;  %v7178_v3 = vpop.permute.xlu1 %1132 }
 0x1de   : > { %v8885_v19 = vrot.slane %v6998_v12, 2  ;;  %v1976_v41 = vrot.slane %v7127_v50, 1  ;;  %v1403_v35 = vadd.f32 %v1371_v4, %v1207_v31  ;;  %v559_v2 = vmul.f32 %v5860_v6, %v8886_v48  ;;  %v7180_v42 = vpop.permute.xlu0 %748 }
 0x1df   : > { %2031 = vrot.lane.b32.xlu0 %v6945_v40, %s5444_s23  ;;  %v2129_v24 = vrot.slane %v7127_v50, 2  ;;  %v2130_v32 = vrot.slane %v7125_v60, 2  ;;  %v1532_v59 = vadd.f32 %v1500_v11, %v7079_v45  ;;  %v1001_v51 = vadd.f32 %v969_v23, %v805_v17  ;;  %v8887_v23 = vld [vmem:[#allocation42_spill] sm:$0xff] }
 0x1e0   : > { %2202 = vrot.lane.b32.xlu1 %v8885_v19, %s5443_s22  ;;  %v1840_v61 = vadd.f32 %v1808_v58, %v1648_v8  ;;  %v2282_v40 = vrot.slane %v7127_v50, 3  ;;  %v1176_v31 = vmul.f32 %v5905_v18, %v6617_v13  ;;  %v1883_v4 = vmax.f32 %v1403_v35, %v1851_v14 }
 0x1e1   : > { %v1882_v19 = vmax.f32 %v1402_v1, %v1850_v22  ;;  %v8573_v48 = vrot.slane %v7125_v60, 3  ;;  %v1521_v38 = vadd.f32 %v1489_v56, %v1457_v16  ;;  %v1392_v30 = vadd.f32 %v1360_v44, %v1196_v55  ;;  %v7212_v56 = vpop.permute.xlu1 %1092 }
 0x1e2   : > { %v1564_v45 = vmul.f32 %v6617_v13, %v5889_v0  ;;  %v8570_v17 = vrot.slane %v6998_v12, 3  ;;  %v597_v11 = vadd.f32 %v6726_v36, %v559_v2  ;;  %v785_v22 = vmul.f32 %v5873_v9, %v8887_v23  ;;  %v7214_v14 = vpop.permute.xlu0 %1136  ;;  %v8908_v12 = vld [vmem:[#allocation52_spill] sm:$0xff] }
 0x1e3   : > { %2053 = vrot.lane.b32.xlu0 %v7012_v5, %s5444_s23  ;;  %v8888_v1 = vrot.slane %v7125_v60, 1  ;;  %v7204_v13 = vsel %vm2107_vm0, %v2129_v24, %v2130_v32  ;;  %v1872_v5 = vmax.f32 %v1392_v30, %v1840_v61  ;;  %v1165_v16 = vmul.f32 %v5905_v18, %v6685_v7 }
 0x1e4   : > { %2184 = vrot.lane.b32.xlu1 %v6952_v28, %s5443_s22  ;;  %v1437_v28 = vmul.f32 %v8887_v23, %v5860_v6  ;;  %v1628_v58 = vmul.f32 %v6716_v37, %v5905_v18  ;;  %v1208_v44 = vadd.f32 %v1176_v31, %v1012_v43  ;;  %v7216_v8 = vmax.f32 %v1883_v4, 0.0 }
 0x1e5   : > { %v7199_v55 = vsel %vm1954_vm1, %v1976_v41, %v8888_v1  ;;  %v7218_v41 = vmax.f32 %v1882_v19, 0.0  ;;  %v7223_v35 = vsel %vm2260_vm2, %v2282_v40, %v8573_v48  ;;  %v1596_v30 = vadd.f32 %v1564_v45, %v1532_v59  ;;  %v7243_v4 = vpop.permute.xlu1 %1736 }
 0x1e6   : > { %8889 = vst [vmem:[#allocation23_spill] sm:$0xff] %v7216_v8  ;;  %v1553_v2 = vmul.f32 %v6685_v7, %v5889_v0  ;;  %v1820_v24 = vmul.f32 %v6867_v33, %v5917_v62  ;;  %v817_v43 = vadd.f32 %v785_v22, %v597_v11  ;;  %v1372_v61 = vmul.f32 %v5917_v62, %v6716_v37  ;;  %v7245_v19 = vpop.permute.xlu0 %1732 }
 0x1e7   : > { %8890 = vst [vmem:[#allocation26_spill] sm:$0xff] %v7218_v41  ;;  %2355 = vrot.lane.b32.xlu0 %v8570_v17, %s5445_s12  ;;  %v981_v59 = vmul.f32 %v5889_v0, %v6718_v29  ;;  %v1501_v7 = vmul.f32 %v6718_v29, %v5873_v9  ;;  %v1469_v40 = vadd.f32 %v6726_v36, %v1437_v28  ;;  %v7241_v33 = vmax.f32 %v1872_v5, 0.0 }
 0x1e8   : > { %2206 = vrot.lane.b32.xlu1 %v7019_v21, %s5443_s22  ;;  %v1197_v31 = vadd.f32 %v1165_v16, %v1001_v51  ;;  %v1660_v21 = vadd.f32 %v1628_v58, %v1596_v30  ;;  %v1997_v45 = vrot.slane %v7218_v41, 1  ;;  %v8572_v37 = vrot.slane %v7216_v8, 1  ;;  %v8892_v58 = vld [vmem:[#allocation49_spill] sm:$0xff] }
 0x1e9   : > { %8891 = vst [vmem:[#allocation68_spill] sm:$0xff] %v7241_v33  ;;  %v2150_v11 = vrot.slane %v7218_v41, 2  ;;  %v8571_v23 = vrot.slane %v7216_v8, 2  ;;  %v1585_v22 = vadd.f32 %v1553_v2, %v1521_v38  ;;  %v1617_v29 = vmul.f32 %v6825_v52, %v5905_v18  ;;  %v8893_v38 = vld [vmem:[#allocation59_spill] sm:$0xff]  ;;  %v7263_v17 = vpop.permute.xlu1 %1328 }
 0x1ea   : > { %v1852_v1 = vadd.f32 %v1820_v24, %v1660_v21  ;;  %v1404_v51 = vadd.f32 %v1372_v61, %v1208_v44  ;;  %v1013_v28 = vadd.f32 %v981_v59, %v817_v43  ;;  %v1533_v5 = vadd.f32 %v1501_v7, %v1469_v40  ;;  %v7265_v24 = vpop.permute.xlu0 %944  ;;  %v8894_v21 = vld [vmem:[#allocation58_spill] sm:$0xff] }
 0x1eb   : > { %2337 = vrot.lane.b32.xlu0 %v6969_v15, %s5445_s12  ;;  %v549_v16 = vmul.f32 %v5860_v6, %v6746_v63  ;;  %v548_v30 = vmul.f32 %v5860_v6, %v8892_v58  ;;  %v1809_v2 = vmul.f32 %v8893_v38, %v5917_v62  ;;  %v8575_v15 = vrot.slane %v7241_v33, 2 }
 0x1ec   : > { %2359 = vrot.lane.b32.xlu1 %v7028_v26, %s5445_s12  ;;  %v8574_v26 = vrot.slane %v7241_v33, 1  ;;  %v7272_v44 = vsel %vm1954_vm1, %v1997_v45, %v8572_v37  ;;  %v7277_v63 = vsel %vm2107_vm0, %v2150_v11, %v8571_v23  ;;  %v2303_v43 = vrot.slane %v7218_v41, 3  ;;  %v8896_v11 = vld [vmem:[#allocation50_spill] sm:$0xff]  ;;  %v8897_v23 = vld [vmem:[#allocation51_spill] sm:$0xff] }
 0x1ed   : > { %v8578_v61 = vrot.slane %v7216_v8, 3  ;;  %v1361_v59 = vmul.f32 %v5917_v62, %v6825_v52  ;;  %v1649_v7 = vadd.f32 %v1617_v29, %v1585_v22  ;;  %v1884_v40 = vmax.f32 %v1404_v51, %v1852_v1  ;;  %v7295_v29 = vpop.permute.xlu1 %1288 }
 0x1ee   : > { %v8895_v58 = vrot.slane %v8894_v21, 1  ;;  %v587_v45 = vadd.f32 %v6726_v36, %v549_v16  ;;  %v775_v38 = vmul.f32 %v5873_v9, %v8896_v11  ;;  %v774_v37 = vmul.f32 %v5873_v9, %v8897_v23  ;;  %v7297_v1 = vpop.permute.xlu0 %1332 }
 0x1ef   : > { %2055 = vrot.lane.b32.xlu0 %v7123_v46, %s5444_s23  ;;  %v586_v52 = vadd.f32 %v6726_v36, %v548_v30  ;;  %v1841_v22 = vadd.f32 %v1809_v2, %v1649_v7  ;;  %v8898_v46 = vrot.slane %v7125_v60, 1  ;;  %v7311_v16 = vsel %vm2107_vm0, %v2130_v32, %v8575_v15  ;;  %v8899_v7 = vld [vmem:[#allocation46_spill] sm:$0xff]  ;;  %v8900_v32 = vld [vmem:[#allocation47_spill] sm:$0xff] }
 0x1f0   : > { %2033 = vrot.lane.b32.xlu1 %v8895_v58, %s5444_s23  ;;  %v1427_v30 = vmul.f32 %v8896_v11, %v5860_v6  ;;  %v1426_v2 = vmul.f32 %v8897_v23, %v5860_v6  ;;  %v1177_v58 = vmul.f32 %v5905_v18, %v8899_v7  ;;  %v1393_v48 = vadd.f32 %v1361_v59, %v1197_v31 }
 0x1f1   : > { %v7304_v51 = vsel %vm1954_vm1, %v8898_v46, %v8574_v26  ;;  %v7322_v46 = vsel %vm2260_vm2, %v2303_v43, %v8578_v61  ;;  %v1565_v26 = vmul.f32 %v8899_v7, %v5889_v0  ;;  %v970_v15 = vmul.f32 %v5889_v0, %v8900_v32  ;;  %v8903_v7 = vld [vmem:[#allocation48_spill] sm:$0xff] }
 0x1f2   : > { %v7328_v41 = vmax.f32 %v1884_v40, 0.0  ;;  %v807_v23 = vadd.f32 %v775_v38, %v587_v45  ;;  %v806_v11 = vadd.f32 %v774_v37, %v586_v52  ;;  %v1490_v43 = vmul.f32 %v8900_v32, %v5873_v9  ;;  %v7349_v45 = vpop.permute.xlu1 %752  ;;  %v7351_v38 = vpop.permute.xlu0 %526 }
 0x1f3   : > { %2035 = vrot.lane.b32.xlu0 %v7199_v55, %s5444_s23  ;;  %v8901_v61 = vrot.slane %v7241_v33, 3  ;;  %v8902_v31 = vrot.slane %v7125_v60, 3  ;;  %v1873_v40 = vmax.f32 %v1393_v48, %v1841_v22  ;;  %v971_v50 = vmul.f32 %v5889_v0, %v8903_v7  ;;  %v8904_v55 = vld [vmem:[#allocation54_spill] sm:$0xff]  ;;  %8905 = vst [vmem:[#allocation2_spill] sm:$0xff] %v7349_v45  ;;  %8906 = vst [vmem:[#allocation70_spill] sm:$0xff] %v7351_v38  ;;  %v8907_v48 = vld [vmem:[#allocation9_spill] sm:$0xff] }
 0x1f4   : > { %2208 = vrot.lane.b32.xlu1 %v7141_v20, %s5443_s22  ;;  %v1491_v20 = vmul.f32 %v8903_v7, %v5873_v9  ;;  %v561_v37 = vmul.f32 %v5860_v6, %v8904_v55  ;;  %v1459_v52 = vadd.f32 %v6726_v36, %v1427_v30  ;;  %v1458_v32 = vadd.f32 %v6726_v36, %v1426_v2  ;;  %v8920_v45 = vld [vmem:[#allocation66_spill] sm:$0xff] }
 0x1f5   : > { %v7341_v59 = vsel %vm2260_vm2, %v8902_v31, %v8901_v61  ;;  %v1209_v61 = vadd.f32 %v1177_v58, %v1013_v28  ;;  %v1629_v22 = vmul.f32 %v8907_v48, %v5905_v18  ;;  %v1597_v31 = vadd.f32 %v1565_v26, %v1533_v5 }
 0x1f6   : > { %v1002_v60 = vadd.f32 %v970_v15, %v806_v11  ;;  %v560_v7 = vmul.f32 %v5860_v6, %v8908_v12  ;;  %v8909_v55 = vrot.slane %v8894_v21, 2  ;;  %v8585_v30 = vrot.slane %v7328_v41, 1  ;;  %v7372_v58 = vpop.permute.xlu1 %1780  ;;  %v7374_v11 = vpop.permute.xlu0 %1140 }
 0x1f7   : > { %v1522_v38 = vadd.f32 %v1490_v43, %v1458_v32  ;;  %v1821_v28 = vmul.f32 %v7090_v39, %v5917_v62  ;;  %v8587_v2 = vrot.slane %v7328_v41, 2  ;;  %v7369_v26 = vmax.f32 %v1873_v40, 0.0  ;;  %8910 = vst [vmem:[#allocation5_spill] sm:$0xff] %v7372_v58  ;;  %8911 = vst [vmem:[#allocation40_spill] sm:$0xff] %v7374_v11 }
 0x1f8   : > { %2188 = vrot.lane.b32.xlu1 %v7204_v13, %s5443_s22  ;;  %2186 = vrot.lane.b32.xlu0 %v8909_v55, %s5443_s22  ;;  %v1003_v12 = vadd.f32 %v971_v50, %v807_v23  ;;  %v1523_v15 = vadd.f32 %v1491_v20, %v1459_v52  ;;  %v599_v13 = vadd.f32 %v6726_v36, %v561_v37  ;;  %v8912_v55 = vld [vmem:[#allocation56_spill] sm:$0xff]  ;;  %v8913_v50 = vld [vmem:[#allocation61_spill] sm:$0xff]  ;;  %v8914_v20 = vrot.slane %v8894_v21, 3 }
 0x1f9   : > { %v787_v43 = vmul.f32 %v5873_v9, %v8912_v55  ;;  %v1439_v39 = vmul.f32 %v8912_v55, %v5860_v6  ;;  %v1373_v32 = vmul.f32 %v5917_v62, %v8907_v48  ;;  %v1661_v5 = vadd.f32 %v1629_v22, %v1597_v31  ;;  %v8916_v48 = vld [vmem:[#allocation57_spill] sm:$0xff] }
 0x1fa   : > { %v598_v40 = vadd.f32 %v6726_v36, %v560_v7  ;;  %v550_v23 = vmul.f32 %v5860_v6, %v8913_v50  ;;  %v8915_v37 = vrot.slane %v7216_v8, 1  ;;  %v786_v22 = vmul.f32 %v5873_v9, %v8916_v48 }
 0x1fb   : > { %v1853_v31 = vadd.f32 %v1821_v28, %v1661_v5  ;;  %v8917_v7 = vrot.slane %v7216_v8, 2  ;;  %v8919_v50 = vrot.slane %v7216_v8, 3  ;;  %v7417_v28 = vpop.permute.xlu0 %1784  ;;  %v8593_v5 = vrot.slane %v7369_v26, 1 }
 0x1fc   : > { %2339 = vrot.lane.b32.xlu1 %v8914_v20, %s5445_s12  ;;  %2361 = vrot.lane.b32.xlu0 %v7150_v57, %s5445_s12  ;;  %v7395_v52 = vsel %vm1954_vm1, %v8915_v37, %v8585_v30  ;;  %v8918_v57 = vrot.slane %v7328_v41, 3  ;;  %v1438_v37 = vmul.f32 %v8916_v48, %v5860_v6  ;;  %v7415_v30 = vpop.permute.xlu1 %1740  ;;  %v1471_v11 = vadd.f32 %v6726_v36, %v1439_v39 }
 0x1fd   : > { %v7404_v55 = vsel %vm2107_vm0, %v8917_v7, %v8587_v2  ;;  %v819_v2 = vadd.f32 %v787_v43, %v599_v13  ;;  %v1405_v8 = vadd.f32 %v1373_v32, %v1209_v61  ;;  %v1554_v48 = vmul.f32 %v7036_v47, %v5889_v0 }
 0x1fe   : > { %v7411_v20 = vsel %vm2260_vm2, %v8919_v50, %v8918_v57  ;;  %v1166_v57 = vmul.f32 %v5905_v18, %v7036_v47  ;;  %v588_v50 = vadd.f32 %v6726_v36, %v550_v23  ;;  %v776_v58 = vmul.f32 %v5873_v9, %v8920_v45 }
 0x1ff   : > { %v1428_v61 = vmul.f32 %v8920_v45, %v5860_v6  ;;  %v982_v13 = vmul.f32 %v5889_v0, %v7059_v53  ;;  %v1502_v43 = vmul.f32 %v7059_v53, %v5873_v9  ;;  %v1885_v39 = vmax.f32 %v1405_v8, %v1853_v31  ;;  %v7447_v7 = vpop.permute.xlu0 %948 }
 0x200   : > { %2059 = vrot.lane.b32.xlu1 %v7272_v44, %s5444_s23  ;;  %2341 = vrot.lane.b32.xlu0 %v7223_v35, %s5445_s12  ;;  %v818_v47 = vadd.f32 %v786_v22, %v598_v40  ;;  %v1470_v32 = vadd.f32 %v6726_v36, %v1438_v37  ;;  %v1167_v23 = vmul.f32 %v5905_v18, %v7061_v10  ;;  %v7445_v35 = vpop.permute.xlu1 %1336  ;;  %v8923_v21 = vrot.slane %v7241_v33, 1 }
 0x201   : > { %v1555_v44 = vmul.f32 %v7061_v10, %v5889_v0  ;;  %8921 = vst [vmem:[#allocation41_spill] sm:$0xff] %v7445_v35  ;;  %8922 = vst [vmem:[#allocation3_spill] sm:$0xff] %v7447_v7  ;;  %v1198_v45 = vadd.f32 %v1166_v57, %v1002_v60  ;;  %v8924_v8 = vrot.slane %v7369_v26, 2  ;;  %v8925_v40 = vrot.slane %v7241_v33, 2  ;;  %v8928_v7 = vld [vmem:[#allocation67_spill] sm:$0xff] }
 0x202   : > { %v7454_v53 = vsel %vm1954_vm1, %v8923_v21, %v8593_v5  ;;  %v8926_v10 = vrot.slane %v7369_v26, 3  ;;  %v8927_v31 = vrot.slane %v7241_v33, 3  ;;  %v1586_v37 = vadd.f32 %v1554_v48, %v1522_v38 }
 0x203   : > { %v7461_v22 = vsel %vm2107_vm0, %v8925_v40, %v8924_v8  ;;  %v808_v57 = vadd.f32 %v776_v58, %v588_v50  ;;  %v983_v21 = vmul.f32 %v5889_v0, %v8928_v7  ;;  %v1460_v8 = vadd.f32 %v6726_v36, %v1428_v61 }
 0x204   : > { %v7468_v60 = vsel %vm2260_vm2, %v8927_v31, %v8926_v10  ;;  %2212 = vrot.lane.b32.xlu1 %v7277_v63, %s5443_s22  ;;  %2037 = vrot.lane.b32.xlu0 %v7304_v51, %s5444_s23  ;;  %v1014_v40 = vadd.f32 %v982_v13, %v818_v47  ;;  %v1534_v5 = vadd.f32 %v1502_v43, %v1470_v32  ;;  %v7477_v35 = vmax.f32 %v1885_v39, 0.0  ;;  %v7483_v50 = vpop.permute.xlu1 %1788  ;;  %v7485_v63 = vpop.permute.xlu0 %1144 }
 0x205   : > { %v1199_v33 = vadd.f32 %v1167_v23, %v1003_v12  ;;  %v1587_v10 = vadd.f32 %v1555_v44, %v1523_v15  ;;  %v1503_v38 = vmul.f32 %v8928_v7, %v5873_v9  ;;  %v1619_v58 = vmul.f32 %v7160_v27, %v5905_v18 }
 0x206   : > { %v1362_v51 = vmul.f32 %v5917_v62, %v7108_v54  ;;  %v1618_v48 = vmul.f32 %v7108_v54, %v5905_v18  ;;  %v972_v12 = vmul.f32 %v5889_v0, %v7110_v25  ;;  %v1492_v15 = vmul.f32 %v7110_v25, %v5873_v9 }
 0x207   : > { %v1015_v7 = vadd.f32 %v983_v21, %v819_v2  ;;  %v562_v61 = vmul.f32 %v5860_v6, %v7158_v34  ;;  %v1811_v13 = vmul.f32 %v7243_v4, %v5917_v62  ;;  %v8929_v43 = vrot.slane %v7069_v49, 1 }
 0x208   : > { %2190 = vrot.lane.b32.xlu1 %v7311_v16, %s5443_s22  ;;  %v1363_v54 = vmul.f32 %v5917_v62, %v7160_v27  ;;  %v1810_v25 = vmul.f32 %v7245_v19, %v5917_v62  ;;  %v2002_v2 = vrot.slane %v7477_v35, 1  ;;  %v2155_v34 = vrot.slane %v7477_v35, 2  ;;  %v7512_v47 = vpop.permute.xlu1 %1792  ;;  %v7514_v32 = vpop.permute.xlu0 %1340 }
 0x209   : > { %2057 = vrot.lane.b32.xlu0 %v8929_v43, %s5444_s23  ;;  %v1535_v39 = vadd.f32 %v1503_v38, %v1471_v11  ;;  %v1651_v4 = vadd.f32 %v1619_v58, %v1587_v10  ;;  %v1178_v16 = vmul.f32 %v5905_v18, %v7178_v3  ;;  %v2308_v23 = vrot.slane %v7477_v35, 3 }
 0x20a   : > { %v1394_v44 = vadd.f32 %v1362_v51, %v1198_v45  ;;  %v1650_v27 = vadd.f32 %v1618_v48, %v1586_v37  ;;  %v1004_v31 = vadd.f32 %v972_v12, %v808_v57  ;;  %v1524_v21 = vadd.f32 %v1492_v15, %v1460_v8 }
 0x20b   : > { %v600_v19 = vadd.f32 %v6726_v36, %v562_v61  ;;  %v1566_v43 = vmul.f32 %v7178_v3, %v5889_v0  ;;  %v1843_v11 = vadd.f32 %v1811_v13, %v1651_v4  ;;  %v8930_v10 = vrot.slane %v7069_v49, 2 }
 0x20c   : > { %v1395_v38 = vadd.f32 %v1363_v54, %v1199_v33  ;;  %v1842_v58 = vadd.f32 %v1810_v25, %v1650_v27  ;;  %v8931_v45 = vrot.slane %v7328_v41, 1  ;;  %v8932_v3 = vrot.slane %v7328_v41, 2  ;;  %v2165_v51 = vpop.permute.xlu1 %2164  ;;  %v2012_v48 = vpop.permute.xlu0 %2011  ;;  %v8934_v54 = vld [vmem:[#allocation63_spill] sm:$0xff] }
 0x20d   : > { %2210 = vrot.lane.b32.xlu1 %v8930_v10, %s5443_s22  ;;  %2365 = vrot.lane.b32.xlu0 %v7322_v46, %s5445_s12  ;;  %v1210_v8 = vadd.f32 %v1178_v16, %v1014_v40  ;;  %v788_v46 = vmul.f32 %v5873_v9, %v7180_v42  ;;  %v1440_v33 = vmul.f32 %v7180_v42, %v5860_v6  ;;  %v8933_v12 = vrot.slane %v7328_v41, 3 }
 0x20e   : > { %v7530_v37 = vsel %vm1954_vm1, %v8931_v45, %v2002_v2  ;;  %v7537_v57 = vsel %vm2107_vm0, %v8932_v3, %v2155_v34  ;;  %v1168_v61 = vmul.f32 %v5905_v18, %v7212_v56  ;;  %v1556_v40 = vmul.f32 %v7212_v56, %v5889_v0 }
 0x20f   : > { %v7548_v15 = vsel %vm2260_vm2, %v8933_v12, %v2308_v23  ;;  %v1179_v13 = vmul.f32 %v5905_v18, %v7214_v14  ;;  %v2471_v42 = vsel %vm2470_vm4, %v8934_v54, %v2012_v48  ;;  %v1598_v25 = vadd.f32 %v1566_v43, %v1534_v5  ;;  %v8935_v12 = vld [vmem:[#allocation71_spill] sm:$0xff] }
 0x210   : > { %v1567_v4 = vmul.f32 %v7214_v14, %v5889_v0  ;;  %v1875_v16 = vmax.f32 %v1395_v38, %v1843_v11  ;;  %v1874_v27 = vmax.f32 %v1394_v44, %v1842_v58  ;;  %v1374_v56 = vmul.f32 %v5917_v62, %v7263_v17  ;;  %v2014_v11 = vpop.permute.xlu1 %2013  ;;  %v2318_v38 = vpop.permute.xlu0 %2317 }
 0x211   : > { %2061 = vrot.lane.b32.xlu1 %v7395_v52, %s5444_s23  ;;  %2343 = vrot.lane.b32.xlu0 %v7341_v59, %s5445_s12  ;;  %v1630_v10 = vmul.f32 %v7263_v17, %v5905_v18  ;;  %v984_v5 = vmul.f32 %v5889_v0, %v7265_v24  ;;  %v820_v43 = vadd.f32 %v788_v46, %v600_v19  ;;  %v8937_v46 = vld [vmem:[#allocation62_spill] sm:$0xff] }
 0x212   : > { %v1472_v14 = vadd.f32 %v6726_v36, %v1440_v33  ;;  %v1504_v52 = vmul.f32 %v7265_v24, %v5873_v9  ;;  %v2504_v59 = vsel %vm2503_vm5, %v2471_v42, %v2165_v51  ;;  %v1200_v44 = vadd.f32 %v1168_v61, %v1004_v31  ;;  %v8938_v51 = vld [vmem:[#allocation60_spill] sm:$0xff] }
 0x213   : > { %v1588_v58 = vadd.f32 %v1556_v40, %v1524_v21  ;;  %v1211_v45 = vadd.f32 %v1179_v13, %v1015_v7  ;;  %v2537_v3 = vsel %vm2536_vm6, %v2504_v59, %v2318_v38  ;;  %v1599_v48 = vadd.f32 %v1567_v4, %v1535_v39 }
 0x214   : > { %v7575_v17 = vmax.f32 %v1875_v16, 0.0  ;;  %v2601_v54 = vcombine.low %v2537_v3, %v8935_v12  ;;  %v2602_v19 = vcombine.high %v2537_v3, %v8935_v12  ;;  %v8936_v36 = vrot.slane %v7069_v49, 3  ;;  %v2320_v40 = vpop.permute.xlu1 %2319  ;;  %v2167_v13 = vpop.permute.xlu0 %2166 }
 0x215   : > { %2039 = vrot.lane.b32.xlu1 %v7454_v53, %s5444_s23  ;;  %v7584_v24 = vmax.f32 %v1874_v27, 0.0  ;;  %v7586_v31 = vadd.f32 %v1374_v56, %v1210_v8  ;;  %v7588_v7 = vadd.f32 %v1630_v10, %v1598_v25  ;;  %v7590_v39 = vadd.f32 %v984_v5, %v820_v43  ;;  %v8939_v10 = vld [vmem:[#allocation38_spill] sm:$0xff] }
 0x216   : > { %2363 = vrot.lane.b32.xlu0 %v8936_v36, %s5445_s12  ;;  %v7592_v21 = vadd.f32 %v1504_v52, %v1472_v14  ;;  %v2472_v33 = vsel %vm2470_vm4, %v8937_v46, %v2014_v11  ;;  %v2609_v61 = vrot.slane %v2601_v54, %v8938_v51  ;;  %v2616_v53 = vrot.slane %v2602_v19, %v8938_v51  ;;  %v8940_v43 = vld [vmem:[#allocation6_spill] sm:$0xff]  ;;  %v8941_v36 = vld [vmem:[#allocation69_spill] sm:$0xff] }
 0x217   : > { %v1364_v42 = vmul.f32 %v5917_v62, %v7295_v29  ;;  %v1620_v8 = vmul.f32 %v7295_v29, %v5905_v18  ;;  %v1375_v25 = vmul.f32 %v5917_v62, %v7297_v1  ;;  %v2505_v4 = vsel %vm2503_vm5, %v2472_v33, %v2167_v13 }
 0x218   : > { %v2617_v16 = vcombine.high %v2609_v61, %v2609_v61  ;;  %v2618_v27 = vcombine.high %v2616_v53, %v2616_v53  ;;  %v2538_v56 = vsel %vm2536_vm6, %v2505_v4, %v2320_v40  ;;  %v2428_v5 = vrot.slane %v8939_v10, 4  ;;  %v2169_v59 = vpop.permute.xlu1 %2168  ;;  %v2016_v38 = vpop.permute.xlu0 %2015 }
 0x219   : > { %2192 = vrot.lane.b32.xlu1 %v7461_v22, %s5443_s22  ;;  %v1631_v29 = vmul.f32 %v7297_v1, %v5905_v18  ;;  %v2619_v14 = vcombine.low %v2538_v56, %v8940_v43  ;;  %v2620_v52 = vcombine.high %v2538_v56, %v8940_v43  ;;  %v1983_v11 = vrot.slane %v7584_v24, 1 }
 0x21a   : > { %2214 = vrot.lane.b32.xlu0 %v7404_v55, %s5443_s22  ;;  %v3124_v3 = vcombine.low %v2609_v61, %v2617_v16  ;;  %v3125_v12 = vcombine.low %v2616_v53, %v2618_v27  ;;  %v1984_v22 = vrot.slane %v7575_v17, 1  ;;  %v2136_v54 = vrot.slane %v7584_v24, 2 }
 0x21b   : > { %v7618_v55 = vadd.f32 %v1364_v42, %v1200_v44  ;;  %v2627_v19 = vrot.slane %v2619_v14, %v8938_v51  ;;  %v2634_v1 = vrot.slane %v2620_v52, %v8938_v51  ;;  %v2473_v46 = vsel %vm2470_vm4, %v8941_v36, %v2016_v38  ;;  %v8946_v36 = vld [vmem:[#allocation70_spill] sm:$0xff] }
 0x21c   : > { %v1652_v33 = vadd.f32 %v1620_v8, %v1588_v58  ;;  %v3132_v61 = vrot.slane %v3124_v3, %v8938_v51  ;;  %v3139_v53 = vrot.slane %v3125_v12, %v8938_v51  ;;  %v2137_v44 = vrot.slane %v7575_v17, 2  ;;  %v2020_v8 = vpop.permute.xlu1 %2019  ;;  %v2322_v16 = vpop.permute.xlu0 %2321 }
 0x21d   : > { %2345 = vrot.lane.b32.xlu1 %v7468_v60, %s5445_s12  ;;  %v7631_v40 = vadd.f32 %v1375_v25, %v1211_v45  ;;  %v1663_v13 = vadd.f32 %v1631_v29, %v1599_v48  ;;  %v2635_v42 = vcombine.high %v2627_v19, %v2627_v19  ;;  %v2636_v4 = vcombine.high %v2634_v1, %v2634_v1  ;;  %v8942_v25 = vld [vmem:[#allocation12_spill] sm:$0xff] }
 0x21e   : > { %2367 = vrot.lane.b32.xlu0 %v7411_v20, %s5445_s12  ;;  %v1812_v58 = vmul.f32 %v7415_v30, %v5917_v62  ;;  %v2506_v60 = vsel %vm2503_vm5, %v2473_v46, %v2169_v59  ;;  %v3141_v27 = vcombine.high %v3132_v61, %v3139_v53  ;;  %v3140_v20 = vcombine.low %v3132_v61, %v3139_v53  ;;  %v8944_v59 = vld [vmem:[#allocation5_spill] sm:$0xff] }
 0x21f   : > { %v1823_v56 = vmul.f32 %v7417_v28, %v5917_v62  ;;  %v3142_v43 = vcombine.low %v2627_v19, %v2635_v42  ;;  %v3143_v14 = vcombine.low %v2634_v1, %v2636_v4  ;;  %v2539_v45 = vsel %vm2536_vm6, %v2506_v60, %v2322_v16  ;;  %v8945_v1 = vld [vmem:[#allocation2_spill] sm:$0xff] }
 0x220   : > { %v2637_v48 = vcombine.low %v2539_v45, %v8942_v25  ;;  %v2638_v29 = vcombine.high %v2539_v45, %v8942_v25  ;;  %v8943_v30 = vrot.slane %v7369_v26, 1  ;;  %v1985_v52 = vsel %vm1954_vm1, %v1983_v11, %v1984_v22  ;;  %5249 = vmatprep.mubr.msk.f32.mxu0 %vm2470_vm4, %v3141_v27  ;;  %v2018_v53 = vpop.permute.xlu1 %2017  ;;  %v2173_v42 = vpop.permute.xlu0 %2172 }
 0x221   : > { %v2289_v28 = vrot.slane %v7584_v24, 3  ;;  %v1822_v38 = vmul.f32 %v8944_v59, %v5917_v62  ;;  %v3150_v3 = vrot.slane %v3142_v43, %v8938_v51  ;;  %v3157_v12 = vrot.slane %v3143_v14, %v8938_v51  ;;  %3735 = vmatmul.mubr.f32.vlgmr.msra.gmra.mrb[0].mxu0 %v3140_v20  ;;  %v8948_v20 = vld [vmem:[#allocation37_spill] sm:$0xff] }
 0x222   : > { %2041 = vrot.lane.b32.xlu1 %v8943_v30, %s5444_s23  ;;  %2063 = vrot.lane.b32.xlu0 %v7530_v37, %s5444_s23  ;;  %v2290_v19 = vrot.slane %v7575_v17, 3  ;;  %v1441_v37 = vmul.f32 %v8945_v1, %v5860_v6  ;;  %v563_v46 = vmul.f32 %v5860_v6, %v8946_v36  ;;  %v2645_v11 = vrot.slane %v2637_v48, %v8938_v51 }
 0x223   : > { %v2652_v61 = vrot.slane %v2638_v29, %v8938_v51  ;;  %v1844_v4 = vadd.f32 %v1812_v58, %v1652_v33  ;;  %v1855_v60 = vadd.f32 %v1823_v56, %v1663_v13  ;;  %v3159_v16 = vcombine.high %v3150_v3, %v3157_v12  ;;  %v8949_v58 = vld [vmem:[#allocation74_spill] sm:$0xff] }
 0x224   : > { %v3158_v27 = vcombine.low %v3150_v3, %v3157_v12  ;;  %v2653_v43 = vcombine.high %v2645_v11, %v2645_v11  ;;  %v8947_v45 = vrot.slane %v7369_v26, 2  ;;  %v2138_v6 = vsel %vm2107_vm0, %v2136_v54, %v2137_v44  ;;  %v5432_v54 = vld [vmem:[%s8436_s3] ss:$0 sm:$0xff] }
 0x225   : > { %v2654_v14 = vcombine.high %v2652_v61, %v2652_v61  ;;  %v2429_v25 = vrot.slane %v8948_v20, 4  ;;  %v789_v33 = vmul.f32 %v5873_v9, %v8945_v1  ;;  %v1854_v13 = vadd.f32 %v1822_v38, %v7588_v7  ;;  %5250 = vmatprep.mubr.msk.f32.mxu0 %vm2470_vm4, %v3159_v16  ;;  %v2171_v7 = vpop.permute.xlu1 %2170  ;;  %v2326_v38 = vpop.permute.xlu0 %2325 }
 0x226   : > { %2194 = vrot.lane.b32.xlu1 %v8947_v45, %s5443_s22  ;;  %2216 = vrot.lane.b32.xlu0 %v7537_v57, %s5443_s22  ;;  %v2475_v56 = vsel %vm2470_vm4, %v8949_v58, %v2020_v8  ;;  %v2291_v57 = vsel %vm2260_vm2, %v2289_v28, %v2290_v19  ;;  %v7683_v48 = vadd.f32 %v5432_v54, %v1441_v37  ;;  %v8950_v37 = vld [vmem:[#allocation15_spill] sm:$0xff]  ;;  %v8953_v58 = vld [vmem:[#allocation41_spill] sm:$0xff] }
 0x227   : > { %v3160_v29 = vcombine.low %v2645_v11, %v2653_v43  ;;  %v3161_v30 = vcombine.low %v2652_v61, %v2654_v14  ;;  %v2508_v59 = vsel %vm2503_vm5, %v2475_v56, %v2173_v42  ;;  %3740 = vmatmul.mubr.f32.gmra.mrb[2].mxu0 %v3158_v27  ;;  %v601_v8 = vadd.f32 %v5432_v54, %v563_v46  ;;  %v8951_v46 = vld [vmem:[#allocation40_spill] sm:$0xff] }
 0x228   : > { %v1876_v3 = vmax.f32 %v7618_v55, %v1844_v4  ;;  %v1887_v12 = vmax.f32 %v7631_v40, %v1855_v60  ;;  %v2541_v28 = vsel %vm2536_vm6, %v2508_v59, %v2326_v38  ;;  %v1886_v61 = vmax.f32 %v7586_v31, %v1854_v13  ;;  %v8952_v42 = vld [vmem:[#allocation8_spill] sm:$0xff] }
 0x229   : > { %v3168_v1 = vrot.slane %v3160_v29, %v8938_v51  ;;  %v3175_v36 = vrot.slane %v3161_v30, %v8938_v51  ;;  %v2663_v16 = vcombine.low %v2541_v28, %v8950_v37  ;;  %v2664_v11 = vcombine.high %v2541_v28, %v8950_v37  ;;  %v2324_v43 = vpop.permute.xlu1 %2323  ;;  %v2022_v14 = vpop.permute.xlu0 %2021 }
 0x22a   : > { %2369 = vrot.lane.b32.xlu0 %v7548_v15, %s5445_s12  ;;  %v1180_v55 = vmul.f32 %v5905_v18, %v8951_v46  ;;  %v1568_v40 = vmul.f32 %v8951_v46, %v5889_v0  ;;  %v2474_v4 = vsel %vm2470_vm4, %v8952_v42, %v2018_v53  ;;  %2043 = vrot.lane.b32.xlu1 %v1985_v52, %s5444_s23  ;;  %v7705_v13 = vmax.f32 %v1887_v12, 0.0 }
 0x22b   : > { %v2507_v60 = vsel %vm2503_vm5, %v2474_v4, %v2171_v7  ;;  %v2671_v27 = vrot.slane %v2663_v16, %v8938_v51  ;;  %v3177_v15 = vcombine.high %v3168_v1, %v3175_v36  ;;  %v3176_v45 = vcombine.low %v3168_v1, %v3175_v36  ;;  %v8956_v36 = vld [vmem:[#allocation73_spill] sm:$0xff] }
 0x22c   : > { %v821_v31 = vadd.f32 %v789_v33, %v601_v8  ;;  %v1632_v56 = vmul.f32 %v8953_v58, %v5905_v18  ;;  %v2540_v54 = vsel %vm2536_vm6, %v2507_v60, %v2324_v43  ;;  %v7710_v29 = vmax.f32 %v1876_v3, 0.0  ;;  %v8958_v60 = vld [vmem:[#allocation25_spill] sm:$0xff] }
 0x22d   : > { %v2678_v52 = vrot.slane %v2664_v11, %v8938_v51  ;;  %v2679_v53 = vcombine.high %v2671_v27, %v2671_v27  ;;  %v8954_v30 = vrot.slane %v8952_v42, 4  ;;  %v8955_v7 = vrot.slane %v7369_v26, 3  ;;  %5251 = vmatprep.mubr.msk.f32.mxu0 %vm2470_vm4, %v3177_v15  ;;  %v2328_v16 = vpop.permute.xlu1 %2327  ;;  %v2175_v11 = vpop.permute.xlu0 %2174 }
 0x22e   : > { %v7719_v33 = vmax.f32 %v1886_v61, 0.0  ;;  %v1212_v38 = vadd.f32 %v1180_v55, %v7590_v39  ;;  %v1600_v8 = vadd.f32 %v1568_v40, %v7592_v21  ;;  %v1376_v3 = vmul.f32 %v5917_v62, %v8953_v58  ;;  %2196 = vrot.lane.b32.xlu1 %v2138_v6, %s5443_s22  ;;  %3745 = vmatmul.mubr.f32.gmra.mrb[4].mxu0 %v3176_v45  ;;  %v8957_v39 = vld [vmem:[#allocation3_spill] sm:$0xff] }
 0x22f   : > { %v2655_v59 = vcombine.low %v2540_v54, %v8954_v30  ;;  %2347 = vrot.lane.b32.xlu0 %v8955_v7, %s5445_s12  ;;  %v1824_v12 = vmul.f32 %v7483_v50, %v5917_v62  ;;  %v3179_v28 = vcombine.low %v2679_v53, %v2678_v52  ;;  %v2476_v37 = vsel %vm2470_vm4, %v8956_v36, %v2022_v14  ;;  %v8959_v30 = vld [vmem:[#allocation21_spill] sm:$0xff] }
 0x230   : > { %v985_v21 = vmul.f32 %v5889_v0, %v8957_v39  ;;  %v1505_v61 = vmul.f32 %v8957_v39, %v5873_v9  ;;  %v2509_v6 = vsel %vm2503_vm5, %v2476_v37, %v2175_v11  ;;  %v2005_v46 = vrot.slane %v7705_v13, 1 }
 0x231   : > { %v2662_v1 = vrot.slane %v2655_v59, %v8938_v51  ;;  %v1664_v55 = vadd.f32 %v1632_v56, %v1600_v8  ;;  %v2542_v40 = vsel %vm2536_vm6, %v2509_v6, %v2328_v16  ;;  %v1986_v42 = vrot.slane %v7710_v29, 1  ;;  %v2177_v58 = vpop.permute.xlu1 %2176  ;;  %v2024_v56 = vpop.permute.xlu0 %2023 }
 0x232   : > { %v1408_v4 = vadd.f32 %v1376_v3, %v1212_v38  ;;  %v2681_v43 = vcombine.low %v2542_v40, %v8958_v60  ;;  %v2682_v14 = vcombine.high %v2542_v40, %v8958_v60  ;;  %2065 = vrot.lane.b32.xlu1 %v2002_v2, %s5444_s23  ;;  %v2004_v9 = vrot.slane %v7719_v33, 1 }
 0x233   : > { %v3178_v50 = vcombine.low %v2662_v1, %v2671_v27  ;;  %2349 = vrot.lane.b32.xlu0 %v2291_v57, %s5445_s12  ;;  %v1856_v15 = vadd.f32 %v1824_v12, %v1664_v55  ;;  %v1569_v27 = vmul.f32 %v7485_v63, %v5889_v0  ;;  %v3193_v45 = vrot.slane %v3179_v28, %v8938_v51 }
 0x234   : > { %v2680_v54 = vcombine.high %v2678_v52, %v2678_v52  ;;  %v2689_v53 = vrot.slane %v2681_v43, %v8938_v51  ;;  %v2477_v59 = vsel %vm2470_vm4, %v8959_v30, %v2024_v56  ;;  %v2006_v2 = vsel %vm1954_vm1, %v2004_v9, %v2005_v46 }
 0x235   : > { %v3186_v57 = vrot.slane %v3178_v50, %v8938_v51  ;;  %v1987_v0 = vsel %vm1954_vm1, %v1984_v22, %v1986_v42  ;;  %v2158_v52 = vrot.slane %v7705_v13, 2  ;;  %v2696_v8 = vrot.slane %v2682_v14, %v8938_v51  ;;  %v2028_v37 = vpop.permute.xlu1 %2027  ;;  %v2330_v16 = vpop.permute.xlu0 %2329 }
 0x236   : > { %v2697_v3 = vcombine.high %v2689_v53, %v2689_v53  ;;  %v3196_v12 = vcombine.low %v2680_v54, %v2689_v53  ;;  %2045 = vrot.lane.b32.xlu1 %v1987_v0, %s5444_s23  ;;  %v2139_v28 = vrot.slane %v7710_v29, 2  ;;  %v1017_v1 = vadd.f32 %v985_v21, %v821_v31 }
 0x237   : > { %2067 = vrot.lane.b32.xlu0 %v2006_v2, %s5444_s23  ;;  %v3195_v7 = vcombine.high %v3186_v57, %v3193_v45  ;;  %v3194_v38 = vcombine.low %v3186_v57, %v3193_v45  ;;  %v1537_v36 = vadd.f32 %v1505_v61, %v7683_v48  ;;  %v2510_v22 = vsel %vm2503_vm5, %v2477_v59, %v2177_v58  ;;  %v8960_v48 = vld [vmem:[#allocation77_spill] sm:$0xff] }
 0x238   : > { %v2157_v11 = vrot.slane %v7719_v33, 2  ;;  %v1888_v39 = vmax.f32 %v1408_v4, %v1856_v15  ;;  %v1633_v6 = vmul.f32 %v7514_v32, %v5905_v18  ;;  %v3197_v55 = vcombine.low %v2697_v3, %v2696_v8 }
 0x239   : > { %5252 = vmatprep.mubr.msk.f32.mxu0 %vm2470_vm4, %v3195_v7  ;;  %v2543_v50 = vsel %vm2536_vm6, %v2510_v22, %v2330_v16  ;;  %v1181_v31 = vmul.f32 %v5905_v18, %v7485_v63  ;;  %v1601_v4 = vadd.f32 %v1569_v27, %v1537_v36  ;;  %v2140_v18 = vsel %vm2107_vm0, %v2137_v44, %v2139_v28  ;;  %v2181_v15 = vpop.permute.xlu0 %2180  ;;  %v8961_v16 = vld [vmem:[#allocation76_spill] sm:$0xff] }
 0x23a   : > { %3750 = vmatmul.mubr.f32.gmra.mrb[6].mxu0 %v3194_v38  ;;  %v2699_v21 = vcombine.low %v2543_v50, %v8960_v48  ;;  %v2700_v61 = vcombine.high %v2543_v50, %v8960_v48  ;;  %v2159_v40 = vsel %vm2107_vm0, %v2157_v11, %v2158_v52  ;;  %v3204_v63 = vrot.slane %v3196_v12, %v8938_v51 }
 0x23b   : > { %2218 = vrot.lane.b32.xlu0 %v2155_v34, %s5443_s22  ;;  %2220 = vrot.lane.b32.xlu1 %v2159_v40, %s5443_s22  ;;  %v3211_v60 = vrot.slane %v3197_v55, %v8938_v51  ;;  %v1825_v43 = vmul.f32 %v7512_v47, %v5917_v62  ;;  %v2698_v14 = vcombine.high %v2696_v8, %v2696_v8  ;;  %v2026_v34 = vpop.permute.xlu1 %2025  ;;  %v2311_v27 = vrot.slane %v7705_v13, 3 }
 0x23c   : > { %v2707_v9 = vrot.slane %v2699_v21, %v8938_v51  ;;  %v7795_v45 = vmax.f32 %v1888_v39, 0.0  ;;  %v1665_v57 = vadd.f32 %v1633_v6, %v1601_v4  ;;  %v2714_v44 = vrot.slane %v2700_v61, %v8938_v51  ;;  %v8962_v39 = vld [vmem:[#allocation22_spill] sm:$0xff] }
 0x23d   : > { %v3213_v58 = vcombine.high %v3204_v63, %v3211_v60  ;;  %v3212_v56 = vcombine.low %v3204_v63, %v3211_v60  ;;  %v2292_v47 = vrot.slane %v7710_v29, 3  ;;  %v1377_v30 = vmul.f32 %v5917_v62, %v7514_v32  ;;  %v2334_v32 = vpop.permute.xlu0 %2333 }
 0x23e   : > { %v2715_v54 = vcombine.high %v2707_v9, %v2707_v9  ;;  %v3214_v53 = vcombine.low %v2698_v14, %v2707_v9  ;;  %v2479_v59 = vsel %vm2470_vm4, %v8939_v10, %v2028_v37  ;;  %v2310_v2 = vrot.slane %v7719_v33, 3  ;;  %v8965_v9 = vld [vmem:[#allocation44_spill] sm:$0xff] }
 0x23f   : > { %2198 = vrot.lane.b32.xlu0 %v2140_v18, %s5443_s22  ;;  %2371 = vrot.lane.b32.xlu1 %v2308_v23, %s5445_s12  ;;  %v1213_v0 = vadd.f32 %v1181_v31, %v1017_v1  ;;  %v2512_v38 = vsel %vm2503_vm5, %v2479_v59, %v2181_v15  ;;  %v2179_v8 = vpop.permute.xlu1 %2178  ;;  %v2430_v62 = vsel %vm2413_vm3, %v2428_v5, %v2429_v25  ;;  %v2007_v1 = vrot.slane %v7795_v45, 1 }
 0x240   : > { %5253 = vmatprep.mubr.msk.f32.mxu0 %vm2470_vm4, %v3213_v58  ;;  %v3215_v7 = vcombine.low %v2715_v54, %v2714_v44  ;;  %v1857_v3 = vadd.f32 %v1825_v43, %v1665_v57  ;;  %v2545_v23 = vsel %vm2536_vm6, %v2512_v38, %v2334_v32  ;;  %v2312_v12 = vsel %vm2260_vm2, %v2310_v2, %v2311_v27 }
 0x241   : > { %3755 = vmatmul.mubr.f32.gmra.mrb[8].mxu0 %v3212_v56  ;;  %v3222_v36 = vrot.slane %v3214_v53, %v8938_v51  ;;  %v2725_v22 = vcombine.low %v2545_v23, %v2430_v62  ;;  %v2293_v10 = vsel %vm2260_vm2, %v2290_v19, %v2292_v47  ;;  %v1409_v5 = vadd.f32 %v1377_v30, %v1213_v0  ;;  %v2030_v19 = vpop.permute.xlu0 %2029 }
 0x242   : > { %v3229_v37 = vrot.slane %v3215_v7, %v8938_v51  ;;  %v2478_v11 = vsel %vm2470_vm4, %v8961_v16, %v2026_v34  ;;  %v8963_v6 = vrot.slane %v8962_v39, 1  ;;  %v2008_v18 = vsel %vm1954_vm1, %v2005_v46, %v2007_v1 }
 0x243   : > { %2373 = vrot.lane.b32.xlu0 %v2312_v12, %s5445_s12  ;;  %2351 = vrot.lane.b32.xlu1 %v2293_v10, %s5445_s12  ;;  %v2511_v50 = vsel %vm2503_vm5, %v2478_v11, %v2179_v8  ;;  %v2733_v31 = vrot.slane %v2725_v22, %v8938_v51  ;;  %v2332_v48 = vpop.permute.xlu1 %2331  ;;  %v1889_v40 = vmax.f32 %v1409_v5, %v1857_v3  ;;  %v2160_v63 = vrot.slane %v7795_v45, 2 }
 0x244   : > { %v1989_v55 = vsel %vm1954_vm1, %v1986_v42, %v8963_v6  ;;  %v3231_v21 = vcombine.high %v3222_v36, %v3229_v37  ;;  %v3230_v61 = vcombine.low %v3222_v36, %v3229_v37  ;;  %v2544_v4 = vsel %vm2536_vm6, %v2511_v50, %v2332_v48  ;;  %v8969_v6 = vld [vmem:[#allocation45_spill] sm:$0xff] }
 0x245   : > { %v2726_v42 = vcombine.high %v2545_v23, %v2430_v62  ;;  %v2741_v60 = vcombine.high %v2733_v31, %v2733_v31  ;;  %v8964_v43 = vrot.slane %v8961_v16, 4  ;;  %v2431_v34 = vrot.slane %v8965_v9, 4  ;;  %v2052_v56 = vpop.permute.xlu0 %2051 }
 0x246   : > { %5254 = vmatprep.mubr.msk.f32.mxu0 %vm2470_vm4, %v3231_v21  ;;  %v2716_v15 = vcombine.high %v2714_v44, %v2714_v44  ;;  %v7852_v54 = vmax.f32 %v1889_v40, 0.0  ;;  %v2161_v53 = vsel %vm2107_vm0, %v2158_v52, %v2160_v63  ;;  %v2313_v30 = vrot.slane %v7795_v45, 3 }
 0x247   : > { %v2717_v14 = vcombine.low %v2544_v4, %v8964_v43  ;;  %2069 = vrot.lane.b32.xlu0 %v2008_v18, %s5444_s23  ;;  %2047 = vrot.lane.b32.xlu1 %v1989_v55, %s5444_s23  ;;  %v3233_v57 = vcombine.low %v2733_v31, %v2741_v60  ;;  %v2183_v58 = vpop.permute.xlu1 %2182  ;;  %v2740_v59 = vrot.slane %v2726_v42, %v8938_v51  ;;  %v8966_v0 = vrot.slane %v8962_v39, 2 }
 0x248   : > { %3760 = vmatmul.mubr.f32.gmra.mrb[10].mxu0 %v3230_v61  ;;  %v2480_v7 = vsel %vm2470_vm4, %v8948_v20, %v2030_v19  ;;  %v7873_v52 = vsel %vm2413_vm3, %v2429_v25, %v2431_v34  ;;  %v8967_v3 = vrot.slane %v8962_v39, 3  ;;  %v2314_v20 = vsel %vm2260_vm2, %v2311_v27, %v2313_v30 }
 0x249   : > { %v2724_v46 = vrot.slane %v2717_v14, %v8938_v51  ;;  %v2142_v44 = vsel %vm2107_vm0, %v2139_v28, %v8966_v0  ;;  %v3247_v38 = vrot.slane %v3233_v57, %v8938_v51  ;;  %v2513_v28 = vsel %vm2503_vm5, %v2480_v7, %v2183_v58  ;;  %v2205_v32 = vpop.permute.xlu0 %2204 }
 0x24a   : > { %v2295_v23 = vsel %vm2260_vm2, %v2292_v47, %v8967_v3  ;;  %v2162_v25 = vrot.slane %v7852_v54, 2  ;;  %v2009_v36 = vrot.slane %v7852_v54, 1  ;;  %v2742_v37 = vcombine.high %v2740_v59, %v2740_v59  ;;  %v8968_v47 = vld [vmem:[#allocation55_spill] sm:$0xff] }
 0x24b   : > { %v3232_v2 = vcombine.low %v2716_v15, %v2724_v46  ;;  %2222 = vrot.lane.b32.xlu0 %v2161_v53, %s5443_s22  ;;  %2200 = vrot.lane.b32.xlu1 %v2142_v44, %s5443_s22  ;;  %v2336_v62 = vpop.permute.xlu1 %2335  ;;  %v2491_v16 = vsel %vm2470_vm4, %v8968_v47, %v2052_v56  ;;  %v2449_v27 = vrot.slane %v8968_v47, 4  ;;  %v2450_v55 = vrot.slane %v8969_v6, 4  ;;  %v8970_v44 = vld [vmem:[#allocation58_spill] sm:$0xff] }
 0x24c   : > { %v2546_v12 = vsel %vm2536_vm6, %v2513_v28, %v2336_v62  ;;  %v2524_v48 = vsel %vm2503_vm5, %v2491_v16, %v2205_v32  ;;  %v2010_v19 = vsel %vm1954_vm1, %v2007_v1, %v2009_v36  ;;  %v2315_v21 = vrot.slane %v7852_v54, 3  ;;  %v8971_v62 = vld [vmem:[#allocation53_spill] sm:$0xff] }
 0x24d   : > { %v3240_v8 = vrot.slane %v3232_v2, %v8938_v51  ;;  %v2743_v22 = vcombine.low %v2546_v12, %v7873_v52  ;;  %v2050_v31 = vpop.permute.xlu0 %2049  ;;  %v3250_v61 = vcombine.low %v2740_v59, %v2742_v37  ;;  %v2163_v18 = vsel %vm2107_vm0, %v2160_v63, %v2162_v25 }
 0x24e   : > { %v2451_v60 = vsel %vm2413_vm3, %v2449_v27, %v2450_v55  ;;  %v2316_v1 = vsel %vm2260_vm2, %v2313_v30, %v2315_v21  ;;  %v2744_v59 = vcombine.high %v2546_v12, %v7873_v52  ;;  %v2490_v0 = vsel %vm2470_vm4, %v8962_v39, %v2050_v31 }
 0x24f   : > { %2375 = vrot.lane.b32.xlu0 %v2314_v20, %s5445_s12  ;;  %v3249_v10 = vcombine.high %v3240_v8, %v3247_v38  ;;  %v3248_v5 = vcombine.low %v3240_v8, %v3247_v38  ;;  %2353 = vrot.lane.b32.xlu1 %v2295_v23, %s5445_s12  ;;  %v2751_v11 = vrot.slane %v2743_v22, %v8938_v51  ;;  %v2358_v50 = vpop.permute.xlu1 %2357  ;;  %v2433_v7 = vrot.slane %v8970_v44, 4 }
 0x250   : > { %v2557_v4 = vsel %vm2536_vm6, %v2524_v48, %v2358_v50  ;;  %v3258_v57 = vrot.slane %v3250_v61, %v8938_v51  ;;  %v2447_v52 = vrot.slane %v8962_v39, 4  ;;  %v2452_v32 = vrot.slane %v8971_v62, 4 }
 0x251   : > { %5255 = vmatprep.mubr.msk.f32.mxu0 %vm2470_vm4, %v3249_v10  ;;  %v2759_v40 = vcombine.high %v2751_v11, %v2751_v11  ;;  %v2032_v14 = vpop.permute.xlu0 %2031  ;;  %v2911_v15 = vcombine.low %v2557_v4, %v2451_v60  ;;  %v2912_v30 = vcombine.high %v2557_v4, %v2451_v60  ;;  %v2758_v3 = vrot.slane %v2744_v59, %v8938_v51 }
 0x252   : > { %3765 = vmatmul.mubr.f32.gmra.mrb[12].mxu0 %v3248_v5  ;;  %v2434_v22 = vsel %vm2413_vm3, %v2431_v34, %v2433_v7  ;;  %v2453_v16 = vsel %vm2413_vm3, %v2450_v55, %v2452_v32 }
 0x253   : > { %2071 = vrot.lane.b32.xlu0 %v2010_v19, %s5444_s23  ;;  %2224 = vrot.lane.b32.xlu1 %v2163_v18, %s5443_s22  ;;  %v3251_v42 = vcombine.low %v2751_v11, %v2759_v40  ;;  %v2203_v43 = vpop.permute.xlu1 %2202  ;;  %v2919_v2 = vrot.slane %v2911_v15, %v8938_v51  ;;  %v2760_v50 = vcombine.high %v2758_v3, %v2758_v3 }
 0x254   : > { %v2523_v38 = vsel %vm2503_vm5, %v2490_v0, %v2203_v43 }
 0x255   : > { %v3265_v46 = vrot.slane %v3251_v42, %v8938_v51  ;;  %v2054_v58 = vpop.permute.xlu0 %2053  ;;  %v2927_v23 = vcombine.high %v2919_v2, %v2919_v2  ;;  %v3268_v55 = vcombine.low %v2758_v3, %v2760_v50 }
 0x256   : > { %v2492_v37 = vsel %vm2470_vm4, %v8969_v6, %v2054_v58 }
 0x257   : > { %2377 = vrot.lane.b32.xlu0 %v2316_v1, %s5445_s12  ;;  %2073 = vrot.lane.b32.xlu1 %v2009_v36, %s5444_s23  ;;  %v2185_v63 = vpop.permute.xlu1 %2184  ;;  %v3267_v56 = vcombine.high %v3258_v57, %v3265_v46  ;;  %v3266_v53 = vcombine.low %v3258_v57, %v3265_v46  ;;  %v2481_v36 = vsel %vm2470_vm4, %v8965_v9, %v2032_v14  ;;  %s371_s23 = scalar_lea.vmem %s8443_s10, %s5513_s15 }
 0x258   : > { %v2514_v10 = vsel %vm2503_vm5, %v2481_v36, %v2185_v63 }
 0x259   : > { %5256 = vmatprep.mubr.msk.f32.mxu0 %vm2470_vm4, %v3267_v56  ;;  %v2356_v28 = vpop.permute.xlu0 %2355 }
 0x25a   : > { %3770 = vmatmul.mubr.f32.gmra.mrb[14].mxu0 %v3266_v53  ;;  %v2556_v12 = vsel %vm2536_vm6, %v2523_v38, %v2356_v28  ;;  %v2454_v28 = vrot.slane %v7069_v49, 4 }
 0x25b   : > { %2226 = vrot.lane.b32.xlu0 %v2162_v25, %s5443_s22  ;;  %2379 = vrot.lane.b32.xlu1 %v2315_v21, %s5445_s12  ;;  %v2207_v8 = vpop.permute.xlu1 %2206  ;;  %v2903_v20 = vcombine.low %v2556_v12, %v2447_v52  ;;  %v2926_v25 = vrot.slane %v2912_v30, %v8938_v51 }
 0x25c   : > { %v2525_v5 = vsel %vm2503_vm5, %v2492_v37, %v2207_v8 }
 0x25d   : > { %v2910_v47 = vrot.slane %v2903_v20, %v8938_v51  ;;  %v2338_v27 = vpop.permute.xlu0 %2337  ;;  %v3413_v9 = vcombine.low %v2927_v23, %v2926_v25  ;;  %v2928_v61 = vcombine.high %v2926_v25, %v2926_v25 }
 0x25e   : > { %v2547_v31 = vsel %vm2536_vm6, %v2514_v10, %v2338_v27 }
 0x25f   : > { %v2360_v11 = vpop.permute.xlu1 %2359  ;;  %v2761_v19 = vcombine.low %v2547_v31, %v2434_v22  ;;  %v3412_v21 = vcombine.low %v2910_v47, %v2919_v2  ;;  %v3427_v43 = vrot.slane %v3413_v9, %v8938_v51  ;;  %v3276_v2 = vrot.slane %v3268_v55, %v8938_v51 }
 0x260   : > { %v2558_v6 = vsel %vm2536_vm6, %v2525_v5, %v2360_v11  ;;  %v2762_v8 = vcombine.high %v2547_v31, %v2434_v22  ;;  %v2455_v11 = vsel %vm2413_vm3, %v2452_v32, %v2454_v28  ;;  %v8972_v31 = vld [vmem:[#allocation65_spill] sm:$0xff] }
 0x261   : > { %v2929_v48 = vcombine.low %v2558_v6, %v2453_v16  ;;  %v2930_v34 = vcombine.high %v2558_v6, %v2453_v16  ;;  %v2769_v4 = vrot.slane %v2761_v19, %v8938_v51  ;;  %v2056_v42 = vpop.permute.xlu0 %2055  ;;  %v3420_v60 = vrot.slane %v3412_v21, %v8938_v51 }
 0x262   : > { %v2493_v10 = vsel %vm2470_vm4, %v8971_v62, %v2056_v42  ;;  %v2776_v22 = vrot.slane %v2762_v8, %v8938_v51  ;;  %v2435_v9 = vrot.slane %v8972_v31, 4 }
 0x263   : > { %v2937_v40 = vrot.slane %v2929_v48, %v8938_v51  ;;  %v2034_v18 = vpop.permute.xlu1 %2033  ;;  %v2944_v14 = vrot.slane %v2930_v34, %v8938_v51  ;;  %v2777_v57 = vcombine.high %v2769_v4, %v2769_v4  ;;  %v3429_v46 = vcombine.high %v3420_v60, %v3427_v43  ;;  %v8973_v48 = vld [vmem:[#allocation64_spill] sm:$0xff] }
 0x264   : > { %v3428_v63 = vcombine.low %v3420_v60, %v3427_v43  ;;  %v2482_v37 = vsel %vm2470_vm4, %v8970_v44, %v2034_v18  ;;  %v2436_v34 = vrot.slane %v8973_v48, 4 }
 0x265   : > { %v2945_v15 = vcombine.high %v2937_v40, %v2937_v40  ;;  %v3430_v1 = vcombine.low %v2928_v61, %v2937_v40  ;;  %v3269_v56 = vcombine.low %v2769_v4, %v2777_v57  ;;  %v2036_v59 = vpop.permute.xlu0 %2035  ;;  %5265 = vmatprep.mubr.msk.f32.mxu1 %vm2470_vm4, %v3429_v46  ;;  %v2946_v61 = vcombine.high %v2944_v14, %v2944_v14 }
 0x266   : > { %3815 = vmatmul.mubr.f32.vlgmr.msra.gmra.mrb[0].mxu1 %v3428_v63  ;;  %v2483_v40 = vsel %vm2470_vm4, %v8972_v31, %v2036_v59  ;;  %v2778_v4 = vcombine.high %v2776_v22, %v2776_v22  ;;  %v2437_v60 = vsel %vm2413_vm3, %v2435_v9, %v2436_v34 }
 0x267   : > { %v3431_v58 = vcombine.low %v2945_v15, %v2944_v14  ;;  %v2209_v53 = vpop.permute.xlu1 %2208  ;;  %v3438_v30 = vrot.slane %v3430_v1, %v8938_v51  ;;  %v3283_v38 = vrot.slane %v3269_v56, %v8938_v51 }
 0x268   : > { %v2526_v5 = vsel %vm2503_vm5, %v2493_v10, %v2209_v53  ;;  %v3286_v46 = vcombine.low %v2776_v22, %v2778_v4 }
 0x269   : > { %v3445_v0 = vrot.slane %v3431_v58, %v8938_v51  ;;  %v3285_v12 = vcombine.high %v3276_v2, %v3283_v38  ;;  %v3284_v25 = vcombine.low %v3276_v2, %v3283_v38 }
 0x26a   : > { %v2187_v23 = vpop.permute.xlu0 %2186 }
 0x26b   : > { %v2189_v3 = vpop.permute.xlu1 %2188  ;;  %v3447_v20 = vcombine.high %v3438_v30, %v3445_v0  ;;  %v3446_v36 = vcombine.low %v3438_v30, %v3445_v0  ;;  %5257 = vmatprep.mubr.msk.f32.mxu0 %vm2470_vm4, %v3285_v12  ;;  %v2515_v47 = vsel %vm2503_vm5, %v2482_v37, %v2187_v23  ;;  %v3294_v30 = vrot.slane %v3286_v46, %v8938_v51  ;;  %v8974_v12 = vld [vmem:[#allocation26_spill] sm:$0xff] }
 0x26c   : > { %3775 = vmatmul.mubr.f32.gmra.mrb[16].mxu0 %v3284_v25  ;;  %v2516_v62 = vsel %vm2503_vm5, %v2483_v40, %v2189_v3  ;;  %v8975_v25 = vld [vmem:[#allocation23_spill] sm:$0xff] }
 0x26d   : > { %5266 = vmatprep.mubr.msk.f32.mxu1 %vm2470_vm4, %v3447_v20  ;;  %v2456_v20 = vrot.slane %v8974_v12, 4 }
 0x26e   : > { %3820 = vmatmul.mubr.f32.gmra.mrb[2].mxu1 %v3446_v36  ;;  %v2362_v27 = vpop.permute.xlu0 %2361  ;;  %v2457_v36 = vrot.slane %v8975_v25, 4 }
 0x26f   : > { %v2340_v16 = vpop.permute.xlu1 %2339  ;;  %v2559_v6 = vsel %vm2536_vm6, %v2526_v5, %v2362_v27 }
 0x270   : > { %v2548_v50 = vsel %vm2536_vm6, %v2515_v47, %v2340_v16  ;;  %v2947_v19 = vcombine.low %v2559_v6, %v2455_v11  ;;  %v2948_v21 = vcombine.high %v2559_v6, %v2455_v11  ;;  %v8976_v11 = vld [vmem:[#allocation68_spill] sm:$0xff]  ;;  %v2458_v6 = vsel %vm2413_vm3, %v2456_v20, %v2457_v36 }
 0x271   : > { %v2779_v32 = vcombine.low %v2548_v50, %v2433_v7  ;;  %v2438_v27 = vrot.slane %v8976_v11, 4 }
 0x272   : > { %v2955_v18 = vrot.slane %v2947_v19, %v8938_v51  ;;  %v2342_v55 = vpop.permute.xlu0 %2341  ;;  %v7984_v15 = vrot.slane %v2948_v21, %v8938_v51 }
 0x273   : > { %v2060_v42 = vpop.permute.xlu1 %2059  ;;  %v2549_v43 = vsel %vm2536_vm6, %v2516_v62, %v2342_v55  ;;  %v2786_v63 = vrot.slane %v2779_v32, %v8938_v51  ;;  %v2439_v40 = vsel %vm2413_vm3, %v2436_v34, %v2438_v27 }
 0x274   : > { %v2963_v14 = vcombine.high %v2955_v18, %v2955_v18  ;;  %v3448_v1 = vcombine.low %v2946_v61, %v2955_v18  ;;  %v2787_v57 = vcombine.low %v2549_v43, %v2437_v60  ;;  %v2495_v22 = vsel %vm2470_vm4, %v8974_v12, %v2060_v42 }
 0x275   : > { %v2788_v50 = vcombine.high %v2549_v43, %v2437_v60 }
 0x276   : > { %v3449_v44 = vcombine.low %v2963_v14, %v7984_v15  ;;  %v2795_v7 = vrot.slane %v2787_v57, %v8938_v51  ;;  %v2038_v56 = vpop.permute.xlu0 %2037  ;;  %v3456_v53 = vrot.slane %v3448_v1, %v8938_v51 }
 0x277   : > { %v2213_v58 = vpop.permute.xlu1 %2212  ;;  %v2484_v19 = vsel %vm2470_vm4, %v8973_v48, %v2038_v56  ;;  %v2802_v62 = vrot.slane %v2788_v50, %v8938_v51  ;;  %v2459_v56 = vrot.slane %v7328_v41, 4 }
 0x278   : > { %v3463_v59 = vrot.slane %v3449_v44, %v8938_v51  ;;  %v3287_v2 = vcombine.low %v2786_v63, %v2795_v7  ;;  %v2528_v5 = vsel %vm2503_vm5, %v2495_v22, %v2213_v58  ;;  %v2803_v32 = vcombine.high %v2795_v7, %v2795_v7 }
 0x279   : > { %v2804_v34 = vcombine.high %v2802_v62, %v2802_v62  ;;  %v2440_v58 = vrot.slane %v7369_v26, 4 }
 0x27a   : > { %v3301_v0 = vrot.slane %v3287_v2, %v8938_v51  ;;  %v3465_v3 = vcombine.high %v3456_v53, %v3463_v59  ;;  %v3464_v23 = vcombine.low %v3456_v53, %v3463_v59  ;;  %v3304_v46 = vcombine.low %v2803_v32, %v2802_v62 }
 0x27b   : > { %v2191_v38 = vpop.permute.xlu1 %2190  ;;  %v2058_v8 = vpop.permute.xlu0 %2057  ;;  %v2964_v2 = vcombine.high %v7984_v15, %v7984_v15 }
 0x27c   : > { %5267 = vmatprep.mubr.msk.f32.mxu1 %vm2470_vm4, %v3465_v3  ;;  %v3303_v37 = vcombine.high %v3294_v30, %v3301_v0  ;;  %v3302_v10 = vcombine.low %v3294_v30, %v3301_v0  ;;  %v2517_v21 = vsel %vm2503_vm5, %v2484_v19, %v2191_v38  ;;  %v2494_v43 = vsel %vm2470_vm4, %v7069_v49, %v2058_v8 }
 0x27d   : > { %3825 = vmatmul.mubr.f32.gmra.mrb[4].mxu1 %v3464_v23  ;;  %v3312_v8 = vrot.slane %v3304_v46, %v8938_v51  ;;  %v2441_v49 = vsel %vm2413_vm3, %v2438_v27, %v2440_v58 }
 0x27e   : > { %5258 = vmatprep.mubr.msk.f32.mxu0 %vm2470_vm4, %v3303_v37 }
 0x27f   : > { %v2211_v47 = vpop.permute.xlu1 %2210  ;;  %v2366_v16 = vpop.permute.xlu0 %2365  ;;  %3780 = vmatmul.mubr.f32.gmra.mrb[18].mxu0 %v3302_v10 }
 0x280   : > { %v2561_v31 = vsel %vm2536_vm6, %v2528_v5, %v2366_v16  ;;  %v2527_v48 = vsel %vm2503_vm5, %v2494_v43, %v2211_v47 }
 0x281   : > { %v2973_v9 = vcombine.low %v2561_v31, %v2458_v6  ;;  %v2974_v55 = vcombine.high %v2561_v31, %v2458_v6 }
 0x283   : > { %v2062_v61 = vpop.permute.xlu1 %2061  ;;  %v2344_v4 = vpop.permute.xlu0 %2343  ;;  %v2981_v18 = vrot.slane %v2973_v9, %v8938_v51  ;;  %v2988_v7 = vrot.slane %v2974_v55, %v8938_v51 }
 0x284   : > { %v2550_v42 = vsel %vm2536_vm6, %v2517_v21, %v2344_v4  ;;  %v2496_v37 = vsel %vm2470_vm4, %v8975_v25, %v2062_v61 }
 0x285   : > { %v2805_v60 = vcombine.low %v2550_v42, %v2439_v40  ;;  %v2989_v63 = vcombine.high %v2981_v18, %v2981_v18  ;;  %v2806_v30 = vcombine.high %v2550_v42, %v2439_v40  ;;  %v2990_v20 = vcombine.high %v2988_v7, %v2988_v7 }
 0x287   : > { %v2813_v14 = vrot.slane %v2805_v60, %v8938_v51  ;;  %v2040_v1 = vpop.permute.xlu1 %2039  ;;  %v3467_v3 = vcombine.low %v2981_v18, %v2989_v63  ;;  %v2820_v47 = vrot.slane %v2806_v30, %v8938_v51  ;;  %v3484_v60 = vcombine.low %v2988_v7, %v2990_v20 }
 0x288   : > { %v2364_v57 = vpop.permute.xlu0 %2363  ;;  %v2485_v15 = vsel %vm2470_vm4, %v8976_v11, %v2040_v1 }
 0x289   : > { %v2560_v44 = vsel %vm2536_vm6, %v2527_v48, %v2364_v57  ;;  %v3305_v53 = vcombine.low %v2804_v34, %v2813_v14  ;;  %v2821_v16 = vcombine.high %v2813_v14, %v2813_v14  ;;  %v3481_v27 = vrot.slane %v3467_v3, %v8938_v51 }
 0x28a   : > { %v2965_v59 = vcombine.low %v2560_v44, %v2454_v28  ;;  %v2460_v28 = vsel %vm2413_vm3, %v2457_v36, %v2459_v56  ;;  %v2822_v4 = vcombine.high %v2820_v47, %v2820_v47  ;;  %v3492_v44 = vrot.slane %v3484_v60, %v8938_v51 }
 0x28b   : > { %v2193_v0 = vpop.permute.xlu1 %2192  ;;  %v3319_v23 = vrot.slane %v3305_v53, %v8938_v51  ;;  %v3322_v62 = vcombine.low %v2821_v16, %v2820_v47  ;;  %v2461_v53 = vrot.slane %v7477_v35, 4 }
 0x28c   : > { %v2215_v38 = vpop.permute.xlu0 %2214  ;;  %v2972_v12 = vrot.slane %v2965_v59, %v8938_v51  ;;  %v2518_v50 = vsel %vm2503_vm5, %v2485_v15, %v2193_v0 }
 0x28d   : > { %v3321_v22 = vcombine.high %v3312_v8, %v3319_v23  ;;  %v3320_v5 = vcombine.low %v3312_v8, %v3319_v23  ;;  %v2529_v25 = vsel %vm2503_vm5, %v2496_v37, %v2215_v38  ;;  %v3330_v1 = vrot.slane %v3322_v62, %v8938_v51 }
 0x28e   : > { %v3466_v10 = vcombine.low %v2964_v2, %v2972_v12  ;;  %v2462_v37 = vsel %vm2413_vm3, %v2459_v56, %v2461_v53 }
 0x28f   : > { %v2346_v6 = vpop.permute.xlu1 %2345  ;;  %5259 = vmatprep.mubr.msk.f32.mxu0 %vm2470_vm4, %v3321_v22 }
 0x290   : > { %v2368_v31 = vpop.permute.xlu0 %2367  ;;  %v3474_v9 = vrot.slane %v3466_v10, %v8938_v51  ;;  %v2551_v36 = vsel %vm2536_vm6, %v2518_v50, %v2346_v6  ;;  %3785 = vmatmul.mubr.f32.gmra.mrb[20].mxu0 %v3320_v5 }
 0x291   : > { %v2562_v11 = vsel %vm2536_vm6, %v2529_v25, %v2368_v31  ;;  %v2823_v19 = vcombine.low %v2551_v36, %v2441_v49  ;;  %v2824_v0 = vcombine.high %v2551_v36, %v2441_v49  ;;  %v2442_v25 = vrot.slane %v7584_v24, 4 }
 0x292   : > { %v2991_v21 = vcombine.low %v2562_v11, %v2460_v28  ;;  %v3483_v61 = vcombine.high %v3474_v9, %v3481_v27  ;;  %v3482_v40 = vcombine.low %v3474_v9, %v3481_v27  ;;  %v2992_v48 = vcombine.high %v2562_v11, %v2460_v28 }
 0x293   : > { %v2831_v32 = vrot.slane %v2823_v19, %v8938_v51  ;;  %v2838_v10 = vrot.slane %v2824_v0, %v8938_v51  ;;  %v2443_v9 = vrot.slane %v7575_v17, 4 }
 0x294   : > { %v2999_v18 = vrot.slane %v2991_v21, %v8938_v51  ;;  %v2042_v42 = vpop.permute.xlu1 %2041  ;;  %v2064_v55 = vpop.permute.xlu0 %2063  ;;  %5268 = vmatprep.mubr.msk.f32.mxu1 %vm2470_vm4, %v3483_v61  ;;  %v3006_v59 = vrot.slane %v2992_v48, %v8938_v51 }
 0x295   : > { %v3323_v43 = vcombine.low %v2822_v4, %v2831_v32  ;;  %3830 = vmatmul.mubr.f32.gmra.mrb[6].mxu1 %v3482_v40  ;;  %v2497_v38 = vsel %vm2470_vm4, %v7328_v41, %v2064_v55  ;;  %v2486_v22 = vsel %vm2470_vm4, %v7369_v26, %v2042_v42  ;;  %v2839_v5 = vcombine.high %v2831_v32, %v2831_v32 }
 0x296   : > { %v3007_v14 = vcombine.high %v2999_v18, %v2999_v18  ;;  %v3008_v49 = vcombine.high %v3006_v59, %v3006_v59  ;;  %v2840_v36 = vcombine.high %v2838_v10, %v2838_v10  ;;  %v2444_v42 = vsel %vm2413_vm3, %v2442_v25, %v2443_v9 }
 0x297   : > { %v3337_v57 = vrot.slane %v3323_v43, %v8938_v51  ;;  %v3340_v19 = vcombine.low %v2839_v5, %v2838_v10 }
 0x298   : > { %v3485_v34 = vcombine.low %v2999_v18, %v3007_v14  ;;  %v2195_v46 = vpop.permute.xlu1 %2194  ;;  %v2217_v63 = vpop.permute.xlu0 %2216  ;;  %v3502_v6 = vcombine.low %v3006_v59, %v3008_v49 }
 0x299   : > { %v3339_v2 = vcombine.high %v3330_v1, %v3337_v57  ;;  %v3338_v30 = vcombine.low %v3330_v1, %v3337_v57  ;;  %v2530_v8 = vsel %vm2503_vm5, %v2497_v38, %v2217_v63  ;;  %v2519_v47 = vsel %vm2503_vm5, %v2486_v22, %v2195_v46 }
 0x29a   : > { %v3499_v7 = vrot.slane %v3485_v34, %v8938_v51  ;;  %v3510_v18 = vrot.slane %v3502_v6, %v8938_v51  ;;  %v3348_v60 = vrot.slane %v3340_v19, %v8938_v51  ;;  %v2464_v22 = vrot.slane %v7705_v13, 4 }
 0x29b   : > { %5260 = vmatprep.mubr.msk.f32.mxu0 %vm2470_vm4, %v3339_v2 }
 0x29c   : > { %v2370_v3 = vpop.permute.xlu0 %2369  ;;  %v3501_v23 = vcombine.high %v3492_v44, %v3499_v7  ;;  %v3500_v12 = vcombine.low %v3492_v44, %v3499_v7  ;;  %v2044_v20 = vpop.permute.xlu1 %2043  ;;  %3790 = vmatmul.mubr.f32.gmra.mrb[22].mxu0 %v3338_v30 }
 0x29d   : > { %v2563_v28 = vsel %vm2536_vm6, %v2530_v8, %v2370_v3  ;;  %v2487_v11 = vsel %vm2470_vm4, %v7584_v24, %v2044_v20 }
 0x29e   : > { %v3009_v15 = vcombine.low %v2563_v28, %v2462_v37  ;;  %5269 = vmatprep.mubr.msk.f32.mxu1 %vm2470_vm4, %v3501_v23  ;;  %v3010_v2 = vcombine.high %v2563_v28, %v2462_v37 }
 0x29f   : > { %3835 = vmatmul.mubr.f32.gmra.mrb[8].mxu1 %v3500_v12 }
 0x2a0   : > { %v3017_v41 = vrot.slane %v3009_v15, %v8938_v51  ;;  %v2197_v56 = vpop.permute.xlu1 %2196  ;;  %v3024_v12 = vrot.slane %v3010_v2, %v8938_v51 }
 0x2a1   : > { %v2348_v16 = vpop.permute.xlu0 %2347  ;;  %v2520_v61 = vsel %vm2503_vm5, %v2487_v11, %v2197_v56 }
 0x2a2   : > { %v2552_v50 = vsel %vm2536_vm6, %v2519_v47, %v2348_v16  ;;  %v3025_v31 = vcombine.high %v3017_v41, %v3017_v41  ;;  %v2445_v47 = vrot.slane %v7710_v29, 4  ;;  %v2463_v16 = vrot.slane %v7719_v33, 4 }
 0x2a3   : > { %v2841_v27 = vcombine.low %v2552_v50, %v2440_v58  ;;  %v3026_v56 = vcombine.high %v3024_v12, %v3024_v12 }
 0x2a4   : > { %v3503_v21 = vcombine.low %v3017_v41, %v3025_v31  ;;  %v2066_v62 = vpop.permute.xlu1 %2065  ;;  %v2465_v11 = vsel %vm2413_vm3, %v2463_v16, %v2464_v22 }
 0x2a5   : > { %v2848_v40 = vrot.slane %v2841_v27, %v8938_v51  ;;  %v2350_v4 = vpop.permute.xlu0 %2349  ;;  %v2498_v20 = vsel %vm2470_vm4, %v7477_v35, %v2066_v62  ;;  %v3520_v35 = vcombine.low %v3024_v12, %v3026_v56 }
 0x2a6   : > { %v2553_v32 = vsel %vm2536_vm6, %v2520_v61, %v2350_v4  ;;  %v3517_v26 = vrot.slane %v3503_v21, %v8938_v51 }
 0x2a7   : > { %v3341_v58 = vcombine.low %v2840_v36, %v2848_v40  ;;  %v2849_v24 = vcombine.low %v2553_v32, %v2444_v42  ;;  %v2850_v55 = vcombine.high %v2553_v32, %v2444_v42 }
 0x2a8   : > { %v3519_v14 = vcombine.high %v3510_v18, %v3517_v26  ;;  %v3518_v1 = vcombine.low %v3510_v18, %v3517_v26  ;;  %v2046_v46 = vpop.permute.xlu1 %2045 }
 0x2a9   : > { %v3355_v43 = vrot.slane %v3341_v58, %v8938_v51  ;;  %v2068_v48 = vpop.permute.xlu0 %2067  ;;  %v2857_v57 = vrot.slane %v2849_v24, %v8938_v51  ;;  %v2864_v34 = vrot.slane %v2850_v55, %v8938_v51  ;;  %v2488_v50 = vsel %vm2470_vm4, %v7575_v17, %v2046_v46 }
 0x2aa   : > { %5270 = vmatprep.mubr.msk.f32.mxu1 %vm2470_vm4, %v3519_v14  ;;  %v2499_v41 = vsel %vm2470_vm4, %v7719_v33, %v2068_v48  ;;  %v2446_v33 = vsel %vm2413_vm3, %v2443_v9, %v2445_v47  ;;  %v2466_v9 = vrot.slane %v7795_v45, 4  ;;  %v3528_v55 = vrot.slane %v3520_v35, %v8938_v51 }
 0x2ab   : > { %v3357_v63 = vcombine.high %v3348_v60, %v3355_v43  ;;  %v3356_v44 = vcombine.low %v3348_v60, %v3355_v43  ;;  %v2865_v59 = vcombine.high %v2857_v57, %v2857_v57  ;;  %v2866_v7 = vcombine.high %v2864_v34, %v2864_v34  ;;  %3840 = vmatmul.mubr.f32.gmra.mrb[10].mxu1 %v3518_v1 }
 0x2ad   : > { %5261 = vmatprep.mubr.msk.f32.mxu0 %vm2470_vm4, %v3357_v63  ;;  %v2219_v30 = vpop.permute.xlu0 %2218  ;;  %v3358_v0 = vcombine.low %v2857_v57, %v2865_v59  ;;  %v3359_v38 = vcombine.low %v2864_v34, %v2866_v7  ;;  %v2221_v8 = vpop.permute.xlu1 %2220  ;;  %v2467_v7 = vsel %vm2413_vm3, %v2464_v22, %v2466_v9 }
 0x2ae   : > { %3795 = vmatmul.mubr.f32.gmra.mrb[24].mxu0 %v3356_v44  ;;  %v2531_v15 = vsel %vm2503_vm5, %v2498_v20, %v2219_v30  ;;  %v2532_v25 = vsel %vm2503_vm5, %v2499_v41, %v2221_v8 }
 0x2af   : > { %v3366_v3 = vrot.slane %v3358_v0, %v8938_v51  ;;  %v3373_v23 = vrot.slane %v3359_v38, %v8938_v51 }
 0x2b1   : > { %v2199_v49 = vpop.permute.xlu0 %2198  ;;  %v2372_v37 = vpop.permute.xlu1 %2371  ;;  %v3375_v28 = vcombine.high %v3366_v3, %v3373_v23  ;;  %v3374_v10 = vcombine.low %v3366_v3, %v3373_v23 }
 0x2b2   : > { %v2564_v5 = vsel %vm2536_vm6, %v2531_v15, %v2372_v37  ;;  %v2521_v27 = vsel %vm2503_vm5, %v2488_v50, %v2199_v49  ;;  %v2448_v49 = vsel %vm2413_vm3, %v2445_v47, %v2447_v52 }
 0x2b3   : > { %5262 = vmatprep.mubr.msk.f32.mxu0 %vm2470_vm4, %v3375_v28  ;;  %v3027_v6 = vcombine.low %v2564_v5, %v2461_v53 }
 0x2b4   : > { %3800 = vmatmul.mubr.f32.gmra.mrb[26].mxu0 %v3374_v10  ;;  %v2468_v10 = vrot.slane %v7852_v54, 4 }
 0x2b5   : > { %v2374_v31 = vpop.permute.xlu0 %2373  ;;  %v2352_v36 = vpop.permute.xlu1 %2351  ;;  %v3034_v53 = vrot.slane %v3027_v6, %v8938_v51 }
 0x2b6   : > { %v2565_v19 = vsel %vm2536_vm6, %v2532_v25, %v2374_v31  ;;  %v2554_v21 = vsel %vm2536_vm6, %v2521_v27, %v2352_v36  ;;  %v2469_v27 = vsel %vm2413_vm3, %v2466_v9, %v2468_v10 }
 0x2b7   : > { %v3035_v61 = vcombine.low %v2565_v19, %v2465_v11  ;;  %v2867_v40 = vcombine.low %v2554_v21, %v2446_v33  ;;  %v2868_v4 = vcombine.high %v2554_v21, %v2446_v33  ;;  %v3036_v60 = vcombine.high %v2565_v19, %v2465_v11 }
 0x2b9   : > { %v3043_v62 = vrot.slane %v3035_v61, %v8938_v51  ;;  %v2070_v32 = vpop.permute.xlu0 %2069  ;;  %v2875_v18 = vrot.slane %v2867_v40, %v8938_v51  ;;  %v2882_v26 = vrot.slane %v2868_v4, %v8938_v51  ;;  %v2048_v58 = vpop.permute.xlu1 %2047  ;;  %v3050_v2 = vrot.slane %v3036_v60, %v8938_v51 }
 0x2ba   : > { %v2500_v59 = vsel %vm2470_vm4, %v7705_v13, %v2070_v32  ;;  %v2489_v0 = vsel %vm2470_vm4, %v7710_v29, %v2048_v58 }
 0x2bb   : > { %v3521_v42 = vcombine.low %v3034_v53, %v3043_v62  ;;  %v2883_v17 = vcombine.high %v2875_v18, %v2875_v18  ;;  %v2884_v24 = vcombine.high %v2882_v26, %v2882_v26  ;;  %v3051_v30 = vcombine.high %v3043_v62, %v3043_v62 }
 0x2bc   : > { %v3052_v22 = vcombine.high %v3050_v2, %v3050_v2 }
 0x2bd   : > { %v3535_v43 = vrot.slane %v3521_v42, %v8938_v51  ;;  %v2223_v48 = vpop.permute.xlu0 %2222  ;;  %v3376_v14 = vcombine.low %v2875_v18, %v2883_v17  ;;  %v3377_v1 = vcombine.low %v2882_v26, %v2884_v24  ;;  %v2201_v57 = vpop.permute.xlu1 %2200  ;;  %v3538_v56 = vcombine.low %v3051_v30, %v3050_v2 }
 0x2be   : > { %v2533_v38 = vsel %vm2503_vm5, %v2500_v59, %v2223_v48  ;;  %v2522_v3 = vsel %vm2503_vm5, %v2489_v0, %v2201_v57 }
 0x2bf   : > { %v3537_v34 = vcombine.high %v3528_v55, %v3535_v43  ;;  %v3536_v46 = vcombine.low %v3528_v55, %v3535_v43  ;;  %v3384_v63 = vrot.slane %v3376_v14, %v8938_v51  ;;  %v3391_v44 = vrot.slane %v3377_v1, %v8938_v51 }
 0x2c0   : > { %v3546_v61 = vrot.slane %v3538_v56, %v8938_v51 }
 0x2c1   : > { %5271 = vmatprep.mubr.msk.f32.mxu1 %vm2470_vm4, %v3537_v34  ;;  %v2376_v8 = vpop.permute.xlu0 %2375  ;;  %v2354_v23 = vpop.permute.xlu1 %2353  ;;  %v3393_v13 = vcombine.high %v3384_v63, %v3391_v44  ;;  %v3392_v20 = vcombine.low %v3384_v63, %v3391_v44 }
 0x2c2   : > { %v2566_v12 = vsel %vm2536_vm6, %v2533_v38, %v2376_v8  ;;  %3845 = vmatmul.mubr.f32.gmra.mrb[12].mxu1 %v3536_v46  ;;  %v2555_v15 = vsel %vm2536_vm6, %v2522_v3, %v2354_v23 }
 0x2c3   : > { %v3053_v29 = vcombine.low %v2566_v12, %v2467_v7  ;;  %v2885_v37 = vcombine.low %v2555_v15, %v2448_v49  ;;  %v2886_v28 = vcombine.high %v2555_v15, %v2448_v49  ;;  %5263 = vmatprep.mubr.msk.f32.mxu0 %vm2470_vm4, %v3393_v13  ;;  %v3054_v5 = vcombine.high %v2566_v12, %v2467_v7  ;;  %v8170_v13 = vld [vmem:[%s8438_s5] ss:$0 sm:$0xff] }
 0x2c4   : > { %3805 = vmatmul.mubr.f32.gmra.mrb[28].mxu0 %v3392_v20 }
 0x2c5   : > { %v3061_v41 = vrot.slane %v3053_v29, %v8938_v51  ;;  %v2072_v16 = vpop.permute.xlu0 %2071  ;;  %v2893_v39 = vrot.slane %v2885_v37, %v8938_v51  ;;  %v2900_v52 = vrot.slane %v2886_v28, %v8938_v51  ;;  %v2225_v47 = vpop.permute.xlu1 %2224  ;;  %v3068_v36 = vrot.slane %v3054_v5, %v8938_v51 }
 0x2c6   : > { %v2501_v50 = vsel %vm2470_vm4, %v7795_v45, %v2072_v16 }
 0x2c7   : > { %v3539_v25 = vcombine.low %v3052_v22, %v3061_v41  ;;  %v2901_v6 = vcombine.high %v2893_v39, %v2893_v39  ;;  %v2902_v31 = vcombine.high %v2900_v52, %v2900_v52  ;;  %v3069_v11 = vcombine.high %v3061_v41, %v3061_v41 }
 0x2c8   : > { %v2534_v33 = vsel %vm2503_vm5, %v2501_v50, %v2225_v47  ;;  %v3070_v42 = vcombine.high %v3068_v36, %v3068_v36 }
 0x2c9   : > { %v3553_v19 = vrot.slane %v3539_v25, %v8938_v51  ;;  %v2378_v21 = vpop.permute.xlu0 %2377  ;;  %v3394_v40 = vcombine.low %v2893_v39, %v2901_v6  ;;  %v3395_v4 = vcombine.low %v2900_v52, %v2902_v31  ;;  %v2074_v35 = vpop.permute.xlu1 %2073  ;;  %v3556_v17 = vcombine.low %v3069_v11, %v3068_v36 }
 0x2ca   : > { %v2567_v45 = vsel %vm2536_vm6, %v2534_v33, %v2378_v21  ;;  %v2502_v24 = vsel %vm2470_vm4, %v7852_v54, %v2074_v35 }
 0x2cb   : > { %v3071_v53 = vcombine.low %v2567_v45, %v2469_v27  ;;  %v3072_v62 = vcombine.high %v2567_v45, %v2469_v27  ;;  %v3402_v32 = vrot.slane %v3394_v40, %v8938_v51  ;;  %v3409_v18 = vrot.slane %v3395_v4, %v8938_v51 }
 0x2cc   : > { %v3555_v26 = vcombine.high %v3546_v61, %v3553_v19  ;;  %v3554_v58 = vcombine.low %v3546_v61, %v3553_v19  ;;  %v3564_v54 = vrot.slane %v3556_v17, %v8938_v51 }
 0x2cd   : > { %v3079_v9 = vrot.slane %v3071_v53, %v8938_v51  ;;  %v2227_v55 = vpop.permute.xlu0 %2226  ;;  %v3086_v60 = vrot.slane %v3072_v62, %v8938_v51  ;;  %v2380_v43 = vpop.permute.xlu1 %2379  ;;  %v3411_v14 = vcombine.high %v3402_v32, %v3409_v18  ;;  %v3410_v1 = vcombine.low %v3402_v32, %v3409_v18 }
 0x2ce   : > { %5272 = vmatprep.mubr.msk.f32.mxu1 %vm2470_vm4, %v3555_v26  ;;  %v2535_v48 = vsel %vm2503_vm5, %v2502_v24, %v2227_v55 }
 0x2cf   : > { %v3087_v57 = vcombine.high %v3079_v9, %v3079_v9  ;;  %v3557_v34 = vcombine.low %v3070_v42, %v3079_v9  ;;  %v2568_v46 = vsel %vm2536_vm6, %v2535_v48, %v2380_v43  ;;  %3850 = vmatmul.mubr.f32.gmra.mrb[14].mxu1 %v3554_v58  ;;  %5264 = vmatprep.mubr.msk.f32.mxu0 %vm2470_vm4, %v3411_v14 }
 0x2d0   : > { %v3089_v63 = vcombine.low %v2568_v46, %v2468_v10  ;;  %3810 = vmatmul.mubr.f32.gmra.mrb[30].mxu0 %v3410_v1  ;;  %v3088_v59 = vcombine.high %v3086_v60, %v3086_v60 }
 0x2d1   : > { %v3571_v44 = vrot.slane %v3557_v34, %v8938_v51  ;;  %v3574_v7 = vcombine.low %v3087_v57, %v3086_v60 }
 0x2d2   : > { %v3096_v2 = vrot.slane %v3089_v63, %v8938_v51 }
 0x2d3   : > { %v3573_v30 = vcombine.high %v3564_v54, %v3571_v44  ;;  %v3572_v0 = vcombine.low %v3564_v54, %v3571_v44  ;;  %v3582_v8 = vrot.slane %v3574_v7, %v8938_v51 }
 0x2d4   : > { %v3575_v38 = vcombine.low %v3088_v59, %v3096_v2 }
 0x2d5   : > { %5273 = vmatprep.mubr.msk.f32.mxu1 %vm2470_vm4, %v3573_v30 }
 0x2d6   : > { %3855 = vmatmul.mubr.f32.gmra.mrb[16].mxu1 %v3572_v0  ;;  %v3589_v3 = vrot.slane %v3575_v38, %v8938_v51 }
 0x2d8   : > { %v3591_v23 = vcombine.high %v3582_v8, %v3589_v3  ;;  %v3590_v12 = vcombine.low %v3582_v8, %v3589_v3 }
 0x2da   : > { %5274 = vmatprep.mubr.msk.f32.mxu1 %vm2470_vm4, %v3591_v23 }
 0x2db   : > { %3860 = vmatmul.mubr.f32.gmra.mrb[18].mxu1 %v3590_v12 }
 0x2f4   : > { %v3736_v20 = vpop.f32.mrb[0].mxu0 }
 0x2f5   : > { %v3737_v49 = vadd.f32 %v8170_v13, %v3736_v20  ;;  %v3738_v15 = vpop.f32.mrb[1].mxu0 }
 0x2f7   : > { %v3865_v29 = vmax.f32 %v3737_v49, 0.0 }
 0x2f9   : > { %v3917_v28 = vcombine.high %v3865_v29, %v3865_v29  ;;  %v3924_v10 = vrot.slane %v3865_v29, %v8938_v51 }
 0x2fa   : > { %v3741_v37 = vpop.f32.mrb[2].mxu0 }
 0x2fb   : > { %v3742_v22 = vadd.f32 %v8170_v13, %v3741_v37  ;;  %v3743_v5 = vpop.f32.mrb[3].mxu0  ;;  %v3931_v41 = vrot.slane %v3917_v28, %v8938_v51  ;;  %v3932_v16 = vcombine.high %v3924_v10, %v3924_v10 }
 0x2fd   : > { %v3866_v56 = vmax.f32 %v3742_v22, 0.0  ;;  %v3933_v39 = vcombine.high %v3931_v41, %v3931_v41  ;;  %v4359_v50 = vcombine.low %v3924_v10, %v3932_v16 }
 0x2ff   : > { %v3934_v52 = vcombine.high %v3866_v56, %v3866_v56  ;;  %v3941_v47 = vrot.slane %v3866_v56, %v8938_v51  ;;  %v4360_v25 = vcombine.low %v3931_v41, %v3933_v39  ;;  %v4367_v40 = vrot.slane %v4359_v50, %v8938_v51 }
 0x301   : > { %v3948_v6 = vrot.slane %v3934_v52, %v8938_v51  ;;  %v3949_v31 = vcombine.high %v3941_v47, %v3941_v47  ;;  %v3746_v27 = vpop.f32.mrb[4].mxu0  ;;  %v4374_v19 = vrot.slane %v4360_v25, %v8938_v51 }
 0x302   : > { %v3747_v36 = vadd.f32 %v8170_v13, %v3746_v27  ;;  %v3748_v11 = vpop.f32.mrb[5].mxu0 }
 0x303   : > { %v3950_v33 = vcombine.high %v3948_v6, %v3948_v6  ;;  %v4376_v21 = vcombine.low %v3941_v47, %v3949_v31  ;;  %v4375_v53 = vcombine.low %v4367_v40, %v4374_v19 }
 0x304   : > { %v3867_v61 = vmax.f32 %v3747_v36, 0.0 }
 0x305   : > { %v4377_v4 = vcombine.low %v3948_v6, %v3950_v33  ;;  %v4384_v62 = vrot.slane %v4376_v21, %v8938_v51  ;;  %v4855_v24 = vsel %vm2503_vm5, %v4375_v53, 0.0 }
 0x306   : > { %v3951_v35 = vcombine.high %v3867_v61, %v3867_v61  ;;  %v3958_v45 = vrot.slane %v3867_v61, %v8938_v51 }
 0x307   : > { %v4391_v32 = vrot.slane %v4377_v4, %v8938_v51 }
 0x308   : > { %v3965_v18 = vrot.slane %v3951_v35, %v8938_v51  ;;  %v3966_v26 = vcombine.high %v3958_v45, %v3958_v45 }
 0x309   : > { %v4392_v58 = vcombine.low %v4384_v62, %v4391_v32 }
 0x30a   : > { %v3967_v42 = vcombine.high %v3965_v18, %v3965_v18  ;;  %v4393_v17 = vcombine.low %v3958_v45, %v3966_v26 }
 0x30b   : > { %v4856_v9 = vsel %vm2503_vm5, %v4392_v58, 0.0 }
 0x30c   : > { %v4394_v60 = vcombine.low %v3965_v18, %v3967_v42  ;;  %v4857_v48 = vadd.f32 %v4856_v9, %v4855_v24  ;;  %v4401_v1 = vrot.slane %v4393_v17, %v8938_v51 }
 0x30d   : > { %v3751_v55 = vpop.f32.mrb[6].mxu0 }
 0x30e   : > { %v3752_v43 = vadd.f32 %v8170_v13, %v3751_v55  ;;  %v3753_v14 = vpop.f32.mrb[7].mxu0  ;;  %v4408_v57 = vrot.slane %v4394_v60, %v8938_v51 }
 0x310   : > { %v3868_v34 = vmax.f32 %v3752_v43, 0.0  ;;  %v4409_v46 = vcombine.low %v4401_v1, %v4408_v57 }
 0x312   : > { %v3968_v63 = vcombine.high %v3868_v34, %v3868_v34  ;;  %v3975_v54 = vrot.slane %v3868_v34, %v8938_v51  ;;  %v4858_v59 = vsel %vm2503_vm5, %v4409_v46, 0.0 }
 0x313   : > { %v4859_v0 = vadd.f32 %v4858_v59, %v4857_v48 }
 0x314   : > { %v4416_v44 = vrot.slane %v3975_v54, %v8938_v51  ;;  %v3756_v7 = vpop.f32.mrb[8].mxu0  ;;  %v3982_v2 = vrot.slane %v3968_v63, %v8938_v51  ;;  %v3983_v30 = vcombine.high %v3975_v54, %v3975_v54 }
 0x315   : > { %v3757_v38 = vadd.f32 %v8170_v13, %v3756_v7  ;;  %v3758_v8 = vpop.f32.mrb[9].mxu0 }
 0x316   : > { %v4861_v3 = vsel %vm4860_vm7, %v4416_v44, 0.0  ;;  %v4417_v20 = vcombine.low %v3983_v30, %v3982_v2  ;;  %v3984_v49 = vcombine.high %v3982_v2, %v3982_v2 }
 0x317   : > { %v4862_v23 = vadd.f32 %v4861_v3, %v4859_v0  ;;  %v3869_v12 = vmax.f32 %v3757_v38, 0.0 }
 0x318   : > { %v4425_v16 = vrot.slane %v4417_v20, %v8938_v51 }
 0x319   : > { %v3985_v15 = vcombine.high %v3869_v12, %v3869_v12  ;;  %v3992_v29 = vrot.slane %v3869_v12, %v8938_v51  ;;  %v4863_v58 = vrot.slane %v4862_v23, 4 }
 0x31b   : > { %v4418_v37 = vcombine.low %v3984_v49, %v3992_v29  ;;  %v3761_v28 = vpop.f32.mrb[10].mxu0  ;;  %v3999_v10 = vrot.slane %v3985_v15, %v8938_v51  ;;  %v4000_v22 = vcombine.high %v3992_v29, %v3992_v29  ;;  %v4864_v60 = vadd.f32 %v4863_v58, %v4862_v23 }
 0x31c   : > { %v3762_v5 = vadd.f32 %v8170_v13, %v3761_v28  ;;  %v3763_v41 = vpop.f32.mrb[11].mxu0 }
 0x31d   : > { %v4432_v56 = vrot.slane %v4418_v37, %v8938_v51  ;;  %v4434_v47 = vcombine.low %v4000_v22, %v3999_v10  ;;  %v4001_v50 = vcombine.high %v3999_v10, %v3999_v10  ;;  %v4865_v54 = vrot.slane %v4864_v60, 2 }
 0x31e   : > { %v3870_v39 = vmax.f32 %v3762_v5, 0.0 }
 0x31f   : > { %v4433_v52 = vcombine.low %v4425_v16, %v4432_v56  ;;  %v4442_v27 = vrot.slane %v4434_v47, %v8938_v51  ;;  %v4866_v38 = vadd.f32 %v4865_v54, %v4864_v60  ;;  %v4973_v60 = vld [vmem:[%s8439_s6 + $0x20] sm:$0xff]  ;;  %v4975_v54 = vld [vmem:[%s8439_s6 + $0x30] sm:$0xff] }
 0x320   : > { %v4009_v25 = vrot.slane %v3870_v39, %v8938_v51  ;;  %v4002_v6 = vcombine.high %v3870_v39, %v3870_v39 }
 0x321   : > { %v4869_v4 = vsel %vm2503_vm5, %v4433_v52, 0.0  ;;  %v4867_v49 = vrot.slane %v4866_v38, 1 }
 0x322   : > { %v4435_v31 = vcombine.low %v4001_v50, %v4009_v25  ;;  %v4016_v19 = vrot.slane %v4002_v6, %v8938_v51  ;;  %v4017_v33 = vcombine.high %v4009_v25, %v4009_v25 }
 0x323   : > { %v4868_v22 = vadd.f32 %v4867_v49, %v4866_v38 }
 0x324   : > { %v4449_v36 = vrot.slane %v4435_v31, %v8938_v51  ;;  %v4451_v62 = vcombine.low %v4017_v33, %v4016_v19  ;;  %v4018_v32 = vcombine.high %v4016_v19, %v4016_v19 }
 0x325   : > { %v3766_v11 = vpop.f32.mrb[12].mxu0  ;;  %v4961_v47 = vmul.f32 0.03846154, %v4868_v22 }
 0x326   : > { %v4450_v21 = vcombine.low %v4442_v27, %v4449_v36  ;;  %v3767_v61 = vadd.f32 %v8170_v13, %v3766_v11  ;;  %v3768_v40 = vpop.f32.mrb[13].mxu0  ;;  %v4459_v24 = vrot.slane %v4451_v62, %v8938_v51 }
 0x328   : > { %v4870_v35 = vsel %vm2503_vm5, %v4450_v21, 0.0  ;;  %v3871_v45 = vmax.f32 %v3767_v61, 0.0 }
 0x329   : > { %v4871_v53 = vadd.f32 %v4870_v35, %v4869_v4  ;;  %v4969_v4 = vld [vmem:[%s8439_s6] sm:$0xff]  ;;  %v4970_v35 = vld [vmem:[%s8439_s6 + $0x8] sm:$0xff] }
 0x32a   : > { %v4019_v18 = vcombine.high %v3871_v45, %v3871_v45  ;;  %v4026_v26 = vrot.slane %v3871_v45, %v8938_v51 }
 0x32c   : > { %v4034_v42 = vcombine.high %v4026_v26, %v4026_v26  ;;  %v4452_v17 = vcombine.low %v4018_v32, %v4026_v26  ;;  %v4033_v9 = vrot.slane %v4019_v18, %v8938_v51  ;;  %v5369_v32 = vpack.c.bf16 %v4970_v35, %v4969_v4  ;;  %v4971_v18 = vld [vmem:[%s8439_s6 + $0x10] sm:$0xff]  ;;  %v4972_v26 = vld [vmem:[%s8439_s6 + $0x18] sm:$0xff] }
 0x32d   : > { %v3771_v43 = vpop.f32.mrb[14].mxu0 }
 0x32e   : > { %v4466_v55 = vrot.slane %v4452_v17, %v8938_v51  ;;  %v4474_v14 = vrot.slane %v4034_v42, %v8938_v51  ;;  %v3772_v1 = vadd.f32 %v8170_v13, %v3771_v43  ;;  %v3773_v57 = vpop.f32.mrb[15].mxu0  ;;  %v4035_v34 = vcombine.high %v4033_v9, %v4033_v9  ;;  %5370 = vmatpush3.bf16.msra.mxu1 %v5369_v32  ;;  %v4974_v43 = vld [vmem:[%s8439_s6 + $0x28] sm:$0xff] }
 0x330   : > { %v4467_v48 = vcombine.low %v4459_v24, %v4466_v55  ;;  %v3872_v63 = vmax.f32 %v3772_v1, 0.0  ;;  %v4874_v59 = vsel %vm4860_vm7, %v4474_v14, 0.0  ;;  %v4475_v30 = vcombine.low %v4033_v9, %v4035_v34 }
 0x331   : > { %v8977_v9 = vmov 0.0|0.0   ;;  %v5372_v55 = vpack.c.bf16 %v4972_v26, %v4971_v18  ;;  %v5375_v34 = vpack.c.bf16 %v4974_v43, %v4973_v60 }
 0x332   : > { %v4872_v46 = vsel %vm2503_vm5, %v4467_v48, 0.0  ;;  %v4043_v7 = vrot.slane %v3872_v63, %v8938_v51  ;;  %v4483_v12 = vrot.slane %v4475_v30, %v8938_v51  ;;  %v4036_v28 = vcombine.high %v3872_v63, %v3872_v63  ;;  %5371 = vmatprep.subr.bf16.mxu1 %v8977_v9 }
 0x333   : > { %v4873_v44 = vadd.f32 %v4872_v46, %v4871_v53  ;;  %5373 = vmatpush3.bf16.msra.mxu1 %v5372_v55 }
 0x334   : > { %v4051_v0 = vcombine.high %v4043_v7, %v4043_v7  ;;  %v4050_v52 = vrot.slane %v4036_v28, %v8938_v51  ;;  %5374 = vmatprep.subr.bf16.mxu1 %v8977_v9 }
 0x335   : > { %v4875_v2 = vadd.f32 %v4874_v59, %v4873_v44  ;;  %v4976_v44 = vld [vmem:[%s8439_s6 + $0x38] sm:$0xff]  ;;  %v5447_v59 = vmov 0.0  }
 0x336   : > { %v4476_v3 = vcombine.low %v4043_v7, %v4051_v0  ;;  %v4052_v45 = vcombine.high %v4050_v52, %v4050_v52  ;;  %5316 = vmatprep.mubr.msk.f32.mxu1 %vm5446_vm9, %v5447_v59 }
 0x337   : > { %v4876_v8 = vrot.slane %v4875_v2, 4  ;;  %5376 = vmatpush3.bf16.msra.mxu1 %v5375_v34 }
 0x338   : > { %v4490_v20 = vrot.slane %v4476_v3, %v8938_v51  ;;  %v4492_v48 = vcombine.low %v4050_v52, %v4052_v45  ;;  %5377 = vmatprep.subr.bf16.mxu1 %v8977_v9 }
 0x339   : > { %v4877_v23 = vadd.f32 %v4876_v8, %v4875_v2  ;;  %v3816_v10 = vpop.f32.mrb[0].mxu1  ;;  %v5378_v8 = vpack.c.bf16 %v4976_v44, %v4975_v54 }
 0x33a   : > { %v8219_v29 = vcombine.low %v4483_v12, %v4490_v20  ;;  %v3817_v41 = vadd.f32 %v8170_v13, %v3816_v10  ;;  %v3818_v16 = vpop.f32.mrb[1].mxu1  ;;  %v4500_v7 = vrot.slane %v4492_v48, %v8938_v51 }
 0x33b   : > { %v4878_v15 = vrot.slane %v4877_v23, 2  ;;  %5379 = vmatpush3.bf16.msra.mxu1 %v5378_v8 }
 0x33c   : > { %v3881_v39 = vmax.f32 %v3817_v41, 0.0  ;;  %5380 = vmatprep.subr.bf16.mxu1 %v8977_v9 }
 0x33d   : > { %v4879_v37 = vadd.f32 %v4878_v15, %v4877_v23  ;;  %v4882_v23 = vsel %vm2503_vm5, %v8219_v29, 0.0 }
 0x33e   : > { %v4189_v25 = vcombine.high %v3881_v39, %v3881_v39  ;;  %v8224_v6 = vrot.slane %v3881_v39, %v8938_v51 }
 0x33f   : > { %v4880_v5 = vrot.slane %v4879_v37, 1  ;;  %v3776_v31 = vpop.f32.mrb[16].mxu0 }
 0x340   : > { %v3777_v36 = vadd.f32 %v8170_v13, %v3776_v31  ;;  %v3778_v19 = vpop.f32.mrb[17].mxu0  ;;  %v4203_v61 = vrot.slane %v4189_v25, %v8938_v51  ;;  %v4204_v40 = vcombine.high %v8224_v6, %v8224_v6 }
 0x341   : > { %v4881_v56 = vadd.f32 %v4880_v5, %v4879_v37  ;;  %v3821_v27 = vpop.f32.mrb[2].mxu1 }
 0x342   : > { %v3822_v11 = vadd.f32 %v8170_v13, %v3821_v27  ;;  %v3823_v33 = vpop.f32.mrb[3].mxu1  ;;  %v3873_v53 = vmax.f32 %v3777_v36, 0.0  ;;  %v4649_v17 = vcombine.low %v4204_v40, %v4203_v61  ;;  %v4205_v24 = vcombine.high %v4203_v61, %v4203_v61 }
 0x343   : > { %v4962_v50 = vmul.f32 0.03846154, %v4881_v56 }
 0x344   : > { %v3882_v62 = vmax.f32 %v3822_v11, 0.0  ;;  %v4060_v58 = vrot.slane %v3873_v53, %v8938_v51  ;;  %v4657_v46 = vrot.slane %v4649_v17, %v8938_v51  ;;  %v4053_v3 = vcombine.high %v3873_v53, %v3873_v53 }
 0x345   : > { %v8228_v21 = vsel %vm4992_vm8, %v4962_v50, %v4961_v47 }
 0x346   : > { %v4213_v42 = vrot.slane %v3882_v62, %v8938_v51  ;;  %v4068_v14 = vcombine.high %v4060_v58, %v4060_v58  ;;  %v4206_v38 = vcombine.high %v3882_v62, %v3882_v62  ;;  %v4067_v22 = vrot.slane %v4053_v3, %v8938_v51 }
 0x348   : > { %v4650_v1 = vcombine.low %v4205_v24, %v4213_v42  ;;  %v4493_v57 = vcombine.low %v4060_v58, %v4068_v14  ;;  %v4220_v15 = vrot.slane %v4206_v38, %v8938_v51  ;;  %v4221_v37 = vcombine.high %v4213_v42, %v4213_v42 }
 0x349   : > { %v4069_v50 = vcombine.high %v4067_v22, %v4067_v22 }
 0x34a   : > { %v4664_v63 = vrot.slane %v4650_v1, %v8938_v51  ;;  %v4507_v2 = vrot.slane %v4493_v57, %v8938_v51  ;;  %v4666_v56 = vcombine.low %v4221_v37, %v4220_v15  ;;  %v4222_v39 = vcombine.high %v4220_v15, %v4220_v15 }
 0x34b   : > { %v4509_v19 = vcombine.low %v4067_v22, %v4069_v50 }
 0x34c   : > { %v4665_v30 = vcombine.low %v4657_v46, %v4664_v63  ;;  %v4508_v0 = vcombine.low %v4500_v7, %v4507_v2  ;;  %v4674_v36 = vrot.slane %v4666_v56, %v8938_v51 }
 0x34d   : > { %v4517_v53 = vrot.slane %v4509_v19, %v8938_v51 }
 0x34e   : > { %v4883_v12 = vsel %vm2503_vm5, %v4508_v0, 0.0  ;;  %v4921_v35 = vsel %vm2503_vm5, %v4665_v30, 0.0 }
 0x34f   : > { %v4884_v20 = vadd.f32 %v4883_v12, %v4882_v23 }
 0x350   : > { %v3826_v49 = vpop.f32.mrb[4].mxu1 }
 0x351   : > { %v3827_v28 = vadd.f32 %v8170_v13, %v3826_v49  ;;  %v3828_v10 = vpop.f32.mrb[5].mxu1 }
 0x352   : > { %v3781_v5 = vpop.f32.mrb[18].mxu0 }
 0x353   : > { %v3883_v41 = vmax.f32 %v3827_v28, 0.0  ;;  %v3782_v16 = vadd.f32 %v8170_v13, %v3781_v5  ;;  %v3783_v29 = vpop.f32.mrb[19].mxu0 }
 0x355   : > { %v4230_v52 = vrot.slane %v3883_v41, %v8938_v51  ;;  %v3874_v47 = vmax.f32 %v3782_v16, 0.0  ;;  %v4223_v42 = vcombine.high %v3883_v41, %v3883_v41 }
 0x357   : > { %v4667_v25 = vcombine.low %v4222_v39, %v4230_v52  ;;  %v4070_v31 = vcombine.high %v3874_v47, %v3874_v47  ;;  %v4077_v27 = vrot.slane %v3874_v47, %v8938_v51  ;;  %v4237_v1 = vrot.slane %v4223_v42, %v8938_v51 }
 0x358   : > { %v4238_v57 = vcombine.high %v4230_v52, %v4230_v52 }
 0x359   : > { %v4681_v11 = vrot.slane %v4667_v25, %v8938_v51  ;;  %v4085_v33 = vcombine.high %v4077_v27, %v4077_v27  ;;  %v4084_v40 = vrot.slane %v4070_v31, %v8938_v51  ;;  %v4239_v49 = vcombine.high %v4237_v1, %v4237_v1 }
 0x35a   : > { %v4683_v23 = vcombine.low %v4238_v57, %v4237_v1 }
 0x35b   : > { %v4682_v61 = vcombine.low %v4674_v36, %v4681_v11  ;;  %v4510_v4 = vcombine.low %v4077_v27, %v4085_v33  ;;  %v4532_v26 = vrot.slane %v4084_v40, %v8938_v51  ;;  %v4086_v63 = vcombine.high %v4084_v40, %v4084_v40 }
 0x35c   : > { %v4691_v52 = vrot.slane %v4683_v23, %v8938_v51 }
 0x35d   : > { %v4922_v45 = vsel %vm2503_vm5, %v4682_v61, 0.0  ;;  %v4524_v32 = vrot.slane %v4510_v4, %v8938_v51  ;;  %v4887_v55 = vsel %vm4860_vm7, %v4532_v26, 0.0 }
 0x35e   : > { %v4923_v62 = vadd.f32 %v4922_v45, %v4921_v35 }
 0x35f   : > { %v4525_v18 = vcombine.low %v4517_v53, %v4524_v32 }
 0x361   : > { %v4885_v58 = vsel %vm2503_vm5, %v4525_v18, 0.0 }
 0x362   : > { %v4886_v17 = vadd.f32 %v4885_v58, %v4884_v20 }
 0x363   : > { %v3786_v24 = vpop.f32.mrb[20].mxu0 }
 0x364   : > { %v3787_v60 = vadd.f32 %v8170_v13, %v3786_v24  ;;  %v3788_v43 = vpop.f32.mrb[21].mxu0  ;;  %v4888_v48 = vadd.f32 %v4887_v55, %v4886_v17 }
 0x366   : > { %v3875_v14 = vmax.f32 %v3787_v60, 0.0  ;;  %v4889_v34 = vrot.slane %v4888_v48, 4 }
 0x368   : > { %v3831_v46 = vpop.f32.mrb[6].mxu1  ;;  %v4087_v54 = vcombine.high %v3875_v14, %v3875_v14  ;;  %v4094_v44 = vrot.slane %v3875_v14, %v8938_v51  ;;  %v4890_v30 = vadd.f32 %v4889_v34, %v4888_v48 }
 0x369   : > { %v3832_v7 = vadd.f32 %v8170_v13, %v3831_v46  ;;  %v3833_v2 = vpop.f32.mrb[7].mxu1 }
 0x36a   : > { %v4101_v0 = vrot.slane %v4087_v54, %v8938_v51  ;;  %v4102_v38 = vcombine.high %v4094_v44, %v4094_v44  ;;  %v4533_v8 = vcombine.low %v4086_v63, %v4094_v44  ;;  %v4891_v12 = vrot.slane %v4890_v30, 2 }
 0x36b   : > { %v3884_v3 = vmax.f32 %v3832_v7, 0.0 }
 0x36c   : > { %v4534_v20 = vcombine.low %v4102_v38, %v4101_v0  ;;  %v4892_v28 = vadd.f32 %v4891_v12, %v4890_v30  ;;  %v4541_v10 = vrot.slane %v4533_v8, %v8938_v51  ;;  %v4103_v40 = vcombine.high %v4101_v0, %v4101_v0 }
 0x36d   : > { %v4240_v15 = vcombine.high %v3884_v3, %v3884_v3  ;;  %v4247_v37 = vrot.slane %v3884_v3, %v8938_v51 }
 0x36e   : > { %v4548_v22 = vrot.slane %v4534_v20, %v8938_v51  ;;  %v4893_v29 = vrot.slane %v4892_v28, 1 }
 0x36f   : > { %v4255_v5 = vcombine.high %v4247_v37, %v4247_v37  ;;  %v4684_v41 = vcombine.low %v4239_v49, %v4247_v37  ;;  %v3791_v16 = vpop.f32.mrb[22].mxu0  ;;  %v4254_v50 = vrot.slane %v4240_v15, %v8938_v51 }
 0x370   : > { %v3792_v56 = vadd.f32 %v8170_v13, %v3791_v16  ;;  %v3793_v39 = vpop.f32.mrb[23].mxu0  ;;  %v4549_v47 = vcombine.low %v4541_v10, %v4548_v22  ;;  %v4894_v27 = vadd.f32 %v4893_v29, %v4892_v28 }
 0x371   : > { %v4698_v25 = vrot.slane %v4684_v41, %v8938_v51  ;;  %v4706_v61 = vrot.slane %v4255_v5, %v8938_v51  ;;  %v4256_v32 = vcombine.high %v4254_v50, %v4254_v50 }
 0x372   : > { %v3836_v31 = vpop.f32.mrb[8].mxu1  ;;  %v3876_v36 = vmax.f32 %v3792_v56, 0.0  ;;  %v4963_v4 = vmul.f32 0.03846154, %v4894_v27  ;;  %v4895_v2 = vsel %vm2503_vm5, %v4549_v47, 0.0 }
 0x373   : > { %v3837_v11 = vadd.f32 %v8170_v13, %v3836_v31  ;;  %v3838_v19 = vpop.f32.mrb[9].mxu1  ;;  %v4699_v33 = vcombine.low %v4691_v52, %v4698_v25  ;;  %v4926_v24 = vsel %vm4860_vm7, %v4706_v61, 0.0  ;;  %v4707_v1 = vcombine.low %v4254_v50, %v4256_v32 }
 0x374   : > { %v4104_v35 = vcombine.high %v3876_v36, %v3876_v36  ;;  %v4111_v45 = vrot.slane %v3876_v36, %v8938_v51  ;;  %v8308_v60 = vsel %vm4994_vm10, %v4963_v4, %v8228_v21 }
 0x375   : > { %v3885_v53 = vmax.f32 %v3837_v11, 0.0  ;;  %v4924_v18 = vsel %vm2503_vm5, %v4699_v33, 0.0  ;;  %v4715_v44 = vrot.slane %v4707_v1, %v8938_v51 }
 0x376   : > { %v4925_v26 = vadd.f32 %v4924_v18, %v4923_v62  ;;  %v4118_v58 = vrot.slane %v4104_v35, %v8938_v51  ;;  %v4119_v42 = vcombine.high %v4111_v45, %v4111_v45  ;;  %v4550_v17 = vcombine.low %v4103_v40, %v4111_v45 }
 0x377   : > { %v4264_v55 = vrot.slane %v3885_v53, %v8938_v51  ;;  %v4257_v14 = vcombine.high %v3885_v53, %v3885_v53 }
 0x378   : > { %v8310_v43 = vadd.f32 %v4926_v24, %v4925_v26  ;;  %v4551_v48 = vcombine.low %v4119_v42, %v4118_v58  ;;  %v4558_v34 = vrot.slane %v4550_v17, %v8938_v51  ;;  %v4120_v41 = vcombine.high %v4118_v58, %v4118_v58 }
 0x379   : > { %v4272_v57 = vcombine.high %v4264_v55, %v4264_v55  ;;  %v4271_v54 = vrot.slane %v4257_v14, %v8938_v51 }
 0x37a   : > { %v4565_v62 = vrot.slane %v4551_v48, %v8938_v51 }
 0x37b   : > { %v4708_v46 = vcombine.low %v4264_v55, %v4272_v57  ;;  %v4273_v12 = vcombine.high %v4271_v54, %v4271_v54 }
 0x37c   : > { %v4566_v63 = vcombine.low %v4558_v34, %v4565_v62 }
 0x37d   : > { %v4722_v7 = vrot.slane %v4708_v46, %v8938_v51  ;;  %v4724_v10 = vcombine.low %v4271_v54, %v4273_v12 }
 0x37e   : > { %v3841_v21 = vpop.f32.mrb[10].mxu1  ;;  %v4896_v30 = vsel %vm2503_vm5, %v4566_v63, 0.0 }
 0x37f   : > { %v3842_v0 = vadd.f32 %v8170_v13, %v3841_v21  ;;  %v3843_v38 = vpop.f32.mrb[11].mxu1  ;;  %v4897_v8 = vadd.f32 %v4896_v30, %v4895_v2  ;;  %v4723_v3 = vcombine.low %v4715_v44, %v4722_v7  ;;  %v4732_v31 = vrot.slane %v4724_v10, %v8938_v51 }
 0x381   : > { %v3796_v23 = vpop.f32.mrb[24].mxu0  ;;  %v3886_v20 = vmax.f32 %v3842_v0, 0.0  ;;  %v4934_v4 = vsel %vm2503_vm5, %v4723_v3, 0.0 }
 0x382   : > { %v3797_v49 = vadd.f32 %v8170_v13, %v3796_v23  ;;  %v3798_v15 = vpop.f32.mrb[25].mxu0 }
 0x383   : > { %v4281_v37 = vrot.slane %v3886_v20, %v8938_v51  ;;  %v4274_v18 = vcombine.high %v3886_v20, %v3886_v20 }
 0x384   : > { %v3877_v28 = vmax.f32 %v3797_v49, 0.0 }
 0x385   : > { %v4289_v22 = vcombine.high %v4281_v37, %v4281_v37  ;;  %v4288_v24 = vrot.slane %v4274_v18, %v8938_v51 }
 0x386   : > { %v4121_v5 = vcombine.high %v3877_v28, %v3877_v28  ;;  %v4128_v16 = vrot.slane %v3877_v28, %v8938_v51 }
 0x387   : > { %v4725_v29 = vcombine.low %v4281_v37, %v4289_v22  ;;  %v3801_v39 = vpop.f32.mrb[26].mxu0  ;;  %v4290_v46 = vcombine.high %v4288_v24, %v4288_v24 }
 0x388   : > { %v4135_v56 = vrot.slane %v4121_v5, %v8938_v51  ;;  %v4136_v52 = vcombine.high %v4128_v16, %v4128_v16  ;;  %v4567_v47 = vcombine.low %v4120_v41, %v4128_v16  ;;  %v3802_v50 = vadd.f32 %v8170_v13, %v3801_v39  ;;  %v3803_v25 = vpop.f32.mrb[27].mxu0 }
 0x389   : > { %v4739_v27 = vrot.slane %v4725_v29, %v8938_v51  ;;  %v4741_v23 = vcombine.low %v4288_v24, %v4290_v46 }
 0x38a   : > { %v4137_v36 = vcombine.high %v4135_v56, %v4135_v56  ;;  %v4568_v11 = vcombine.low %v4136_v52, %v4135_v56  ;;  %v3878_v33 = vmax.f32 %v3802_v50, 0.0  ;;  %v4575_v61 = vrot.slane %v4567_v47, %v8938_v51 }
 0x38b   : > { %v4740_v19 = vcombine.low %v4732_v31, %v4739_v27  ;;  %v4749_v29 = vrot.slane %v4741_v23, %v8938_v51 }
 0x38c   : > { %v4582_v40 = vrot.slane %v4568_v11, %v8938_v51  ;;  %v4590_v32 = vrot.slane %v4137_v36, %v8938_v51  ;;  %v4138_v26 = vcombine.high %v3878_v33, %v3878_v33  ;;  %v4145_v57 = vrot.slane %v3878_v33, %v8938_v51 }
 0x38d   : > { %v4935_v35 = vsel %vm2503_vm5, %v4740_v19, 0.0 }
 0x38e   : > { %v4936_v45 = vadd.f32 %v4935_v35, %v4934_v4  ;;  %v4583_v53 = vcombine.low %v4575_v61, %v4582_v40  ;;  %v4900_v17 = vsel %vm4860_vm7, %v4590_v32, 0.0  ;;  %v4152_v48 = vrot.slane %v4138_v26, %v8938_v51 }
 0x38f   : > { %v4153_v0 = vcombine.high %v4145_v57, %v4145_v57 }
 0x390   : > { %v4898_v58 = vsel %vm2503_vm5, %v4583_v53, 0.0  ;;  %v4154_v54 = vcombine.high %v4152_v48, %v4152_v48 }
 0x391   : > { %v4899_v42 = vadd.f32 %v4898_v58, %v4897_v8  ;;  %v4591_v10 = vcombine.low %v4145_v57, %v4153_v0 }
 0x392   : > { %v4592_v20 = vcombine.low %v4152_v48, %v4154_v54 }
 0x393   : > { %v4901_v55 = vadd.f32 %v4900_v17, %v4899_v42  ;;  %v4599_v31 = vrot.slane %v4591_v10, %v8938_v51 }
 0x394   : > { %v4606_v39 = vrot.slane %v4592_v20, %v8938_v51 }
 0x395   : > { %v3846_v14 = vpop.f32.mrb[12].mxu1  ;;  %v4902_v1 = vrot.slane %v4901_v55, 4 }
 0x396   : > { %v3847_v34 = vadd.f32 %v8170_v13, %v3846_v14  ;;  %v3848_v62 = vpop.f32.mrb[13].mxu1  ;;  %v4607_v40 = vcombine.low %v4599_v31, %v4606_v39 }
 0x397   : > { %v4903_v63 = vadd.f32 %v4902_v1, %v4901_v55  ;;  %v3806_v7 = vpop.f32.mrb[28].mxu0 }
 0x398   : > { %v3887_v44 = vmax.f32 %v3847_v34, 0.0  ;;  %v3807_v21 = vadd.f32 %v8170_v13, %v3806_v7  ;;  %v3808_v2 = vpop.f32.mrb[29].mxu0  ;;  %v4908_v62 = vsel %vm2503_vm5, %v4607_v40, 0.0 }
 0x399   : > { %v4904_v30 = vrot.slane %v4903_v63, 2 }
 0x39a   : > { %v4291_v38 = vcombine.high %v3887_v44, %v3887_v44  ;;  %v4298_v8 = vrot.slane %v3887_v44, %v8938_v51  ;;  %v3879_v3 = vmax.f32 %v3807_v21, 0.0 }
 0x39b   : > { %v4905_v12 = vadd.f32 %v4904_v30, %v4903_v63 }
 0x39c   : > { %v4306_v49 = vcombine.high %v4298_v8, %v4298_v8  ;;  %v4155_v15 = vcombine.high %v3879_v3, %v3879_v3  ;;  %v4162_v37 = vrot.slane %v3879_v3, %v8938_v51  ;;  %v4305_v22 = vrot.slane %v4291_v38, %v8938_v51 }
 0x39d   : > { %v4906_v28 = vrot.slane %v4905_v12, 1 }
 0x39e   : > { %v4742_v5 = vcombine.low %v4298_v8, %v4306_v49  ;;  %v4169_v41 = vrot.slane %v4155_v15, %v8938_v51  ;;  %v4170_v16 = vcombine.high %v4162_v37, %v4162_v37  ;;  %v4764_v36 = vrot.slane %v4305_v22, %v8938_v51 }
 0x39f   : > { %v4907_v56 = vadd.f32 %v4906_v28, %v4905_v12  ;;  %v4307_v57 = vcombine.high %v4305_v22, %v4305_v22 }
 0x3a0   : > { %v4756_v52 = vrot.slane %v4742_v5, %v8938_v51  ;;  %v4171_v47 = vcombine.high %v4169_v41, %v4169_v41  ;;  %v4608_v50 = vcombine.low %v4162_v37, %v4170_v16  ;;  %v4939_v24 = vsel %vm4860_vm7, %v4764_v36, 0.0 }
 0x3a1   : > { %v4964_v25 = vmul.f32 0.03846154, %v4907_v56  ;;  %v4928_v5 = vrot.slane %v8310_v43, 4 }
 0x3a2   : > { %v4757_v27 = vcombine.low %v4749_v29, %v4756_v52  ;;  %v3851_v11 = vpop.f32.mrb[14].mxu1  ;;  %v4609_v19 = vcombine.low %v4169_v41, %v4171_v47  ;;  %v4616_v35 = vrot.slane %v4608_v50, %v8938_v51 }
 0x3a3   : > { %v3852_v33 = vadd.f32 %v8170_v13, %v3851_v11  ;;  %v3853_v61 = vpop.f32.mrb[15].mxu1  ;;  %v3811_v53 = vpop.f32.mrb[30].mxu0  ;;  %v8352_v32 = vsel %vm4996_vm11, %v4964_v25, %v8308_v60 }
 0x3a4   : > { %v4937_v4 = vsel %vm2503_vm5, %v4757_v27, 0.0  ;;  %v4623_v26 = vrot.slane %v4609_v19, %v8938_v51  ;;  %v3812_v42 = vadd.f32 %v8170_v13, %v3811_v53  ;;  %v3813_v17 = vpop.f32.mrb[31].mxu0  ;;  %v4648_v27 = vrot.slane %v8224_v6, %v8938_v51 }
 0x3a5   : > { %v4938_v18 = vadd.f32 %v4937_v4, %v4936_v45  ;;  %v3888_v58 = vmax.f32 %v3852_v33, 0.0  ;;  %v4929_v19 = vadd.f32 %v4928_v5, %v8310_v43 }
 0x3a6   : > { %v4624_v48 = vcombine.low %v4616_v35, %v4623_v26  ;;  %v3880_v34 = vmax.f32 %v3812_v42, 0.0  ;;  %v4913_v17 = vsel %vm4860_vm7, %v4648_v27, 0.0  ;;  %v5081_v27 = vld [vmem:[%s8441_s8 + $0x10] sm:$0xff] }
 0x3a7   : > { %v4940_v55 = vadd.f32 %v4939_v24, %v4938_v18  ;;  %v4308_v14 = vcombine.high %v3888_v58, %v3888_v58  ;;  %v4315_v1 = vrot.slane %v3888_v58, %v8938_v51  ;;  %v4930_v43 = vrot.slane %v4929_v19, 2 }
 0x3a8   : > { %v4909_v60 = vsel %vm2503_vm5, %v4624_v48, 0.0  ;;  %v4172_v7 = vcombine.high %v3880_v34, %v3880_v34  ;;  %v4179_v21 = vrot.slane %v3880_v34, %v8938_v51 }
 0x3a9   : > { %v4322_v45 = vrot.slane %v4308_v14, %v8938_v51  ;;  %v4323_v46 = vcombine.high %v4315_v1, %v4315_v1  ;;  %v3856_v63 = vpop.f32.mrb[16].mxu1  ;;  %v4910_v54 = vadd.f32 %v4909_v60, %v4908_v62  ;;  %v4765_v44 = vcombine.low %v4307_v57, %v4315_v1 }
 0x3aa   : > { %v3858_v2 = vpop.f32.mrb[17].mxu1  ;;  %v3857_v0 = vadd.f32 %v8170_v13, %v3856_v63  ;;  %v4186_v38 = vrot.slane %v4172_v7, %v8938_v51  ;;  %v4187_v8 = vcombine.high %v4179_v21, %v4179_v21  ;;  %v4941_v56 = vrot.slane %v4940_v55, 4 }
 0x3ab   : > { %v4766_v30 = vcombine.low %v4323_v46, %v4322_v45  ;;  %v4773_v3 = vrot.slane %v4765_v44, %v8938_v51  ;;  %v4324_v16 = vcombine.high %v4322_v45, %v4322_v45  ;;  %v4931_v46 = vadd.f32 %v4930_v43, %v4929_v19  ;;  %v5083_v19 = vld [vmem:[%s8441_s8 + $0x20] sm:$0xff] }
 0x3ac   : > { %v3889_v12 = vmax.f32 %v3857_v0, 0.0  ;;  %v4188_v20 = vcombine.high %v4186_v38, %v4186_v38  ;;  %v4625_v49 = vcombine.low %v4179_v21, %v4187_v8  ;;  %v4942_v40 = vadd.f32 %v4941_v56, %v4940_v55 }
 0x3ad   : > { %v4780_v23 = vrot.slane %v4766_v30, %v8938_v51  ;;  %v4932_v0 = vrot.slane %v4931_v46, 1 }
 0x3ae   : > { %v3861_v15 = vpop.f32.mrb[18].mxu1  ;;  %v4325_v28 = vcombine.high %v3889_v12, %v3889_v12  ;;  %v4332_v10 = vrot.slane %v3889_v12, %v8938_v51  ;;  %v4626_v41 = vcombine.low %v4186_v38, %v4188_v20  ;;  %v4633_v47 = vrot.slane %v4625_v49, %v8938_v51 }
 0x3af   : > { %v4781_v37 = vcombine.low %v4773_v3, %v4780_v23  ;;  %v3863_v22 = vpop.f32.mrb[19].mxu1  ;;  %v3862_v29 = vadd.f32 %v8170_v13, %v3861_v15  ;;  %v4943_v14 = vrot.slane %v4942_v40, 2  ;;  %v4933_v49 = vadd.f32 %v4932_v0, %v4931_v46 }
 0x3b0   : > { %v4339_v39 = vrot.slane %v4325_v28, %v8938_v51  ;;  %v4340_v52 = vcombine.high %v4332_v10, %v4332_v10  ;;  %v4640_v50 = vrot.slane %v4626_v41, %v8938_v51  ;;  %v4782_v25 = vcombine.low %v4324_v16, %v4332_v10 }
 0x3b1   : > { %v3890_v31 = vmax.f32 %v3862_v29, 0.0  ;;  %v4947_v55 = vsel %vm2503_vm5, %v4781_v37, 0.0  ;;  %v4944_v44 = vadd.f32 %v4943_v14, %v4942_v40  ;;  %v4966_v22 = vmul.f32 0.03846154, %v4933_v49 }
 0x3b2   : > { %v4783_v36 = vcombine.low %v4340_v52, %v4339_v39  ;;  %v4341_v11 = vcombine.high %v4339_v39, %v4339_v39  ;;  %v4641_v33 = vcombine.low %v4633_v47, %v4640_v50  ;;  %v4790_v4 = vrot.slane %v4782_v25, %v8938_v51  ;;  %v5079_v52 = vld [vmem:[%s8441_s8] sm:$0xff]  ;;  %v5080_v47 = vld [vmem:[%s8441_s8 + $0x8] sm:$0xff] }
 0x3b3   : > { %v4342_v61 = vcombine.high %v3890_v31, %v3890_v31  ;;  %v4349_v13 = vrot.slane %v3890_v31, %v8938_v51  ;;  %v4945_v8 = vrot.slane %v4944_v44, 1  ;;  %v5381_v31 = vpack.c.bf16 %v5080_v47, %v5079_v52 }
 0x3b4   : > { %v4797_v35 = vrot.slane %v4783_v36, %v8938_v51  ;;  %v4911_v53 = vsel %vm2503_vm5, %v4641_v33, 0.0  ;;  %v5084_v33 = vld [vmem:[%s8441_s8 + $0x28] sm:$0xff] }
 0x3b5   : > { %v4356_v18 = vrot.slane %v4342_v61, %v8938_v51  ;;  %v4357_v26 = vcombine.high %v4349_v13, %v4349_v13  ;;  %v4799_v58 = vcombine.low %v4341_v11, %v4349_v13  ;;  %v4912_v6 = vadd.f32 %v4911_v53, %v4910_v54  ;;  %v5086_v13 = vld [vmem:[%s8441_s8 + $0x38] sm:$0xff] }
 0x3b6   : > { %v4798_v42 = vcombine.low %v4790_v4, %v4797_v35  ;;  %v4946_v28 = vadd.f32 %v4945_v8, %v4944_v44  ;;  %v5387_v61 = vpack.c.bf16 %v5084_v33, %v5083_v19  ;;  %v5275_v4 = vld [vmem:[%s8440_s7] ss:$0 sm:$0xff] }
 0x3b7   : > { %v4358_v24 = vcombine.high %v4356_v18, %v4356_v18  ;;  %v4800_v48 = vcombine.low %v4357_v26, %v4356_v18  ;;  %v4914_v1 = vadd.f32 %v4913_v17, %v4912_v6  ;;  %v4807_v62 = vrot.slane %v4799_v58, %v8938_v51 }
 0x3b8   : > { %v4948_v57 = vsel %vm2503_vm5, %v4798_v42, 0.0  ;;  %v4967_v41 = vmul.f32 0.03846154, %v4946_v28 }
 0x3b9   : > { %v4949_v34 = vadd.f32 %v4948_v57, %v4947_v55  ;;  %v4814_v60 = vrot.slane %v4800_v48, %v8938_v51  ;;  %v4915_v45 = vrot.slane %v4914_v1, 4  ;;  %v4822_v54 = vrot.slane %v4358_v24, %v8938_v51 }
 0x3bb   : > { %v4815_v63 = vcombine.low %v4807_v62, %v4814_v60  ;;  %v4916_v7 = vadd.f32 %v4915_v45, %v4914_v1  ;;  %v4952_v38 = vsel %vm4860_vm7, %v4822_v54, 0.0 }
 0x3bd   : > { %v4950_v21 = vsel %vm2503_vm5, %v4815_v63, 0.0  ;;  %v4917_v2 = vrot.slane %v4916_v7, 2 }
 0x3be   : > { %v4951_v30 = vadd.f32 %v4950_v21, %v4949_v34 }
 0x3bf   : > { %v4918_v3 = vadd.f32 %v4917_v2, %v4916_v7 }
 0x3c0   : > { %v4953_v23 = vadd.f32 %v4952_v38, %v4951_v30 }
 0x3c1   : > { %v4919_v12 = vrot.slane %v4918_v3, 1 }
 0x3c2   : > { %v4954_v20 = vrot.slane %v4953_v23, 4 }
 0x3c3   : > { %v4920_v15 = vadd.f32 %v4919_v12, %v4918_v3 }
 0x3c4   : > { %v4955_v37 = vadd.f32 %v4954_v20, %v4953_v23 }
 0x3c5   : > { %v4965_v10 = vmul.f32 0.03846154, %v4920_v15 }
 0x3c6   : > { %v4956_v51 = vrot.slane %v4955_v37, 2 }
 0x3c7   : > { %v4999_v16 = vsel %vm4998_vm12, %v4965_v10, %v8352_v32  ;;  %v5082_v32 = vld [vmem:[%s8441_s8 + $0x18] sm:$0xff] }
 0x3c8   : > { %v4957_v5 = vadd.f32 %v4956_v51, %v4955_v37  ;;  %v5001_v29 = vsel %vm5000_vm13, %v4966_v22, %v4999_v16  ;;  %v5384_v11 = vpack.c.bf16 %v5082_v32, %v5081_v27 }
 0x3c9   : > { %v5003_v39 = vsel %vm5002_vm14, %v4967_v41, %v5001_v29 }
 0x3ca   : > { %v4958_v56 = vrot.slane %v4957_v5, 1 }
 0x3cc   : > { %v4959_v50 = vadd.f32 %v4958_v56, %v4957_v5 }
 0x3ce   : > { %v4968_v25 = vmul.f32 0.03846154, %v4959_v50 }
 0x3d0   : > { %v5005_v36 = vsel %vm5004_vm15, %v4968_v25, %v5003_v39 }
 0x3d1   : > { %5317 = vmatmul.mubr.msk.f32.vlgmr.msra.gmra.mrb[20].mxu1 %vm2503_vm5, %v5005_v36 }
 0x3d2   : > { %5382 = vmatpush3.bf16.msra.mxu1 %v5381_v31  ;;  %5335 = vmatprep.mubr.msk.f32.mxu1 %vm5446_vm9, %v5447_v59  ;;  %v5085_v59 = vld [vmem:[%s8441_s8 + $0x30] sm:$0xff] }
 0x3d3   : > { %5383 = vmatprep.subr.bf16.mxu1 %v8977_v9  ;;  %v5390_v40 = vpack.c.bf16 %v5086_v13, %v5085_v59 }
 0x3d6   : > { %5385 = vmatpush3.bf16.msra.mxu1 %v5384_v11 }
 0x3d7   : > { %5386 = vmatprep.subr.bf16.mxu1 %v8977_v9 }
 0x3da   : > { %5388 = vmatpush3.bf16.msra.mxu1 %v5387_v61 }
 0x3db   : > { %5389 = vmatprep.subr.bf16.mxu1 %v8977_v9  ;;  %v5277_v9 = vld [vmem:[%s8442_s9] ss:$0 sm:$0xff] }
 0x3de   : > { %5391 = vmatpush3.bf16.msra.mxu1 %v5390_v40 }
 0x4a4   : > { %v5074_v35 = vpop.f32.mrb[20].mxu1 }
 0x4a5   : > { %v5075_v53 = vadd.f32 %v5275_v4, %v5074_v35  ;;  %v5318_v18 = vpop.f32.mrb[21].mxu1 }
 0x4a7   : > { %v5078_v26 = vmax.f32 %v5075_v53, 0.0 }
 0x4a9   : > { %5336 = vmatmul.mubr.msk.f32.vlgmr.msra.gmra.mrb[22].mxu1 %vm2503_vm5, %v5078_v26 }
 0x57c   : > { %v5163_v58 = vpop.f32.mrb[22].mxu1 }
 0x57d   : > { %v5164_v6 = vadd.f32 %v5277_v9, %v5163_v58  ;;  %v5337_v42 = vpop.f32.mrb[23].mxu1 }
 0x57f   : > { %v5279_v17 = vmul.f32 -1.442695, %v5164_v6 }
 0x581   : > { %5427 = vpow2.f32 %v5279_v17 }
 0x58b   : > { %v5428_v43 = vpop.eup %5427 }
 0x58c   : > { %v5170_v24 = vadd.f32 1.0, %v5428_v43 }
 0x58e   : > { %5429 = vrcp.f32 %v5170_v24 }
 0x598   : > { %v5430_v48 = vpop.eup %5429 }
 0x599   : > { %5173 = vst [vmem:[%s371_s23] sm:$0xff] %v5430_v48 }
 0x59a PF: > { %s20_s13 = sadd.s32 1, %s5439_s13  }
 0x59b   : > { %p17_p4 = scmp.ge.s32.totalorder %s20_s13, 4  }
 0x59d   :  { %19 = sbr.rel (!%p17_p4) target bundleno = 1 (0x1), region = 93 }

</bundles_post_ra>
